<compile_context>
chip_gen: v6e
topology: v6e:2x2x1
jax: 0.10.0
libtpu: 0.0.40
codegen_flags: <defaults>
</compile_context>

<pallas_src>
import functools

import jax
import jax.numpy as jnp
from jax.experimental import pallas as pl
from jax.experimental.pallas import tpu as pltpu


def _round_up(x, m):
    return (x + m - 1) // m * m


# ----------------------------------------------------------------------------
# Tiled GEMM kernel with fused bias / PReLU / residual epilogue
# ----------------------------------------------------------------------------
def _gemm_kernel(*refs, apply_prelu, has_skip, skip_scale, res_scale):
    """refs = (a, w, bias, alpha[, skip], out, acc_scratch).

    a:(tm,tk)  w:(tk,tn)  bias,alpha:(1,tn)  skip,out:(tm,tn)  acc:(tm,tn) f32
    out = res_scale * act(A @ W + bias) + skip_scale * skip
    """
    if has_skip:
        a_ref, w_ref, b_ref, al_ref, skip_ref, o_ref, acc_ref = refs
    else:
        a_ref, w_ref, b_ref, al_ref, o_ref, acc_ref = refs
        skip_ref = None

    kstep = pl.program_id(2)

    @pl.when(kstep == 0)
    def _():
        acc_ref[...] = jnp.zeros(acc_ref.shape, jnp.float32)

    acc_ref[...] += jnp.dot(a_ref[...], w_ref[...],
                            preferred_element_type=jnp.float32)

    @pl.when(kstep == pl.num_programs(2) - 1)
    def _():
        acc = acc_ref[...] + b_ref[...]
        if apply_prelu:
            acc = jnp.where(acc >= 0.0, acc, al_ref[...] * acc)
        if res_scale != 1.0:
            acc = acc * res_scale
        if has_skip:
            acc = acc + skip_scale * skip_ref[...]
        o_ref[...] = acc.astype(o_ref.dtype)


def matmul_bias_act(a, w, b, alpha, *, apply_prelu, skip=None,
                    skip_scale=1.0, res_scale=1.0):
    """(M,K) @ (K,N) + bias, fused per-channel PReLU and optional residual."""
    M, K = a.shape
    K2, N = w.shape
    assert K == K2

    # Tile choice: <=256 x 128 x 512 keeps double-buffered VMEM use ~2 MiB,
    # safe on v7x's 64 MiB (32 MiB default scoped) and v5e's 16 MiB default,
    # while the 128-lane output tile gives unmasked, lane-dense stores.
    tm = min(256, _round_up(M, 8))
    tn = 128
    tk = min(512, _round_up(K, 128))
    Mp, Kp, Np = _round_up(M, tm), _round_up(K, tk), _round_up(N, tn)

    a_p = jnp.pad(a.astype(jnp.float32), ((0, Mp - M), (0, Kp - K)))
    w_p = jnp.pad(w.astype(jnp.float32), ((0, Kp - K), (0, Np - N)))
    b_p = jnp.pad(b.astype(jnp.float32).reshape(1, N), ((0, 0), (0, Np - N)))
    al_p = jnp.pad(alpha.astype(jnp.float32).reshape(1, N),
                   ((0, 0), (0, Np - N)))

    in_specs = [
        pl.BlockSpec((tm, tk), lambda i, j, k: (i, k)),
        pl.BlockSpec((tk, tn), lambda i, j, k: (k, j)),
        pl.BlockSpec((1, tn), lambda i, j, k: (0, j)),
        pl.BlockSpec((1, tn), lambda i, j, k: (0, j)),
    ]
    inputs = [a_p, w_p, b_p, al_p]
    has_skip = skip is not None
    if has_skip:
        skip_p = jnp.pad(skip.astype(jnp.float32).reshape(M, N),
                         ((0, Mp - M), (0, Np - N)))
        in_specs.append(pl.BlockSpec((tm, tn), lambda i, j, k: (i, j)))
        inputs.append(skip_p)

    kernel = functools.partial(
        _gemm_kernel, apply_prelu=apply_prelu, has_skip=has_skip,
        skip_scale=float(skip_scale), res_scale=float(res_scale))

    cost = pl.CostEstimate(
        flops=2 * Mp * Np * Kp, transcendentals=0,
        bytes_accessed=4 * (Mp * Kp + Kp * Np + (1 + int(has_skip)) * Mp * Np))

    out = pl.pallas_call(
        kernel,
        out_shape=jax.ShapeDtypeStruct((Mp, Np), jnp.float32),
        grid=(Mp // tm, Np // tn, Kp // tk),
        in_specs=in_specs,
        out_specs=pl.BlockSpec((tm, tn), lambda i, j, k: (i, j)),
        scratch_shapes=[pltpu.VMEM((tm, tn), jnp.float32)],
        compiler_params=pltpu.CompilerParams(
            dimension_semantics=("parallel", "parallel", "arbitrary")),
        cost_estimate=cost,
    )(*inputs)
    return out[:M, :N]


# ----------------------------------------------------------------------------
# Flash-style non-local attention kernel (online softmax)
# ----------------------------------------------------------------------------
def _nla_flash_kernel(e1_ref, e2_ref, asm_ref, o_ref, m_ref, l_ref, acc_ref,
                      *, hw, tk):
    """One (batch, q-tile, k-tile) step of softmax(e1 @ e2^T) @ asm."""
    kv = pl.program_id(2)

    @pl.when(kv == 0)
    def _():
        m_ref[...] = jnp.full(m_ref.shape, -jnp.inf, jnp.float32)
        l_ref[...] = jnp.zeros(l_ref.shape, jnp.float32)
        acc_ref[...] = jnp.zeros(acc_ref.shape, jnp.float32)

    e1 = e1_ref[0]                                   # (tq, Ch)
    e2 = e2_ref[0]                                   # (tk, Ch)
    asm = asm_ref[0]                                 # (tk, C)

    s = jax.lax.dot_general(e1, e2, (((1,), (1,)), ((), ())),
                            preferred_element_type=jnp.float32)   # (tq, tk)
    key_idx = kv * tk + jax.lax.broadcasted_iota(jnp.int32, s.shape, 1)
    s = jnp.where(key_idx < hw, s, -1e30)            # mask padded keys

    m_prev = m_ref[...]
    m_new = jnp.maximum(m_prev, jnp.max(s, axis=-1, keepdims=True))
    rescale = jnp.exp(m_prev - m_new)
    p = jnp.exp(s - m_new)
    l_ref[...] = rescale * l_ref[...] + jnp.sum(p, axis=-1, keepdims=True)
    acc_ref[...] = rescale * acc_ref[...] + jnp.dot(
        p, asm, preferred_element_type=jnp.float32)
    m_ref[...] = m_new

    @pl.when(kv == pl.num_programs(2) - 1)
    def _():
        o_ref[0] = (acc_ref[...] *
                    pl.reciprocal(l_ref[...], approx=True)).astype(o_ref.dtype)


def non_local_attention(e1, e2, asm):
    """e1,e2: (N,HW,Ch), asm: (N,HW,C) -> softmax(e1 @ e2^T, -1) @ asm."""
    Nb, HW, Ch = e1.shape
    C = asm.shape[-1]
    tq = min(256, _round_up(HW, 8))
    tk = min(512, _round_up(HW, 8))
    HWq, HWk = _round_up(HW, tq), _round_up(HW, tk)

    e1p = jnp.pad(e1, ((0, 0), (0, HWq - HW), (0, 0)))
    e2p = jnp.pad(e2, ((0, 0), (0, HWk - HW), (0, 0)))
    asmp = jnp.pad(asm, ((0, 0), (0, HWk - HW), (0, 0)))

    cost = pl.CostEstimate(
        flops=2 * Nb * HWq * HWk * (Ch + C),
        transcendentals=Nb * HWq * HWk,
        bytes_accessed=4 * (e1p.size + e2p.size + asmp.size + Nb * HWq * C))

    out = pl.pallas_call(
        functools.partial(_nla_flash_kernel, hw=HW, tk=tk),
        out_shape=jax.ShapeDtypeStruct((Nb, HWq, C), jnp.float32),
        grid=(Nb, HWq // tq, HWk // tk),
        in_specs=[
            pl.BlockSpec((1, tq, Ch), lambda b, q, k: (b, q, 0)),
            pl.BlockSpec((1, tk, Ch), lambda b, q, k: (b, k, 0)),
            pl.BlockSpec((1, tk, C), lambda b, q, k: (b, k, 0)),
        ],
        out_specs=pl.BlockSpec((1, tq, C), lambda b, q, k: (b, q, 0)),
        scratch_shapes=[
            pltpu.VMEM((tq, 1), jnp.float32),     # running max m
            pltpu.VMEM((tq, 1), jnp.float32),     # running denom l
            pltpu.VMEM((tq, C), jnp.float32),     # output accumulator
        ],
        compiler_params=pltpu.CompilerParams(
            dimension_semantics=("parallel", "parallel", "arbitrary")),
        cost_estimate=cost,
    )(e1p, e2p, asmp)
    return out[:, :HW, :]


# ----------------------------------------------------------------------------
# Conv helpers (NHWC glue in plain JAX, all GEMMs in Pallas)
# ----------------------------------------------------------------------------
def _im2col_nhwc(x, k, stride, pad):
    """x:(N,H,W,C) -> cols:(N*Ho*Wo, k*k*C), tap-major / channel-minor columns."""
    # TODO(synk): replace the materialized im2col with a shifted-window
    # accumulation grid axis (k*k 'arbitrary' steps over shifted input tiles)
    # to cut HBM traffic by ~k^2 for the k=3 / k=6 convs.
    Nb, H, W, C = x.shape
    xp = jnp.pad(x, ((0, 0), (pad, pad), (pad, pad), (0, 0)))
    Ho = (H + 2 * pad - k) // stride + 1
    Wo = (W + 2 * pad - k) // stride + 1
    patches = []
    for di in range(k):
        for dj in range(k):
            patches.append(
                xp[:, di:di + stride * (Ho - 1) + 1:stride,
                   dj:dj + stride * (Wo - 1) + 1:stride, :])
    cols = jnp.concatenate(patches, axis=-1)          # (N, Ho, Wo, k*k*C)
    return cols.reshape(Nb * Ho * Wo, k * k * C), Ho, Wo


def conv2d_nhwc(x, w, b, alpha=None, *, stride=1, pad=0, apply_prelu=False,
                skip=None, skip_scale=1.0, res_scale=1.0):
    """Conv2d on NHWC input, PyTorch-layout weight (O, C, k, k), fused epilogue."""
    Nb, H, W, C = x.shape
    O, Cw, k, k2 = w.shape
    assert C == Cw and k == k2
    if k == 1 and stride == 1 and pad == 0:
        cols, Ho, Wo = x.reshape(Nb * H * W, C), H, W   # 1x1 conv: no im2col
    else:
        cols, Ho, Wo = _im2col_nhwc(x, k, stride, pad)
    wmat = jnp.transpose(w, (2, 3, 1, 0)).reshape(k * k * C, O)
    if alpha is None:
        alpha_row = jnp.zeros((O,), jnp.float32)
    else:
        alpha_row = (jnp.asarray(alpha, jnp.float32).reshape(-1) *
                     jnp.ones((O,), jnp.float32))
    skip_flat = None if skip is None else skip.reshape(Nb * Ho * Wo, O)
    out = matmul_bias_act(cols, wmat, b, alpha_row, apply_prelu=apply_prelu,
                          skip=skip_flat, skip_scale=skip_scale,
                          res_scale=res_scale)
    return out.reshape(Nb, Ho, Wo, O)


def _polyphase_pack(w, b, alpha):
    """ConvTranspose2d(k=6, s=2, p=2) weight (C_in, C_out, 6, 6) -> the
    equivalent stride-1 3x3 conv weight with 4*C_out output channels
    (phase-major), plus matching bias and per-channel PReLU alpha rows."""
    c_in, c_out, k, _ = w.shape
    assert k == 6
    subs = []
    for rh in range(2):
        for rw in range(2):
            sub = jnp.flip(w[:, :, rh::2, rw::2], axis=(2, 3))   # (Cin,Cout,3,3)
            subs.append(jnp.transpose(sub, (1, 0, 2, 3)))        # (Cout,Cin,3,3)
    w_big = jnp.concatenate(subs, axis=0)                        # (4Cout,Cin,3,3)
    b_big = jnp.concatenate([b] * 4)
    a_big = alpha * jnp.ones((4 * c_out,), jnp.float32)
    return w_big, b_big, a_big


def _pixel_shuffle(y):
    """(N, H, W, 4C) phase-major -> (N, 2H, 2W, C)."""
    Nb, H, W, C4 = y.shape
    C = C4 // 4
    y = y.reshape(Nb, H, W, 2, 2, C)
    y = jnp.transpose(y, (0, 1, 3, 2, 4, 5))
    return y.reshape(Nb, 2 * H, 2 * W, C)


def _space_to_depth(x):
    """(N, 2H, 2W, C) -> (N, H, W, 4C) with the same phase ordering."""
    Nb, H2, W2, C = x.shape
    H, W = H2 // 2, W2 // 2
    x = x.reshape(Nb, H, 2, W, 2, C)
    x = jnp.transpose(x, (0, 1, 3, 2, 4, 5))
    return x.reshape(Nb, H, W, 4 * C)


def _fused_embedding_conv(x, p):
    """The three NonLocalAttention 1x1 conv+PReLU embeddings as one GEMM."""
    Nb, H, W, C = x.shape
    Ch = C // 2
    w_cat = jnp.concatenate([p["w_m1"].reshape(Ch, C),
                             p["w_m2"].reshape(Ch, C),
                             p["w_asm"].reshape(C, C)], axis=0).T    # (C, 2C)
    b_cat = jnp.concatenate([p["b_m1"], p["b_m2"], p["b_asm"]])
    a_cat = jnp.concatenate([p["a_m1"] * jnp.ones((Ch,), jnp.float32),
                             p["a_m2"] * jnp.ones((Ch,), jnp.float32),
                             p["a_asm"] * jnp.ones((C,), jnp.float32)])
    emb = matmul_bias_act(x.reshape(Nb * H * W, C), w_cat, b_cat, a_cat,
                          apply_prelu=True)                          # (NHW, 2C)
    HW = H * W
    e1 = emb[:, :Ch].reshape(Nb, HW, Ch)
    e2 = emb[:, Ch:C].reshape(Nb, HW, Ch)
    asm = emb[:, C:].reshape(Nb, HW, C)
    return e1, e2, asm


# ----------------------------------------------------------------------------
# RecurrentProjection forward (scale=2)
# ----------------------------------------------------------------------------
def recurrent_projection(x_nchw, p):
    x = jnp.transpose(x_nchw, (0, 2, 3, 1))           # NHWC internally
    Nb, H, W, C = x.shape

    # ---- MultisourceProjection ----
    # NonLocalAttention: fused 1x1 embeddings + flash-style softmax attention.
    e1, e2, asm = _fused_embedding_conv(x, p)
    nla = non_local_attention(e1, e2, asm).reshape(Nb, H, W, C)

    # upsample: ConvTranspose2d(k=6,s=2,p=2)+PReLU via polyphase conv + shuffle.
    w_up, b_up, a_up = _polyphase_pack(p["w_up"], p["b_up"], p["a_up"])
    down_map = _pixel_shuffle(
        conv2d_nhwc(nla, w_up, b_up, a_up, stride=1, pad=1, apply_prelu=True))

    # encoder ResBlock with fused skip: x_up = conv2(PReLU(conv1(dm))) + 2*dm
    # (err = res + dm ; final_map = dm + err).
    r = conv2d_nhwc(down_map, p["w_r1"], p["b_r1"], p["a_r"],
                    stride=1, pad=1, apply_prelu=True)
    x_up = conv2d_nhwc(r, p["w_r2"], p["b_r2"], None, stride=1, pad=1,
                       apply_prelu=False, skip=down_map, skip_scale=2.0)

    # ---- RecurrentProjection body (scale = 2) ----
    # down_sample_1 fused with the residual: diff = x - PReLU(conv(x_up) + b)
    diff = conv2d_nhwc(x_up, p["w_d1"], p["b_d1"], p["a_d1"], stride=2, pad=2,
                       apply_prelu=True, skip=x, skip_scale=1.0, res_scale=-1.0)

    # error_encode (polyphase deconv) with h_estimate = x_up + error_up fused
    # via a space-to-depth view of x_up as the GEMM skip input.
    w_ee, b_ee, a_ee = _polyphase_pack(p["w_ee"], p["b_ee"], p["a_ee"])
    h_pre = conv2d_nhwc(diff, w_ee, b_ee, a_ee, stride=1, pad=1,
                        apply_prelu=True, skip=_space_to_depth(x_up),
                        skip_scale=1.0)
    h_est = _pixel_shuffle(h_pre)                     # (N, 2H, 2W, C)

    # down_sample_2 + post_conv (BasicBlock conv3x3 + PReLU)
    h2 = conv2d_nhwc(h_est, p["w_d2"], p["b_d2"], p["a_d2"],
                     stride=2, pad=2, apply_prelu=True)
    out = conv2d_nhwc(h2, p["w_pc"], p["b_pc"], p["a_pc"],
                      stride=1, pad=1, apply_prelu=True)
    return jnp.transpose(out, (0, 3, 1, 2))           # back to NCHW


# ----------------------------------------------------------------------------
# Deterministic parameter init (synthetic; no checkpoint loading)
# ----------------------------------------------------------------------------
def init_params(key, C):
    ks = iter(jax.random.split(key, 24))

    def conv_init(o, c, ksz):
        kw, kb = jax.random.split(next(ks))
        w = jax.random.normal(kw, (o, c, ksz, ksz), jnp.float32) * 0.1
        b = jax.random.normal(kb, (o,), jnp.float32) * 0.01
        return w, b

    def deconv_init(ci, o, ksz):
        kw, kb = jax.random.split(next(ks))
        w = jax.random.normal(kw, (ci, o, ksz, ksz), jnp.float32) * 0.1
        b = jax.random.normal(kb, (o,), jnp.float32) * 0.01
        return w, b

    a = jnp.float32(0.25)  # nn.PReLU() default init
    p = {}
    # NonLocalAttention 1x1 convs
    p["w_m1"], p["b_m1"] = conv_init(C // 2, C, 1); p["a_m1"] = a
    p["w_m2"], p["b_m2"] = conv_init(C // 2, C, 1); p["a_m2"] = a
    p["w_asm"], p["b_asm"] = conv_init(C, C, 1); p["a_asm"] = a
    # MultisourceProjection upsample (ConvTranspose2d k=6 s=2 p=2)
    p["w_up"], p["b_up"] = deconv_init(C, C, 6); p["a_up"] = a
    # encoder ResBlock
    p["w_r1"], p["b_r1"] = conv_init(C, C, 3); p["a_r"] = a
    p["w_r2"], p["b_r2"] = conv_init(C, C, 3)
    # down_sample_1 / error_encode / down_sample_2
    p["w_d1"], p["b_d1"] = conv_init(C, C, 6); p["a_d1"] = a
    p["w_ee"], p["b_ee"] = deconv_init(C, C, 6); p["a_ee"] = a
    p["w_d2"], p["b_d2"] = conv_init(C, C, 6); p["a_d2"] = a
    # post_conv (BasicBlock: conv3x3 + PReLU, bias=True, bn=False)
    p["w_pc"], p["b_pc"] = conv_init(C, C, 3); p["a_pc"] = a
    return p


if __name__ == "__main__":
    key = jax.random.PRNGKey(0)
    k_param, k_x = jax.random.split(key)

    N, C, H, W = 2, 4, 8, 8            # small shapes consistent with the module
    params = init_params(k_param, C)
    x = jax.random.normal(k_x, (N, C, H, W), jnp.float32)

    fwd = jax.jit(recurrent_projection)
    out = jax.block_until_ready(fwd(x, params))

    assert out.shape == (N, C, H, W), out.shape
    assert out.dtype == jnp.float32
    assert bool(jnp.all(jnp.isfinite(out)))
    print("KERNEL_OK")
</pallas_src>

<mosaic_0001>
module attributes {stable_mosaic.version = 11 : i64} {
  func.func @_gemm_kernel(%arg0: i32, %arg1: i32, %arg2: i32, %arg3: memref<128x128xf32, #tpu.memory_space<vmem>>, %arg4: memref<128x128xf32, #tpu.memory_space<vmem>>, %arg5: memref<1x128xf32, #tpu.memory_space<vmem>>, %arg6: memref<1x128xf32, #tpu.memory_space<vmem>>, %arg7: memref<128x128xf32, #tpu.memory_space<vmem>>, %arg8: memref<128x128xf32, #tpu.memory_space<vmem>>) attributes {dimension_semantics = [#tpu.dimension_semantics<parallel>, #tpu.dimension_semantics<parallel>, #tpu.dimension_semantics<arbitrary>], iteration_bounds = array<i64: 1, 1, 1>, scalar_prefetch = 0 : i64, scratch_operands = 1 : i64, tpu.core_type = #tpu.core_type<tc>, window_params = [{transform_indices = @transform_0, window_bounds = array<i64: 128, 128>}, {transform_indices = @transform_1, window_bounds = array<i64: 128, 128>}, {transform_indices = @transform_2, window_bounds = array<i64: 1, 128>}, {transform_indices = @transform_3, window_bounds = array<i64: 1, 128>}, {transform_indices = @transform_4, window_bounds = array<i64: 128, 128>}]} {
    %c0_i32 = arith.constant 0 : i32
    %0 = arith.cmpi eq, %arg2, %c0_i32 : i32
    %1 = arith.extui %0 : i1 to i32
    %c0_i32_0 = arith.constant 0 : i32
    %2 = arith.cmpi ne, %1, %c0_i32_0 : i32
    scf.if %2 {
      %cst_10 = arith.constant 0.000000e+00 : f32
      %12 = vector.broadcast %cst_10 : f32 to vector<128x128xf32>
      %c0_11 = arith.constant 0 : index
      %c0_12 = arith.constant 0 : index
      %13 = vector.load %arg8[%c0_11, %c0_12] : memref<128x128xf32, #tpu.memory_space<vmem>>, vector<128x128xf32>
      tpu.vector_store %arg8[%c0_11, %c0_12], %12 {strides = array<i32>} : memref<128x128xf32, #tpu.memory_space<vmem>>, vector<128x128xf32>,
    } else {
    }
    %c0 = arith.constant 0 : index
    %c0_1 = arith.constant 0 : index
    %3 = vector.load %arg8[%c0, %c0_1] : memref<128x128xf32, #tpu.memory_space<vmem>>, vector<128x128xf32>
    %c0_2 = arith.constant 0 : index
    %c0_3 = arith.constant 0 : index
    %4 = vector.load %arg3[%c0_2, %c0_3] : memref<128x128xf32, #tpu.memory_space<vmem>>, vector<128x128xf32>
    %c0_4 = arith.constant 0 : index
    %c0_5 = arith.constant 0 : index
    %5 = vector.load %arg4[%c0_4, %c0_5] : memref<128x128xf32, #tpu.memory_space<vmem>>, vector<128x128xf32>
    %cst = arith.constant dense<0.000000e+00> : vector<128x128xf32>
    %6 = tpu.matmul %4, %5, %cst {dimension_numbers = #tpu.dot_dimension_numbers<[1], [0], [0], [1], [0, 0, 1, 1], [], []>} : vector<128x128xf32>, vector<128x128xf32>, vector<128x128xf32> -> vector<128x128xf32>
    %7 = arith.addf %3, %6 : vector<128x128xf32>
    %c0_6 = arith.constant 0 : index
    %c0_7 = arith.constant 0 : index
    %8 = vector.load %arg8[%c0_6, %c0_7] : memref<128x128xf32, #tpu.memory_space<vmem>>, vector<128x128xf32>
    tpu.vector_store %arg8[%c0_6, %c0_7], %7 {strides = array<i32>} : memref<128x128xf32, #tpu.memory_space<vmem>>, vector<128x128xf32>,
    %c0_i32_8 = arith.constant 0 : i32
    %9 = arith.cmpi eq, %arg2, %c0_i32_8 : i32
    %10 = arith.extui %9 : i1 to i32
    %c0_i32_9 = arith.constant 0 : i32
    %11 = arith.cmpi ne, %10, %c0_i32_9 : i32
    scf.if %11 {
      %c0_10 = arith.constant 0 : index
      %c0_11 = arith.constant 0 : index
      %12 = vector.load %arg8[%c0_10, %c0_11] : memref<128x128xf32, #tpu.memory_space<vmem>>, vector<128x128xf32>
      %c0_12 = arith.constant 0 : index
      %c0_13 = arith.constant 0 : index
      %13 = vector.load %arg5[%c0_12, %c0_13] : memref<1x128xf32, #tpu.memory_space<vmem>>, vector<1x128xf32>
      %14 = vector.broadcast %13 : vector<1x128xf32> to vector<128x128xf32>
      %15 = arith.addf %12, %14 : vector<128x128xf32>
      %cst_14 = arith.constant 0.000000e+00 : f32
      %16 = vector.broadcast %cst_14 : f32 to vector<128x128xf32>
      %17 = arith.cmpf oge, %15, %16 : vector<128x128xf32>
      %c0_15 = arith.constant 0 : index
      %c0_16 = arith.constant 0 : index
      %18 = vector.load %arg6[%c0_15, %c0_16] : memref<1x128xf32, #tpu.memory_space<vmem>>, vector<1x128xf32>
      %19 = vector.broadcast %18 : vector<1x128xf32> to vector<128x128xf32>
      %20 = arith.mulf %19, %15 : vector<128x128xf32>
      %21 = arith.select %17, %15, %20 : vector<128x128xi1>, vector<128x128xf32>
      %c0_17 = arith.constant 0 : index
      %c0_18 = arith.constant 0 : index
      %22 = vector.load %arg7[%c0_17, %c0_18] : memref<128x128xf32, #tpu.memory_space<vmem>>, vector<128x128xf32>
      tpu.vector_store %arg7[%c0_17, %c0_18], %21 {strides = array<i32>} : memref<128x128xf32, #tpu.memory_space<vmem>>, vector<128x128xf32>,
    } else {
    }
    return
  }
  func.func @transform_0(%arg0: i32, %arg1: i32, %arg2: i32) -> (i32, i32) {
    %c0_i32 = arith.constant 0 : i32
    return %arg0, %arg2 : i32, i32
  }
  func.func @transform_1(%arg0: i32, %arg1: i32, %arg2: i32) -> (i32, i32) {
    %c0_i32 = arith.constant 0 : i32
    return %arg2, %arg1 : i32, i32
  }
  func.func @transform_2(%arg0: i32, %arg1: i32, %arg2: i32) -> (i32, i32) {
    %c0_i32 = arith.constant 0 : i32
    %c0_i32_0 = arith.constant 0 : i32
    return %c0_i32, %arg1 : i32, i32
  }
  func.func @transform_3(%arg0: i32, %arg1: i32, %arg2: i32) -> (i32, i32) {
    %c0_i32 = arith.constant 0 : i32
    %c0_i32_0 = arith.constant 0 : i32
    return %c0_i32, %arg1 : i32, i32
  }
  func.func @transform_4(%arg0: i32, %arg1: i32, %arg2: i32) -> (i32, i32) {
    %c0_i32 = arith.constant 0 : i32
    return %arg0, %arg1 : i32, i32
  }
}

module attributes {stable_mosaic.version = 11 : i64} {
  func.func @_nla_flash_kernel(%arg0: i32, %arg1: i32, %arg2: i32, %arg3: memref<1x64x2xf32, #tpu.memory_space<vmem>>, %arg4: memref<1x64x2xf32, #tpu.memory_space<vmem>>, %arg5: memref<1x64x4xf32, #tpu.memory_space<vmem>>, %arg6: memref<1x64x4xf32, #tpu.memory_space<vmem>>, %arg7: memref<64x1xf32, #tpu.memory_space<vmem>>, %arg8: memref<64x1xf32, #tpu.memory_space<vmem>>, %arg9: memref<64x4xf32, #tpu.memory_space<vmem>>) attributes {dimension_semantics = [#tpu.dimension_semantics<parallel>, #tpu.dimension_semantics<parallel>, #tpu.dimension_semantics<arbitrary>], iteration_bounds = array<i64: 2, 1, 1>, scalar_prefetch = 0 : i64, scratch_operands = 3 : i64, tpu.core_type = #tpu.core_type<tc>, window_params = [{transform_indices = @transform_0, window_bounds = array<i64: 1, 64, 2>}, {transform_indices = @transform_1, window_bounds = array<i64: 1, 64, 2>}, {transform_indices = @transform_2, window_bounds = array<i64: 1, 64, 4>}, {transform_indices = @transform_3, window_bounds = array<i64: 1, 64, 4>}]} {
    %c0_i32 = arith.constant 0 : i32
    %0 = arith.cmpi eq, %arg2, %c0_i32 : i32
    %1 = arith.extui %0 : i1 to i32
    %c0_i32_0 = arith.constant 0 : i32
    %2 = arith.cmpi ne, %1, %c0_i32_0 : i32
    scf.if %2 {
      %cst_28 = arith.constant 0xFF800000 : f32
      %43 = vector.broadcast %cst_28 : f32 to vector<64x1xf32>
      %c0_29 = arith.constant 0 : index
      %c0_30 = arith.constant 0 : index
      %44 = vector.load %arg7[%c0_29, %c0_30] : memref<64x1xf32, #tpu.memory_space<vmem>>, vector<64x1xf32>
      tpu.vector_store %arg7[%c0_29, %c0_30], %43 {strides = array<i32>} : memref<64x1xf32, #tpu.memory_space<vmem>>, vector<64x1xf32>,
      %cst_31 = arith.constant 0.000000e+00 : f32
      %45 = vector.broadcast %cst_31 : f32 to vector<64x1xf32>
      %c0_32 = arith.constant 0 : index
      %c0_33 = arith.constant 0 : index
      %46 = vector.load %arg8[%c0_32, %c0_33] : memref<64x1xf32, #tpu.memory_space<vmem>>, vector<64x1xf32>
      tpu.vector_store %arg8[%c0_32, %c0_33], %45 {strides = array<i32>} : memref<64x1xf32, #tpu.memory_space<vmem>>, vector<64x1xf32>,
      %cst_34 = arith.constant 0.000000e+00 : f32
      %47 = vector.broadcast %cst_34 : f32 to vector<64x4xf32>
      %c0_35 = arith.constant 0 : index
      %c0_36 = arith.constant 0 : index
      %48 = vector.load %arg9[%c0_35, %c0_36] : memref<64x4xf32, #tpu.memory_space<vmem>>, vector<64x4xf32>
      tpu.vector_store %arg9[%c0_35, %c0_36], %47 {strides = array<i32>} : memref<64x4xf32, #tpu.memory_space<vmem>>, vector<64x4xf32>,
    } else {
    }
    %c0 = arith.constant 0 : index
    %c0_1 = arith.constant 0 : index
    %c0_2 = arith.constant 0 : index
    %3 = vector.load %arg3[%c0, %c0_1, %c0_2] : memref<1x64x2xf32, #tpu.memory_space<vmem>>, vector<1x64x2xf32>
    %4 = vector.shape_cast %3 : vector<1x64x2xf32> to vector<64x2xf32>
    %c0_3 = arith.constant 0 : index
    %c0_4 = arith.constant 0 : index
    %c0_5 = arith.constant 0 : index
    %5 = vector.load %arg4[%c0_3, %c0_4, %c0_5] : memref<1x64x2xf32, #tpu.memory_space<vmem>>, vector<1x64x2xf32>
    %6 = vector.shape_cast %5 : vector<1x64x2xf32> to vector<64x2xf32>
    %c0_6 = arith.constant 0 : index
    %c0_7 = arith.constant 0 : index
    %c0_8 = arith.constant 0 : index
    %7 = vector.load %arg5[%c0_6, %c0_7, %c0_8] : memref<1x64x4xf32, #tpu.memory_space<vmem>>, vector<1x64x4xf32>
    %8 = vector.shape_cast %7 : vector<1x64x4xf32> to vector<64x4xf32>
    %cst = arith.constant dense<0.000000e+00> : vector<64x64xf32>
    %9 = tpu.matmul %4, %6, %cst {dimension_numbers = #tpu.dot_dimension_numbers<[1], [1], [0], [0], [0, 0, 1, 0], [], []>} : vector<64x2xf32>, vector<64x2xf32>, vector<64x64xf32> -> vector<64x64xf32>
    %c64_i32 = arith.constant 64 : i32
    %10 = arith.muli %arg2, %c64_i32 : i32
    %11 = tpu.iota {dimensions = array<i32: 1>} : vector<64x64xi32>
    %12 = vector.broadcast %10 : i32 to vector<64x64xi32>
    %13 = arith.addi %12, %11 : vector<64x64xi32>
    %c64_i32_9 = arith.constant 64 : i32
    %14 = vector.broadcast %c64_i32_9 : i32 to vector<64x64xi32>
    %15 = arith.cmpi slt, %13, %14 : vector<64x64xi32>
    %cst_10 = arith.constant -1.000000e+30 : f32
    %16 = vector.broadcast %cst_10 : f32 to vector<64x64xf32>
    %17 = arith.select %15, %9, %16 : vector<64x64xi1>, vector<64x64xf32>
    %c0_11 = arith.constant 0 : index
    %c0_12 = arith.constant 0 : index
    %18 = vector.load %arg7[%c0_11, %c0_12] : memref<64x1xf32, #tpu.memory_space<vmem>>, vector<64x1xf32>
    %cst_13 = arith.constant dense<0xFF800000> : vector<64xf32>
    %19 = vector.multi_reduction <maximumf>, %17, %cst_13 [1] : vector<64x64xf32> to vector<64xf32>
    %20 = vector.shape_cast %19 : vector<64xf32> to vector<64x1xf32>
    %21 = arith.maximumf %18, %20 : vector<64x1xf32>
    %22 = arith.subf %18, %21 : vector<64x1xf32>
    %23 = math.exp %22 : vector<64x1xf32>
    %24 = vector.broadcast %21 : vector<64x1xf32> to vector<64x64xf32>
    %25 = arith.subf %17, %24 : vector<64x64xf32>
    %26 = math.exp %25 : vector<64x64xf32>
    %c0_14 = arith.constant 0 : index
    %c0_15 = arith.constant 0 : index
    %27 = vector.load %arg8[%c0_14, %c0_15] : memref<64x1xf32, #tpu.memory_space<vmem>>, vector<64x1xf32>
    %28 = arith.mulf %23, %27 : vector<64x1xf32>
    %cst_16 = arith.constant dense<0.000000e+00> : vector<64xf32>
    %29 = vector.multi_reduction <add>, %26, %cst_16 [1] : vector<64x64xf32> to vector<64xf32>
    %30 = vector.shape_cast %29 : vector<64xf32> to vector<64x1xf32>
    %31 = arith.addf %28, %30 : vector<64x1xf32>
    %c0_17 = arith.constant 0 : index
    %c0_18 = arith.constant 0 : index
    %32 = vector.load %arg8[%c0_17, %c0_18] : memref<64x1xf32, #tpu.memory_space<vmem>>, vector<64x1xf32>
    tpu.vector_store %arg8[%c0_17, %c0_18], %31 {strides = array<i32>} : memref<64x1xf32, #tpu.memory_space<vmem>>, vector<64x1xf32>,
    %c0_19 = arith.constant 0 : index
    %c0_20 = arith.constant 0 : index
    %33 = vector.load %arg9[%c0_19, %c0_20] : memref<64x4xf32, #tpu.memory_space<vmem>>, vector<64x4xf32>
    %34 = vector.broadcast %23 : vector<64x1xf32> to vector<64x4xf32>
    %35 = arith.mulf %34, %33 : vector<64x4xf32>
    %cst_21 = arith.constant dense<0.000000e+00> : vector<64x4xf32>
    %36 = tpu.matmul %26, %8, %cst_21 {dimension_numbers = #tpu.dot_dimension_numbers<[1], [0], [0], [1], [0, 0, 1, 1], [], []>} : vector<64x64xf32>, vector<64x4xf32>, vector<64x4xf32> -> vector<64x4xf32>
    %37 = arith.addf %35, %36 : vector<64x4xf32>
    %c0_22 = arith.constant 0 : index
    %c0_23 = arith.constant 0 : index
    %38 = vector.load %arg9[%c0_22, %c0_23] : memref<64x4xf32, #tpu.memory_space<vmem>>, vector<64x4xf32>
    tpu.vector_store %arg9[%c0_22, %c0_23], %37 {strides = array<i32>} : memref<64x4xf32, #tpu.memory_space<vmem>>, vector<64x4xf32>,
    %c0_24 = arith.constant 0 : index
    %c0_25 = arith.constant 0 : index
    %39 = vector.load %arg7[%c0_24, %c0_25] : memref<64x1xf32, #tpu.memory_space<vmem>>, vector<64x1xf32>
    tpu.vector_store %arg7[%c0_24, %c0_25], %21 {strides = array<i32>} : memref<64x1xf32, #tpu.memory_space<vmem>>, vector<64x1xf32>,
    %c0_i32_26 = arith.constant 0 : i32
    %40 = arith.cmpi eq, %arg2, %c0_i32_26 : i32
    %41 = arith.extui %40 : i1 to i32
    %c0_i32_27 = arith.constant 0 : i32
    %42 = arith.cmpi ne, %41, %c0_i32_27 : i32
    scf.if %42 {
      %c0_28 = arith.constant 0 : index
      %c0_29 = arith.constant 0 : index
      %43 = vector.load %arg9[%c0_28, %c0_29] : memref<64x4xf32, #tpu.memory_space<vmem>>, vector<64x4xf32>
      %c0_30 = arith.constant 0 : index
      %c0_31 = arith.constant 0 : index
      %44 = vector.load %arg8[%c0_30, %c0_31] : memref<64x1xf32, #tpu.memory_space<vmem>>, vector<64x1xf32>
      %45 = tpu.reciprocal %44 {approx = true} : vector<64x1xf32> -> vector<64x1xf32>
      %46 = vector.broadcast %45 : vector<64x1xf32> to vector<64x4xf32>
      %47 = arith.mulf %43, %46 : vector<64x4xf32>
      %c0_32 = arith.constant 0 : index
      %c0_33 = arith.constant 0 : index
      %c0_34 = arith.constant 0 : index
      %48 = vector.load %arg6[%c0_32, %c0_33, %c0_34] : memref<1x64x4xf32, #tpu.memory_space<vmem>>, vector<1x64x4xf32>
      %49 = vector.shape_cast %48 : vector<1x64x4xf32> to vector<64x4xf32>
      %50 = vector.shape_cast %47 : vector<64x4xf32> to vector<1x64x4xf32>
      tpu.vector_store %arg6[%c0_32, %c0_33, %c0_34], %50 {strides = array<i32>} : memref<1x64x4xf32, #tpu.memory_space<vmem>>, vector<1x64x4xf32>,
    } else {
    }
    return
  }
  func.func @transform_0(%arg0: i32, %arg1: i32, %arg2: i32) -> (i32, i32, i32) {
    %c0_i32 = arith.constant 0 : i32
    %c0_i32_0 = arith.constant 0 : i32
    return %arg0, %arg1, %c0_i32 : i32, i32, i32
  }
  func.func @transform_1(%arg0: i32, %arg1: i32, %arg2: i32) -> (i32, i32, i32) {
    %c0_i32 = arith.constant 0 : i32
    %c0_i32_0 = arith.constant 0 : i32
    return %arg0, %arg2, %c0_i32 : i32, i32, i32
  }
  func.func @transform_2(%arg0: i32, %arg1: i32, %arg2: i32) -> (i32, i32, i32) {
    %c0_i32 = arith.constant 0 : i32
    %c0_i32_0 = arith.constant 0 : i32
    return %arg0, %arg2, %c0_i32 : i32, i32, i32
  }
  func.func @transform_3(%arg0: i32, %arg1: i32, %arg2: i32) -> (i32, i32, i32) {
    %c0_i32 = arith.constant 0 : i32
    %c0_i32_0 = arith.constant 0 : i32
    return %arg0, %arg1, %c0_i32 : i32, i32, i32
  }
}

module attributes {stable_mosaic.version = 11 : i64} {
  func.func @_gemm_kernel(%arg0: i32, %arg1: i32, %arg2: i32, %arg3: memref<256x128xf32, #tpu.memory_space<vmem>>, %arg4: memref<128x128xf32, #tpu.memory_space<vmem>>, %arg5: memref<1x128xf32, #tpu.memory_space<vmem>>, %arg6: memref<1x128xf32, #tpu.memory_space<vmem>>, %arg7: memref<256x128xf32, #tpu.memory_space<vmem>>, %arg8: memref<256x128xf32, #tpu.memory_space<vmem>>) attributes {dimension_semantics = [#tpu.dimension_semantics<parallel>, #tpu.dimension_semantics<parallel>, #tpu.dimension_semantics<arbitrary>], iteration_bounds = array<i64: 2, 1, 1>, scalar_prefetch = 0 : i64, scratch_operands = 1 : i64, tpu.core_type = #tpu.core_type<tc>, window_params = [{transform_indices = @transform_0, window_bounds = array<i64: 256, 128>}, {transform_indices = @transform_1, window_bounds = array<i64: 128, 128>}, {transform_indices = @transform_2, window_bounds = array<i64: 1, 128>}, {transform_indices = @transform_3, window_bounds = array<i64: 1, 128>}, {transform_indices = @transform_4, window_bounds = array<i64: 256, 128>}]} {
    %c0_i32 = arith.constant 0 : i32
    %0 = arith.cmpi eq, %arg2, %c0_i32 : i32
    %1 = arith.extui %0 : i1 to i32
    %c0_i32_0 = arith.constant 0 : i32
    %2 = arith.cmpi ne, %1, %c0_i32_0 : i32
    scf.if %2 {
      %cst_10 = arith.constant 0.000000e+00 : f32
      %12 = vector.broadcast %cst_10 : f32 to vector<256x128xf32>
      %c0_11 = arith.constant 0 : index
      %c0_12 = arith.constant 0 : index
      %13 = vector.load %arg8[%c0_11, %c0_12] : memref<256x128xf32, #tpu.memory_space<vmem>>, vector<256x128xf32>
      tpu.vector_store %arg8[%c0_11, %c0_12], %12 {strides = array<i32>} : memref<256x128xf32, #tpu.memory_space<vmem>>, vector<256x128xf32>,
    } else {
    }
    %c0 = arith.constant 0 : index
    %c0_1 = arith.constant 0 : index
    %3 = vector.load %arg8[%c0, %c0_1] : memref<256x128xf32, #tpu.memory_space<vmem>>, vector<256x128xf32>
    %c0_2 = arith.constant 0 : index
    %c0_3 = arith.constant 0 : index
    %4 = vector.load %arg3[%c0_2, %c0_3] : memref<256x128xf32, #tpu.memory_space<vmem>>, vector<256x128xf32>
    %c0_4 = arith.constant 0 : index
    %c0_5 = arith.constant 0 : index
    %5 = vector.load %arg4[%c0_4, %c0_5] : memref<128x128xf32, #tpu.memory_space<vmem>>, vector<128x128xf32>
    %cst = arith.constant dense<0.000000e+00> : vector<256x128xf32>
    %6 = tpu.matmul %4, %5, %cst {dimension_numbers = #tpu.dot_dimension_numbers<[1], [0], [0], [1], [0, 0, 1, 1], [], []>} : vector<256x128xf32>, vector<128x128xf32>, vector<256x128xf32> -> vector<256x128xf32>
    %7 = arith.addf %3, %6 : vector<256x128xf32>
    %c0_6 = arith.constant 0 : index
    %c0_7 = arith.constant 0 : index
    %8 = vector.load %arg8[%c0_6, %c0_7] : memref<256x128xf32, #tpu.memory_space<vmem>>, vector<256x128xf32>
    tpu.vector_store %arg8[%c0_6, %c0_7], %7 {strides = array<i32>} : memref<256x128xf32, #tpu.memory_space<vmem>>, vector<256x128xf32>,
    %c0_i32_8 = arith.constant 0 : i32
    %9 = arith.cmpi eq, %arg2, %c0_i32_8 : i32
    %10 = arith.extui %9 : i1 to i32
    %c0_i32_9 = arith.constant 0 : i32
    %11 = arith.cmpi ne, %10, %c0_i32_9 : i32
    scf.if %11 {
      %c0_10 = arith.constant 0 : index
      %c0_11 = arith.constant 0 : index
      %12 = vector.load %arg8[%c0_10, %c0_11] : memref<256x128xf32, #tpu.memory_space<vmem>>, vector<256x128xf32>
      %c0_12 = arith.constant 0 : index
      %c0_13 = arith.constant 0 : index
      %13 = vector.load %arg5[%c0_12, %c0_13] : memref<1x128xf32, #tpu.memory_space<vmem>>, vector<1x128xf32>
      %14 = vector.broadcast %13 : vector<1x128xf32> to vector<256x128xf32>
      %15 = arith.addf %12, %14 : vector<256x128xf32>
      %cst_14 = arith.constant 0.000000e+00 : f32
      %16 = vector.broadcast %cst_14 : f32 to vector<256x128xf32>
      %17 = arith.cmpf oge, %15, %16 : vector<256x128xf32>
      %c0_15 = arith.constant 0 : index
      %c0_16 = arith.constant 0 : index
      %18 = vector.load %arg6[%c0_15, %c0_16] : memref<1x128xf32, #tpu.memory_space<vmem>>, vector<1x128xf32>
      %19 = vector.broadcast %18 : vector<1x128xf32> to vector<256x128xf32>
      %20 = arith.mulf %19, %15 : vector<256x128xf32>
      %21 = arith.select %17, %15, %20 : vector<256x128xi1>, vector<256x128xf32>
      %c0_17 = arith.constant 0 : index
      %c0_18 = arith.constant 0 : index
      %22 = vector.load %arg7[%c0_17, %c0_18] : memref<256x128xf32, #tpu.memory_space<vmem>>, vector<256x128xf32>
      tpu.vector_store %arg7[%c0_17, %c0_18], %21 {strides = array<i32>} : memref<256x128xf32, #tpu.memory_space<vmem>>, vector<256x128xf32>,
    } else {
    }
    return
  }
  func.func @transform_0(%arg0: i32, %arg1: i32, %arg2: i32) -> (i32, i32) {
    %c0_i32 = arith.constant 0 : i32
    return %arg0, %arg2 : i32, i32
  }
  func.func @transform_1(%arg0: i32, %arg1: i32, %arg2: i32) -> (i32, i32) {
    %c0_i32 = arith.constant 0 : i32
    return %arg2, %arg1 : i32, i32
  }
  func.func @transform_2(%arg0: i32, %arg1: i32, %arg2: i32) -> (i32, i32) {
    %c0_i32 = arith.constant 0 : i32
    %c0_i32_0 = arith.constant 0 : i32
    return %c0_i32, %arg1 : i32, i32
  }
  func.func @transform_3(%arg0: i32, %arg1: i32, %arg2: i32) -> (i32, i32) {
    %c0_i32 = arith.constant 0 : i32
    %c0_i32_0 = arith.constant 0 : i32
    return %c0_i32, %arg1 : i32, i32
  }
  func.func @transform_4(%arg0: i32, %arg1: i32, %arg2: i32) -> (i32, i32) {
    %c0_i32 = arith.constant 0 : i32
    return %arg0, %arg1 : i32, i32
  }
}

module attributes {stable_mosaic.version = 11 : i64} {
  func.func @_gemm_kernel(%arg0: i32, %arg1: i32, %arg2: i32, %arg3: memref<256x128xf32, #tpu.memory_space<vmem>>, %arg4: memref<128x128xf32, #tpu.memory_space<vmem>>, %arg5: memref<1x128xf32, #tpu.memory_space<vmem>>, %arg6: memref<1x128xf32, #tpu.memory_space<vmem>>, %arg7: memref<256x128xf32, #tpu.memory_space<vmem>>, %arg8: memref<256x128xf32, #tpu.memory_space<vmem>>, %arg9: memref<256x128xf32, #tpu.memory_space<vmem>>) attributes {dimension_semantics = [#tpu.dimension_semantics<parallel>, #tpu.dimension_semantics<parallel>, #tpu.dimension_semantics<arbitrary>], iteration_bounds = array<i64: 2, 1, 1>, scalar_prefetch = 0 : i64, scratch_operands = 1 : i64, tpu.core_type = #tpu.core_type<tc>, window_params = [{transform_indices = @transform_0, window_bounds = array<i64: 256, 128>}, {transform_indices = @transform_1, window_bounds = array<i64: 128, 128>}, {transform_indices = @transform_2, window_bounds = array<i64: 1, 128>}, {transform_indices = @transform_3, window_bounds = array<i64: 1, 128>}, {transform_indices = @transform_4, window_bounds = array<i64: 256, 128>}, {transform_indices = @transform_5, window_bounds = array<i64: 256, 128>}]} {
    %c0_i32 = arith.constant 0 : i32
    %0 = arith.cmpi eq, %arg2, %c0_i32 : i32
    %1 = arith.extui %0 : i1 to i32
    %c0_i32_0 = arith.constant 0 : i32
    %2 = arith.cmpi ne, %1, %c0_i32_0 : i32
    scf.if %2 {
      %cst_10 = arith.constant 0.000000e+00 : f32
      %12 = vector.broadcast %cst_10 : f32 to vector<256x128xf32>
      %c0_11 = arith.constant 0 : index
      %c0_12 = arith.constant 0 : index
      %13 = vector.load %arg9[%c0_11, %c0_12] : memref<256x128xf32, #tpu.memory_space<vmem>>, vector<256x128xf32>
      tpu.vector_store %arg9[%c0_11, %c0_12], %12 {strides = array<i32>} : memref<256x128xf32, #tpu.memory_space<vmem>>, vector<256x128xf32>,
    } else {
    }
    %c0 = arith.constant 0 : index
    %c0_1 = arith.constant 0 : index
    %3 = vector.load %arg9[%c0, %c0_1] : memref<256x128xf32, #tpu.memory_space<vmem>>, vector<256x128xf32>
    %c0_2 = arith.constant 0 : index
    %c0_3 = arith.constant 0 : index
    %4 = vector.load %arg3[%c0_2, %c0_3] : memref<256x128xf32, #tpu.memory_space<vmem>>, vector<256x128xf32>
    %c0_4 = arith.constant 0 : index
    %c0_5 = arith.constant 0 : index
    %5 = vector.load %arg4[%c0_4, %c0_5] : memref<128x128xf32, #tpu.memory_space<vmem>>, vector<128x128xf32>
    %cst = arith.constant dense<0.000000e+00> : vector<256x128xf32>
    %6 = tpu.matmul %4, %5, %cst {dimension_numbers = #tpu.dot_dimension_numbers<[1], [0], [0], [1], [0, 0, 1, 1], [], []>} : vector<256x128xf32>, vector<128x128xf32>, vector<256x128xf32> -> vector<256x128xf32>
    %7 = arith.addf %3, %6 : vector<256x128xf32>
    %c0_6 = arith.constant 0 : index
    %c0_7 = arith.constant 0 : index
    %8 = vector.load %arg9[%c0_6, %c0_7] : memref<256x128xf32, #tpu.memory_space<vmem>>, vector<256x128xf32>
    tpu.vector_store %arg9[%c0_6, %c0_7], %7 {strides = array<i32>} : memref<256x128xf32, #tpu.memory_space<vmem>>, vector<256x128xf32>,
    %c0_i32_8 = arith.constant 0 : i32
    %9 = arith.cmpi eq, %arg2, %c0_i32_8 : i32
    %10 = arith.extui %9 : i1 to i32
    %c0_i32_9 = arith.constant 0 : i32
    %11 = arith.cmpi ne, %10, %c0_i32_9 : i32
    scf.if %11 {
      %c0_10 = arith.constant 0 : index
      %c0_11 = arith.constant 0 : index
      %12 = vector.load %arg9[%c0_10, %c0_11] : memref<256x128xf32, #tpu.memory_space<vmem>>, vector<256x128xf32>
      %c0_12 = arith.constant 0 : index
      %c0_13 = arith.constant 0 : index
      %13 = vector.load %arg5[%c0_12, %c0_13] : memref<1x128xf32, #tpu.memory_space<vmem>>, vector<1x128xf32>
      %14 = vector.broadcast %13 : vector<1x128xf32> to vector<256x128xf32>
      %15 = arith.addf %12, %14 : vector<256x128xf32>
      %c0_14 = arith.constant 0 : index
      %c0_15 = arith.constant 0 : index
      %16 = vector.load %arg7[%c0_14, %c0_15] : memref<256x128xf32, #tpu.memory_space<vmem>>, vector<256x128xf32>
      %cst_16 = arith.constant 2.000000e+00 : f32
      %17 = vector.broadcast %cst_16 : f32 to vector<256x128xf32>
      %18 = arith.mulf %17, %16 : vector<256x128xf32>
      %19 = arith.addf %15, %18 : vector<256x128xf32>
      %c0_17 = arith.constant 0 : index
      %c0_18 = arith.constant 0 : index
      %20 = vector.load %arg8[%c0_17, %c0_18] : memref<256x128xf32, #tpu.memory_space<vmem>>, vector<256x128xf32>
      tpu.vector_store %arg8[%c0_17, %c0_18], %19 {strides = array<i32>} : memref<256x128xf32, #tpu.memory_space<vmem>>, vector<256x128xf32>,
    } else {
    }
    return
  }
  func.func @transform_0(%arg0: i32, %arg1: i32, %arg2: i32) -> (i32, i32) {
    %c0_i32 = arith.constant 0 : i32
    return %arg0, %arg2 : i32, i32
  }
  func.func @transform_1(%arg0: i32, %arg1: i32, %arg2: i32) -> (i32, i32) {
    %c0_i32 = arith.constant 0 : i32
    return %arg2, %arg1 : i32, i32
  }
  func.func @transform_2(%arg0: i32, %arg1: i32, %arg2: i32) -> (i32, i32) {
    %c0_i32 = arith.constant 0 : i32
    %c0_i32_0 = arith.constant 0 : i32
    return %c0_i32, %arg1 : i32, i32
  }
  func.func @transform_3(%arg0: i32, %arg1: i32, %arg2: i32) -> (i32, i32) {
    %c0_i32 = arith.constant 0 : i32
    %c0_i32_0 = arith.constant 0 : i32
    return %c0_i32, %arg1 : i32, i32
  }
  func.func @transform_4(%arg0: i32, %arg1: i32, %arg2: i32) -> (i32, i32) {
    %c0_i32 = arith.constant 0 : i32
    return %arg0, %arg1 : i32, i32
  }
  func.func @transform_5(%arg0: i32, %arg1: i32, %arg2: i32) -> (i32, i32) {
    %c0_i32 = arith.constant 0 : i32
    return %arg0, %arg1 : i32, i32
  }
}

module attributes {stable_mosaic.version = 11 : i64} {
  func.func @_gemm_kernel(%arg0: i32, %arg1: i32, %arg2: i32, %arg3: memref<128x256xf32, #tpu.memory_space<vmem>>, %arg4: memref<256x128xf32, #tpu.memory_space<vmem>>, %arg5: memref<1x128xf32, #tpu.memory_space<vmem>>, %arg6: memref<1x128xf32, #tpu.memory_space<vmem>>, %arg7: memref<128x128xf32, #tpu.memory_space<vmem>>, %arg8: memref<128x128xf32, #tpu.memory_space<vmem>>, %arg9: memref<128x128xf32, #tpu.memory_space<vmem>>) attributes {dimension_semantics = [#tpu.dimension_semantics<parallel>, #tpu.dimension_semantics<parallel>, #tpu.dimension_semantics<arbitrary>], iteration_bounds = array<i64: 1, 1, 1>, scalar_prefetch = 0 : i64, scratch_operands = 1 : i64, tpu.core_type = #tpu.core_type<tc>, window_params = [{transform_indices = @transform_0, window_bounds = array<i64: 128, 256>}, {transform_indices = @transform_1, window_bounds = array<i64: 256, 128>}, {transform_indices = @transform_2, window_bounds = array<i64: 1, 128>}, {transform_indices = @transform_3, window_bounds = array<i64: 1, 128>}, {transform_indices = @transform_4, window_bounds = array<i64: 128, 128>}, {transform_indices = @transform_5, window_bounds = array<i64: 128, 128>}]} {
    %c0_i32 = arith.constant 0 : i32
    %0 = arith.cmpi eq, %arg2, %c0_i32 : i32
    %1 = arith.extui %0 : i1 to i32
    %c0_i32_0 = arith.constant 0 : i32
    %2 = arith.cmpi ne, %1, %c0_i32_0 : i32
    scf.if %2 {
      %cst_10 = arith.constant 0.000000e+00 : f32
      %12 = vector.broadcast %cst_10 : f32 to vector<128x128xf32>
      %c0_11 = arith.constant 0 : index
      %c0_12 = arith.constant 0 : index
      %13 = vector.load %arg9[%c0_11, %c0_12] : memref<128x128xf32, #tpu.memory_space<vmem>>, vector<128x128xf32>
      tpu.vector_store %arg9[%c0_11, %c0_12], %12 {strides = array<i32>} : memref<128x128xf32, #tpu.memory_space<vmem>>, vector<128x128xf32>,
    } else {
    }
    %c0 = arith.constant 0 : index
    %c0_1 = arith.constant 0 : index
    %3 = vector.load %arg9[%c0, %c0_1] : memref<128x128xf32, #tpu.memory_space<vmem>>, vector<128x128xf32>
    %c0_2 = arith.constant 0 : index
    %c0_3 = arith.constant 0 : index
    %4 = vector.load %arg3[%c0_2, %c0_3] : memref<128x256xf32, #tpu.memory_space<vmem>>, vector<128x256xf32>
    %c0_4 = arith.constant 0 : index
    %c0_5 = arith.constant 0 : index
    %5 = vector.load %arg4[%c0_4, %c0_5] : memref<256x128xf32, #tpu.memory_space<vmem>>, vector<256x128xf32>
    %cst = arith.constant dense<0.000000e+00> : vector<128x128xf32>
    %6 = tpu.matmul %4, %5, %cst {dimension_numbers = #tpu.dot_dimension_numbers<[1], [0], [0], [1], [0, 0, 1, 1], [], []>} : vector<128x256xf32>, vector<256x128xf32>, vector<128x128xf32> -> vector<128x128xf32>
    %7 = arith.addf %3, %6 : vector<128x128xf32>
    %c0_6 = arith.constant 0 : index
    %c0_7 = arith.constant 0 : index
    %8 = vector.load %arg9[%c0_6, %c0_7] : memref<128x128xf32, #tpu.memory_space<vmem>>, vector<128x128xf32>
    tpu.vector_store %arg9[%c0_6, %c0_7], %7 {strides = array<i32>} : memref<128x128xf32, #tpu.memory_space<vmem>>, vector<128x128xf32>,
    %c0_i32_8 = arith.constant 0 : i32
    %9 = arith.cmpi eq, %arg2, %c0_i32_8 : i32
    %10 = arith.extui %9 : i1 to i32
    %c0_i32_9 = arith.constant 0 : i32
    %11 = arith.cmpi ne, %10, %c0_i32_9 : i32
    scf.if %11 {
      %c0_10 = arith.constant 0 : index
      %c0_11 = arith.constant 0 : index
      %12 = vector.load %arg9[%c0_10, %c0_11] : memref<128x128xf32, #tpu.memory_space<vmem>>, vector<128x128xf32>
      %c0_12 = arith.constant 0 : index
      %c0_13 = arith.constant 0 : index
      %13 = vector.load %arg5[%c0_12, %c0_13] : memref<1x128xf32, #tpu.memory_space<vmem>>, vector<1x128xf32>
      %14 = vector.broadcast %13 : vector<1x128xf32> to vector<128x128xf32>
      %15 = arith.addf %12, %14 : vector<128x128xf32>
      %cst_14 = arith.constant 0.000000e+00 : f32
      %16 = vector.broadcast %cst_14 : f32 to vector<128x128xf32>
      %17 = arith.cmpf oge, %15, %16 : vector<128x128xf32>
      %c0_15 = arith.constant 0 : index
      %c0_16 = arith.constant 0 : index
      %18 = vector.load %arg6[%c0_15, %c0_16] : memref<1x128xf32, #tpu.memory_space<vmem>>, vector<1x128xf32>
      %19 = vector.broadcast %18 : vector<1x128xf32> to vector<128x128xf32>
      %20 = arith.mulf %19, %15 : vector<128x128xf32>
      %21 = arith.select %17, %15, %20 : vector<128x128xi1>, vector<128x128xf32>
      %cst_17 = arith.constant -1.000000e+00 : f32
      %22 = vector.broadcast %cst_17 : f32 to vector<128x128xf32>
      %23 = arith.mulf %21, %22 : vector<128x128xf32>
      %c0_18 = arith.constant 0 : index
      %c0_19 = arith.constant 0 : index
      %24 = vector.load %arg7[%c0_18, %c0_19] : memref<128x128xf32, #tpu.memory_space<vmem>>, vector<128x128xf32>
      %cst_20 = arith.constant 1.000000e+00 : f32
      %25 = vector.broadcast %cst_20 : f32 to vector<128x128xf32>
      %26 = arith.mulf %25, %24 : vector<128x128xf32>
      %27 = arith.addf %23, %26 : vector<128x128xf32>
      %c0_21 = arith.constant 0 : index
      %c0_22 = arith.constant 0 : index
      %28 = vector.load %arg8[%c0_21, %c0_22] : memref<128x128xf32, #tpu.memory_space<vmem>>, vector<128x128xf32>
      tpu.vector_store %arg8[%c0_21, %c0_22], %27 {strides = array<i32>} : memref<128x128xf32, #tpu.memory_space<vmem>>, vector<128x128xf32>,
    } else {
    }
    return
  }
  func.func @transform_0(%arg0: i32, %arg1: i32, %arg2: i32) -> (i32, i32) {
    %c0_i32 = arith.constant 0 : i32
    return %arg0, %arg2 : i32, i32
  }
  func.func @transform_1(%arg0: i32, %arg1: i32, %arg2: i32) -> (i32, i32) {
    %c0_i32 = arith.constant 0 : i32
    return %arg2, %arg1 : i32, i32
  }
  func.func @transform_2(%arg0: i32, %arg1: i32, %arg2: i32) -> (i32, i32) {
    %c0_i32 = arith.constant 0 : i32
    %c0_i32_0 = arith.constant 0 : i32
    return %c0_i32, %arg1 : i32, i32
  }
  func.func @transform_3(%arg0: i32, %arg1: i32, %arg2: i32) -> (i32, i32) {
    %c0_i32 = arith.constant 0 : i32
    %c0_i32_0 = arith.constant 0 : i32
    return %c0_i32, %arg1 : i32, i32
  }
  func.func @transform_4(%arg0: i32, %arg1: i32, %arg2: i32) -> (i32, i32) {
    %c0_i32 = arith.constant 0 : i32
    return %arg0, %arg1 : i32, i32
  }
  func.func @transform_5(%arg0: i32, %arg1: i32, %arg2: i32) -> (i32, i32) {
    %c0_i32 = arith.constant 0 : i32
    return %arg0, %arg1 : i32, i32
  }
}

module attributes {stable_mosaic.version = 11 : i64} {
  func.func @_gemm_kernel(%arg0: i32, %arg1: i32, %arg2: i32, %arg3: memref<128x128xf32, #tpu.memory_space<vmem>>, %arg4: memref<128x128xf32, #tpu.memory_space<vmem>>, %arg5: memref<1x128xf32, #tpu.memory_space<vmem>>, %arg6: memref<1x128xf32, #tpu.memory_space<vmem>>, %arg7: memref<128x128xf32, #tpu.memory_space<vmem>>, %arg8: memref<128x128xf32, #tpu.memory_space<vmem>>, %arg9: memref<128x128xf32, #tpu.memory_space<vmem>>) attributes {dimension_semantics = [#tpu.dimension_semantics<parallel>, #tpu.dimension_semantics<parallel>, #tpu.dimension_semantics<arbitrary>], iteration_bounds = array<i64: 1, 1, 1>, scalar_prefetch = 0 : i64, scratch_operands = 1 : i64, tpu.core_type = #tpu.core_type<tc>, window_params = [{transform_indices = @transform_0, window_bounds = array<i64: 128, 128>}, {transform_indices = @transform_1, window_bounds = array<i64: 128, 128>}, {transform_indices = @transform_2, window_bounds = array<i64: 1, 128>}, {transform_indices = @transform_3, window_bounds = array<i64: 1, 128>}, {transform_indices = @transform_4, window_bounds = array<i64: 128, 128>}, {transform_indices = @transform_5, window_bounds = array<i64: 128, 128>}]} {
    %c0_i32 = arith.constant 0 : i32
    %0 = arith.cmpi eq, %arg2, %c0_i32 : i32
    %1 = arith.extui %0 : i1 to i32
    %c0_i32_0 = arith.constant 0 : i32
    %2 = arith.cmpi ne, %1, %c0_i32_0 : i32
    scf.if %2 {
      %cst_10 = arith.constant 0.000000e+00 : f32
      %12 = vector.broadcast %cst_10 : f32 to vector<128x128xf32>
      %c0_11 = arith.constant 0 : index
      %c0_12 = arith.constant 0 : index
      %13 = vector.load %arg9[%c0_11, %c0_12] : memref<128x128xf32, #tpu.memory_space<vmem>>, vector<128x128xf32>
      tpu.vector_store %arg9[%c0_11, %c0_12], %12 {strides = array<i32>} : memref<128x128xf32, #tpu.memory_space<vmem>>, vector<128x128xf32>,
    } else {
    }
    %c0 = arith.constant 0 : index
    %c0_1 = arith.constant 0 : index
    %3 = vector.load %arg9[%c0, %c0_1] : memref<128x128xf32, #tpu.memory_space<vmem>>, vector<128x128xf32>
    %c0_2 = arith.constant 0 : index
    %c0_3 = arith.constant 0 : index
    %4 = vector.load %arg3[%c0_2, %c0_3] : memref<128x128xf32, #tpu.memory_space<vmem>>, vector<128x128xf32>
    %c0_4 = arith.constant 0 : index
    %c0_5 = arith.constant 0 : index
    %5 = vector.load %arg4[%c0_4, %c0_5] : memref<128x128xf32, #tpu.memory_space<vmem>>, vector<128x128xf32>
    %cst = arith.constant dense<0.000000e+00> : vector<128x128xf32>
    %6 = tpu.matmul %4, %5, %cst {dimension_numbers = #tpu.dot_dimension_numbers<[1], [0], [0], [1], [0, 0, 1, 1], [], []>} : vector<128x128xf32>, vector<128x128xf32>, vector<128x128xf32> -> vector<128x128xf32>
    %7 = arith.addf %3, %6 : vector<128x128xf32>
    %c0_6 = arith.constant 0 : index
    %c0_7 = arith.constant 0 : index
    %8 = vector.load %arg9[%c0_6, %c0_7] : memref<128x128xf32, #tpu.memory_space<vmem>>, vector<128x128xf32>
    tpu.vector_store %arg9[%c0_6, %c0_7], %7 {strides = array<i32>} : memref<128x128xf32, #tpu.memory_space<vmem>>, vector<128x128xf32>,
    %c0_i32_8 = arith.constant 0 : i32
    %9 = arith.cmpi eq, %arg2, %c0_i32_8 : i32
    %10 = arith.extui %9 : i1 to i32
    %c0_i32_9 = arith.constant 0 : i32
    %11 = arith.cmpi ne, %10, %c0_i32_9 : i32
    scf.if %11 {
      %c0_10 = arith.constant 0 : index
      %c0_11 = arith.constant 0 : index
      %12 = vector.load %arg9[%c0_10, %c0_11] : memref<128x128xf32, #tpu.memory_space<vmem>>, vector<128x128xf32>
      %c0_12 = arith.constant 0 : index
      %c0_13 = arith.constant 0 : index
      %13 = vector.load %arg5[%c0_12, %c0_13] : memref<1x128xf32, #tpu.memory_space<vmem>>, vector<1x128xf32>
      %14 = vector.broadcast %13 : vector<1x128xf32> to vector<128x128xf32>
      %15 = arith.addf %12, %14 : vector<128x128xf32>
      %cst_14 = arith.constant 0.000000e+00 : f32
      %16 = vector.broadcast %cst_14 : f32 to vector<128x128xf32>
      %17 = arith.cmpf oge, %15, %16 : vector<128x128xf32>
      %c0_15 = arith.constant 0 : index
      %c0_16 = arith.constant 0 : index
      %18 = vector.load %arg6[%c0_15, %c0_16] : memref<1x128xf32, #tpu.memory_space<vmem>>, vector<1x128xf32>
      %19 = vector.broadcast %18 : vector<1x128xf32> to vector<128x128xf32>
      %20 = arith.mulf %19, %15 : vector<128x128xf32>
      %21 = arith.select %17, %15, %20 : vector<128x128xi1>, vector<128x128xf32>
      %c0_17 = arith.constant 0 : index
      %c0_18 = arith.constant 0 : index
      %22 = vector.load %arg7[%c0_17, %c0_18] : memref<128x128xf32, #tpu.memory_space<vmem>>, vector<128x128xf32>
      %cst_19 = arith.constant 1.000000e+00 : f32
      %23 = vector.broadcast %cst_19 : f32 to vector<128x128xf32>
      %24 = arith.mulf %23, %22 : vector<128x128xf32>
      %25 = arith.addf %21, %24 : vector<128x128xf32>
      %c0_20 = arith.constant 0 : index
      %c0_21 = arith.constant 0 : index
      %26 = vector.load %arg8[%c0_20, %c0_21] : memref<128x128xf32, #tpu.memory_space<vmem>>, vector<128x128xf32>
      tpu.vector_store %arg8[%c0_20, %c0_21], %25 {strides = array<i32>} : memref<128x128xf32, #tpu.memory_space<vmem>>, vector<128x128xf32>,
    } else {
    }
    return
  }
  func.func @transform_0(%arg0: i32, %arg1: i32, %arg2: i32) -> (i32, i32) {
    %c0_i32 = arith.constant 0 : i32
    return %arg0, %arg2 : i32, i32
  }
  func.func @transform_1(%arg0: i32, %arg1: i32, %arg2: i32) -> (i32, i32) {
    %c0_i32 = arith.constant 0 : i32
    return %arg2, %arg1 : i32, i32
  }
  func.func @transform_2(%arg0: i32, %arg1: i32, %arg2: i32) -> (i32, i32) {
    %c0_i32 = arith.constant 0 : i32
    %c0_i32_0 = arith.constant 0 : i32
    return %c0_i32, %arg1 : i32, i32
  }
  func.func @transform_3(%arg0: i32, %arg1: i32, %arg2: i32) -> (i32, i32) {
    %c0_i32 = arith.constant 0 : i32
    %c0_i32_0 = arith.constant 0 : i32
    return %c0_i32, %arg1 : i32, i32
  }
  func.func @transform_4(%arg0: i32, %arg1: i32, %arg2: i32) -> (i32, i32) {
    %c0_i32 = arith.constant 0 : i32
    return %arg0, %arg1 : i32, i32
  }
  func.func @transform_5(%arg0: i32, %arg1: i32, %arg2: i32) -> (i32, i32) {
    %c0_i32 = arith.constant 0 : i32
    return %arg0, %arg1 : i32, i32
  }
}

module attributes {stable_mosaic.version = 11 : i64} {
  func.func @_gemm_kernel(%arg0: i32, %arg1: i32, %arg2: i32, %arg3: memref<128x256xf32, #tpu.memory_space<vmem>>, %arg4: memref<256x128xf32, #tpu.memory_space<vmem>>, %arg5: memref<1x128xf32, #tpu.memory_space<vmem>>, %arg6: memref<1x128xf32, #tpu.memory_space<vmem>>, %arg7: memref<128x128xf32, #tpu.memory_space<vmem>>, %arg8: memref<128x128xf32, #tpu.memory_space<vmem>>) attributes {dimension_semantics = [#tpu.dimension_semantics<parallel>, #tpu.dimension_semantics<parallel>, #tpu.dimension_semantics<arbitrary>], iteration_bounds = array<i64: 1, 1, 1>, scalar_prefetch = 0 : i64, scratch_operands = 1 : i64, tpu.core_type = #tpu.core_type<tc>, window_params = [{transform_indices = @transform_0, window_bounds = array<i64: 128, 256>}, {transform_indices = @transform_1, window_bounds = array<i64: 256, 128>}, {transform_indices = @transform_2, window_bounds = array<i64: 1, 128>}, {transform_indices = @transform_3, window_bounds = array<i64: 1, 128>}, {transform_indices = @transform_4, window_bounds = array<i64: 128, 128>}]} {
    %c0_i32 = arith.constant 0 : i32
    %0 = arith.cmpi eq, %arg2, %c0_i32 : i32
    %1 = arith.extui %0 : i1 to i32
    %c0_i32_0 = arith.constant 0 : i32
    %2 = arith.cmpi ne, %1, %c0_i32_0 : i32
    scf.if %2 {
      %cst_10 = arith.constant 0.000000e+00 : f32
      %12 = vector.broadcast %cst_10 : f32 to vector<128x128xf32>
      %c0_11 = arith.constant 0 : index
      %c0_12 = arith.constant 0 : index
      %13 = vector.load %arg8[%c0_11, %c0_12] : memref<128x128xf32, #tpu.memory_space<vmem>>, vector<128x128xf32>
      tpu.vector_store %arg8[%c0_11, %c0_12], %12 {strides = array<i32>} : memref<128x128xf32, #tpu.memory_space<vmem>>, vector<128x128xf32>,
    } else {
    }
    %c0 = arith.constant 0 : index
    %c0_1 = arith.constant 0 : index
    %3 = vector.load %arg8[%c0, %c0_1] : memref<128x128xf32, #tpu.memory_space<vmem>>, vector<128x128xf32>
    %c0_2 = arith.constant 0 : index
    %c0_3 = arith.constant 0 : index
    %4 = vector.load %arg3[%c0_2, %c0_3] : memref<128x256xf32, #tpu.memory_space<vmem>>, vector<128x256xf32>
    %c0_4 = arith.constant 0 : index
    %c0_5 = arith.constant 0 : index
    %5 = vector.load %arg4[%c0_4, %c0_5] : memref<256x128xf32, #tpu.memory_space<vmem>>, vector<256x128xf32>
    %cst = arith.constant dense<0.000000e+00> : vector<128x128xf32>
    %6 = tpu.matmul %4, %5, %cst {dimension_numbers = #tpu.dot_dimension_numbers<[1], [0], [0], [1], [0, 0, 1, 1], [], []>} : vector<128x256xf32>, vector<256x128xf32>, vector<128x128xf32> -> vector<128x128xf32>
    %7 = arith.addf %3, %6 : vector<128x128xf32>
    %c0_6 = arith.constant 0 : index
    %c0_7 = arith.constant 0 : index
    %8 = vector.load %arg8[%c0_6, %c0_7] : memref<128x128xf32, #tpu.memory_space<vmem>>, vector<128x128xf32>
    tpu.vector_store %arg8[%c0_6, %c0_7], %7 {strides = array<i32>} : memref<128x128xf32, #tpu.memory_space<vmem>>, vector<128x128xf32>,
    %c0_i32_8 = arith.constant 0 : i32
    %9 = arith.cmpi eq, %arg2, %c0_i32_8 : i32
    %10 = arith.extui %9 : i1 to i32
    %c0_i32_9 = arith.constant 0 : i32
    %11 = arith.cmpi ne, %10, %c0_i32_9 : i32
    scf.if %11 {
      %c0_10 = arith.constant 0 : index
      %c0_11 = arith.constant 0 : index
      %12 = vector.load %arg8[%c0_10, %c0_11] : memref<128x128xf32, #tpu.memory_space<vmem>>, vector<128x128xf32>
      %c0_12 = arith.constant 0 : index
      %c0_13 = arith.constant 0 : index
      %13 = vector.load %arg5[%c0_12, %c0_13] : memref<1x128xf32, #tpu.memory_space<vmem>>, vector<1x128xf32>
      %14 = vector.broadcast %13 : vector<1x128xf32> to vector<128x128xf32>
      %15 = arith.addf %12, %14 : vector<128x128xf32>
      %cst_14 = arith.constant 0.000000e+00 : f32
      %16 = vector.broadcast %cst_14 : f32 to vector<128x128xf32>
      %17 = arith.cmpf oge, %15, %16 : vector<128x128xf32>
      %c0_15 = arith.constant 0 : index
      %c0_16 = arith.constant 0 : index
      %18 = vector.load %arg6[%c0_15, %c0_16] : memref<1x128xf32, #tpu.memory_space<vmem>>, vector<1x128xf32>
      %19 = vector.broadcast %18 : vector<1x128xf32> to vector<128x128xf32>
      %20 = arith.mulf %19, %15 : vector<128x128xf32>
      %21 = arith.select %17, %15, %20 : vector<128x128xi1>, vector<128x128xf32>
      %c0_17 = arith.constant 0 : index
      %c0_18 = arith.constant 0 : index
      %22 = vector.load %arg7[%c0_17, %c0_18] : memref<128x128xf32, #tpu.memory_space<vmem>>, vector<128x128xf32>
      tpu.vector_store %arg7[%c0_17, %c0_18], %21 {strides = array<i32>} : memref<128x128xf32, #tpu.memory_space<vmem>>, vector<128x128xf32>,
    } else {
    }
    return
  }
  func.func @transform_0(%arg0: i32, %arg1: i32, %arg2: i32) -> (i32, i32) {
    %c0_i32 = arith.constant 0 : i32
    return %arg0, %arg2 : i32, i32
  }
  func.func @transform_1(%arg0: i32, %arg1: i32, %arg2: i32) -> (i32, i32) {
    %c0_i32 = arith.constant 0 : i32
    return %arg2, %arg1 : i32, i32
  }
  func.func @transform_2(%arg0: i32, %arg1: i32, %arg2: i32) -> (i32, i32) {
    %c0_i32 = arith.constant 0 : i32
    %c0_i32_0 = arith.constant 0 : i32
    return %c0_i32, %arg1 : i32, i32
  }
  func.func @transform_3(%arg0: i32, %arg1: i32, %arg2: i32) -> (i32, i32) {
    %c0_i32 = arith.constant 0 : i32
    %c0_i32_0 = arith.constant 0 : i32
    return %c0_i32, %arg1 : i32, i32
  }
  func.func @transform_4(%arg0: i32, %arg1: i32, %arg2: i32) -> (i32, i32) {
    %c0_i32 = arith.constant 0 : i32
    return %arg0, %arg1 : i32, i32
  }
}

</mosaic_0001>

<bundles_post_ra>
// kernel: mul.17
= control target key start
LH: loop header
LB: loop body
LE: loop exit
PB: predicated region body
PF: predicated region fallthrough
CT: control target
= control target key end

     0   :  { %s20_s0 = inlined_call_operand.<no memory space> [shape: f32[], index: 0, kind: input, shape index: {}]   ;;  %s21_s1 = inlined_call_operand.vmem [shape: f32[2], index: 1, kind: output, shape index: {}]  }
   0x1   :  { %v2_v0 = vstv %s20_s0 }
   0x2   :  { %3 = vst [vmem:[%s21_s1] sm:$0x1] %v2_v0 }

// kernel: mul.19
= control target key start
LH: loop header
LB: loop body
LE: loop exit
PB: predicated region body
PF: predicated region fallthrough
CT: control target
= control target key end

     0   :  { %s20_s0 = inlined_call_operand.<no memory space> [shape: f32[], index: 0, kind: input, shape index: {}]   ;;  %s21_s1 = inlined_call_operand.vmem [shape: f32[4], index: 1, kind: output, shape index: {}]  }
   0x1   :  { %v2_v0 = vstv %s20_s0 }
   0x2   :  { %3 = vst [vmem:[%s21_s1] sm:$0x1] %v2_v0 }

// kernel: recurrent_projection.9
= control target key start
LH: loop header
LB: loop body
LE: loop exit
PB: predicated region body
PF: predicated region fallthrough
CT: control target
= control target key end

     0   :  { %s712_s1 = inlined_call_operand.vmem [shape: f32[128,128], index: 1, kind: input, shape index: {}]   ;;  %s713_s0 = inlined_call_operand.vmem [shape: f32[128,128], index: 0, kind: input, shape index: {}]   ;;  %s714_s2 = inlined_call_operand.vmem [shape: f32[1,128], index: 2, kind: input, shape index: {}]   ;;  %s715_s3 = inlined_call_operand.vmem [shape: f32[1,128], index: 3, kind: input, shape index: {}]   ;;  %s716_s4 = inlined_call_operand.vmem [shape: f32[128,128], index: 4, kind: output, shape index: {}]  }
   0x1   :  { %v84_v0 = vld [vmem:[%s712_s1 + $0x78] sm:$0xff]  ;;  %v83_v1 = vld [vmem:[%s712_s1 + $0x70] sm:$0xff]  ;;  %v82_v2 = vld [vmem:[%s712_s1 + $0x68] sm:$0xff] }
   0x2   :  { %413 = vmatprep.subr.mxu0 %v84_v0  ;;  %469 = vmatprep.subr.mxu1 %v84_v0  ;;  %v81_v3 = vld [vmem:[%s712_s1 + $0x60] sm:$0xff]  ;;  %v80_v4 = vld [vmem:[%s712_s1 + $0x58] sm:$0xff]  ;;  %v79_v5 = vld [vmem:[%s712_s1 + $0x50] sm:$0xff] }
   0x3   :  { %414 = vmatpush3.msra.mxu0 %v84_v0  ;;  %485 = vmatpush3.msra.mxu1 %v84_v0  ;;  %v78_v6 = vld [vmem:[%s712_s1 + $0x48] sm:$0xff]  ;;  %v77_v7 = vld [vmem:[%s712_s1 + $0x40] sm:$0xff]  ;;  %v76_v8 = vld [vmem:[%s712_s1 + $0x38] sm:$0xff] }
   0x4   :  { %415 = vmatprep.subr.mxu0 %v83_v1  ;;  %470 = vmatprep.subr.mxu1 %v83_v1  ;;  %v75_v9 = vld [vmem:[%s712_s1 + $0x30] sm:$0xff]  ;;  %v74_v10 = vld [vmem:[%s712_s1 + $0x28] sm:$0xff]  ;;  %v73_v11 = vld [vmem:[%s712_s1 + $0x20] sm:$0xff] }
   0x5   :  { %416 = vmatpush3.msra.mxu0 %v83_v1  ;;  %486 = vmatpush3.msra.mxu1 %v83_v1  ;;  %v72_v12 = vld [vmem:[%s712_s1 + $0x18] sm:$0xff]  ;;  %v71_v13 = vld [vmem:[%s712_s1 + $0x10] sm:$0xff]  ;;  %v70_v14 = vld [vmem:[%s712_s1 + $0x8] sm:$0xff] }
   0x6   :  { %417 = vmatprep.subr.mxu0 %v82_v2  ;;  %471 = vmatprep.subr.mxu1 %v82_v2  ;;  %v69_v15 = vld [vmem:[%s712_s1] sm:$0xff]  ;;  %v54_v18 = vld [vmem:[%s713_s0 + $0x8] sm:$0xff]  ;;  %v55_v20 = vld [vmem:[%s713_s0 + $0x10] sm:$0xff] }
   0x7   :  { %418 = vmatpush3.msra.mxu0 %v82_v2  ;;  %487 = vmatpush3.msra.mxu1 %v82_v2  ;;  %v53_v16 = vld [vmem:[%s713_s0] sm:$0xff]  ;;  %v62_v19 = vld [vmem:[%s713_s0 + $0x48] sm:$0xff]  ;;  %v63_v21 = vld [vmem:[%s713_s0 + $0x50] sm:$0xff] }
   0x8   :  { %419 = vmatprep.subr.mxu0 %v81_v3  ;;  %472 = vmatprep.subr.mxu1 %v81_v3  ;;  %v61_v17 = vld [vmem:[%s713_s0 + $0x40] sm:$0xff]  ;;  %v56_v22 = vld [vmem:[%s713_s0 + $0x18] sm:$0xff]  ;;  %v58_v26 = vld [vmem:[%s713_s0 + $0x28] sm:$0xff] }
   0x9   :  { %420 = vmatpush3.msra.mxu0 %v81_v3  ;;  %488 = vmatpush3.msra.mxu1 %v81_v3  ;;  %v64_v23 = vld [vmem:[%s713_s0 + $0x58] sm:$0xff]  ;;  %v57_v24 = vld [vmem:[%s713_s0 + $0x20] sm:$0xff]  ;;  %v66_v27 = vld [vmem:[%s713_s0 + $0x68] sm:$0xff] }
   0xa   :  { %421 = vmatprep.subr.mxu0 %v80_v4  ;;  %473 = vmatprep.subr.mxu1 %v80_v4  ;;  %v65_v25 = vld [vmem:[%s713_s0 + $0x60] sm:$0xff]  ;;  %v59_v28 = vld [vmem:[%s713_s0 + $0x30] sm:$0xff]  ;;  %v60_v30 = vld [vmem:[%s713_s0 + $0x38] sm:$0xff] }
   0xb   :  { %422 = vmatpush3.msra.mxu0 %v80_v4  ;;  %489 = vmatpush3.msra.mxu1 %v80_v4  ;;  %v67_v29 = vld [vmem:[%s713_s0 + $0x70] sm:$0xff]  ;;  %v68_v31 = vld [vmem:[%s713_s0 + $0x78] sm:$0xff]  ;;  %v625_v32 = vld [vmem:[%s714_s2] ss:$0 sm:$0xff] }
   0xc   :  { %423 = vmatprep.subr.mxu0 %v79_v5  ;;  %474 = vmatprep.subr.mxu1 %v79_v5  ;;  %v630_v34 = vld [vmem:[%s715_s3] ss:$0 sm:$0xff] }
   0xd   :  { %424 = vmatpush3.msra.mxu0 %v79_v5  ;;  %490 = vmatpush3.msra.mxu1 %v79_v5 }
   0xe   :  { %425 = vmatprep.subr.mxu0 %v78_v6  ;;  %475 = vmatprep.subr.mxu1 %v78_v6 }
   0xf   :  { %426 = vmatpush3.msra.mxu0 %v78_v6  ;;  %491 = vmatpush3.msra.mxu1 %v78_v6 }
  0x10   :  { %427 = vmatprep.subr.mxu0 %v77_v7  ;;  %476 = vmatprep.subr.mxu1 %v77_v7 }
  0x11   :  { %428 = vmatpush3.msra.mxu0 %v77_v7  ;;  %492 = vmatpush3.msra.mxu1 %v77_v7 }
  0x12   :  { %429 = vmatprep.subr.mxu0 %v76_v8  ;;  %477 = vmatprep.subr.mxu1 %v76_v8 }
  0x13   :  { %430 = vmatpush3.msra.mxu0 %v76_v8  ;;  %493 = vmatpush3.msra.mxu1 %v76_v8 }
  0x14   :  { %431 = vmatprep.subr.mxu0 %v75_v9  ;;  %478 = vmatprep.subr.mxu1 %v75_v9 }
  0x15   :  { %432 = vmatpush3.msra.mxu0 %v75_v9  ;;  %494 = vmatpush3.msra.mxu1 %v75_v9 }
  0x16   :  { %433 = vmatprep.subr.mxu0 %v74_v10  ;;  %479 = vmatprep.subr.mxu1 %v74_v10 }
  0x17   :  { %434 = vmatpush3.msra.mxu0 %v74_v10  ;;  %495 = vmatpush3.msra.mxu1 %v74_v10 }
  0x18   :  { %435 = vmatprep.subr.mxu0 %v73_v11  ;;  %480 = vmatprep.subr.mxu1 %v73_v11 }
  0x19   :  { %436 = vmatpush3.msra.mxu0 %v73_v11  ;;  %496 = vmatpush3.msra.mxu1 %v73_v11 }
  0x1a   :  { %437 = vmatprep.subr.mxu0 %v72_v12  ;;  %481 = vmatprep.subr.mxu1 %v72_v12 }
  0x1b   :  { %438 = vmatpush3.msra.mxu0 %v72_v12  ;;  %497 = vmatpush3.msra.mxu1 %v72_v12 }
  0x1c   :  { %439 = vmatprep.subr.mxu0 %v71_v13  ;;  %482 = vmatprep.subr.mxu1 %v71_v13 }
  0x1d   :  { %440 = vmatpush3.msra.mxu0 %v71_v13  ;;  %498 = vmatpush3.msra.mxu1 %v71_v13 }
  0x1e   :  { %441 = vmatprep.subr.mxu0 %v70_v14  ;;  %483 = vmatprep.subr.mxu1 %v70_v14 }
  0x1f   :  { %442 = vmatpush3.msra.mxu0 %v70_v14  ;;  %499 = vmatpush3.msra.mxu1 %v70_v14 }
  0x20   :  { %443 = vmatprep.subr.mxu0 %v69_v15  ;;  %484 = vmatprep.subr.mxu1 %v69_v15 }
  0x21   :  { %444 = vmatpush3.msra.mxu0 %v69_v15  ;;  %500 = vmatpush3.msra.mxu1 %v69_v15 }
  0x22   :  { %445 = vmatprep.mubr.f32.mxu0 %v53_v16  ;;  %457 = vmatprep.mubr.f32.mxu1 %v61_v17 }
  0x23   :  { %446 = vmatmul.mubr.f32.vlgmr.msra.gmra.mxu0 %v54_v18  ;;  %458 = vmatmul.mubr.f32.vlgmr.msra.gmra.mxu1 %v62_v19 }
  0x24   :  { %448 = vmatprep.mubr.f32.mxu0 %v55_v20  ;;  %460 = vmatprep.mubr.f32.mxu1 %v63_v21 }
  0x27   :  { %449 = vmatmul.mubr.f32.gmra.mxu0 %v56_v22  ;;  %461 = vmatmul.mubr.f32.gmra.mxu1 %v64_v23 }
  0x28   :  { %451 = vmatprep.mubr.f32.mxu0 %v57_v24  ;;  %463 = vmatprep.mubr.f32.mxu1 %v65_v25 }
  0x2b   :  { %452 = vmatmul.mubr.f32.gmra.mxu0 %v58_v26  ;;  %464 = vmatmul.mubr.f32.gmra.mxu1 %v66_v27 }
  0x2c   :  { %454 = vmatprep.mubr.f32.mxu0 %v59_v28  ;;  %466 = vmatprep.mubr.f32.mxu1 %v67_v29 }
  0x2f   :  { %455 = vmatmul.mubr.f32.gmra.mxu0 %v60_v30  ;;  %467 = vmatmul.mubr.f32.gmra.mxu1 %v68_v31 }
  0xe3   :  { %v447_v33 = vpop.f32.mrf.mxu0  ;;  %v459_v35 = vpop.f32.mrf.mxu1 }
  0xe4   :  { %v289_v36 = vadd.f32 %v447_v33, %v625_v32  ;;  %v297_v37 = vadd.f32 %v459_v35, %v625_v32 }
  0xe5   :  { %v151_v38 = vpop.f32.mrf.mxu0  ;;  %v191_v39 = vpop.f32.mrf.mxu1 }
  0xe6   :  { %vm305_vm0 = vcmp.ge.f32.partialorder %v289_v36, 0.0  ;;  %v328_v40 = vmul.f32 %v630_v34, %v289_v36  ;;  %vm313_vm1 = vcmp.ge.f32.partialorder %v297_v37, 0.0  ;;  %v336_v41 = vmul.f32 %v630_v34, %v297_v37 }
  0xe7   :  { %v288_v42 = vadd.f32 %v625_v32, %v151_v38  ;;  %v296_v43 = vadd.f32 %v625_v32, %v191_v39  ;;  %v450_v44 = vpop.f32.mrf.mxu0  ;;  %v462_v45 = vpop.f32.mrf.mxu1 }
  0xe8   :  { %v344_v46 = vsel %vm305_vm0, %v289_v36, %v328_v40  ;;  %v352_v47 = vsel %vm313_vm1, %v297_v37, %v336_v41  ;;  %v291_v48 = vadd.f32 %v450_v44, %v625_v32  ;;  %v299_v49 = vadd.f32 %v462_v45, %v625_v32 }
  0xe9   :  { %360 = vst [vmem:[%s716_s4 + $0x8] sm:$0xff] %v344_v46  ;;  %368 = vst [vmem:[%s716_s4 + $0x48] sm:$0xff] %v352_v47  ;;  %vm304_vm2 = vcmp.ge.f32.partialorder %v288_v42, 0.0  ;;  %v327_v50 = vmul.f32 %v630_v34, %v288_v42  ;;  %vm312_vm3 = vcmp.ge.f32.partialorder %v296_v43, 0.0  ;;  %v335_v51 = vmul.f32 %v630_v34, %v296_v43  ;;  %v161_v52 = vpop.f32.mrf.mxu0  ;;  %v201_v53 = vpop.f32.mrf.mxu1 }
  0xea   :  { %vm307_vm4 = vcmp.ge.f32.partialorder %v291_v48, 0.0  ;;  %v330_v54 = vmul.f32 %v630_v34, %v291_v48  ;;  %vm315_vm5 = vcmp.ge.f32.partialorder %v299_v49, 0.0  ;;  %v338_v55 = vmul.f32 %v630_v34, %v299_v49 }
  0xeb   :  { %v343_v56 = vsel %vm304_vm2, %v288_v42, %v327_v50  ;;  %v351_v57 = vsel %vm312_vm3, %v296_v43, %v335_v51  ;;  %v290_v58 = vadd.f32 %v625_v32, %v161_v52  ;;  %v298_v59 = vadd.f32 %v625_v32, %v201_v53  ;;  %v453_v60 = vpop.f32.mrf.mxu0  ;;  %v465_v61 = vpop.f32.mrf.mxu1 }
  0xec   :  { %359 = vst [vmem:[%s716_s4] sm:$0xff] %v343_v56  ;;  %367 = vst [vmem:[%s716_s4 + $0x40] sm:$0xff] %v351_v57  ;;  %v346_v62 = vsel %vm307_vm4, %v291_v48, %v330_v54  ;;  %v354_v63 = vsel %vm315_vm5, %v299_v49, %v338_v55  ;;  %v293_v0 = vadd.f32 %v453_v60, %v625_v32 }
  0xed   :  { %v301_v1 = vadd.f32 %v465_v61, %v625_v32  ;;  %362 = vst [vmem:[%s716_s4 + $0x18] sm:$0xff] %v346_v62  ;;  %370 = vst [vmem:[%s716_s4 + $0x58] sm:$0xff] %v354_v63  ;;  %vm306_vm6 = vcmp.ge.f32.partialorder %v290_v58, 0.0  ;;  %v329_v2 = vmul.f32 %v630_v34, %v290_v58  ;;  %vm314_vm7 = vcmp.ge.f32.partialorder %v298_v59, 0.0  ;;  %v171_v4 = vpop.f32.mrf.mxu0  ;;  %v211_v5 = vpop.f32.mrf.mxu1 }
  0xee   :  { %v337_v3 = vmul.f32 %v630_v34, %v298_v59  ;;  %vm309_vm8 = vcmp.ge.f32.partialorder %v293_v0, 0.0  ;;  %v332_v6 = vmul.f32 %v630_v34, %v293_v0  ;;  %v292_v10 = vadd.f32 %v625_v32, %v171_v4 }
  0xef   :  { %vm317_vm9 = vcmp.ge.f32.partialorder %v301_v1, 0.0  ;;  %v340_v7 = vmul.f32 %v630_v34, %v301_v1  ;;  %v345_v8 = vsel %vm306_vm6, %v290_v58, %v329_v2  ;;  %v300_v11 = vadd.f32 %v625_v32, %v211_v5  ;;  %v456_v12 = vpop.f32.mrf.mxu0  ;;  %v468_v13 = vpop.f32.mrf.mxu1 }
  0xf0   :  { %v353_v9 = vsel %vm314_vm7, %v298_v59, %v337_v3  ;;  %361 = vst [vmem:[%s716_s4 + $0x10] sm:$0xff] %v345_v8  ;;  %v348_v14 = vsel %vm309_vm8, %v293_v0, %v332_v6  ;;  %v295_v16 = vadd.f32 %v456_v12, %v625_v32  ;;  %v303_v17 = vadd.f32 %v468_v13, %v625_v32 }
  0xf1   :  { %369 = vst [vmem:[%s716_s4 + $0x50] sm:$0xff] %v353_v9  ;;  %v356_v15 = vsel %vm317_vm9, %v301_v1, %v340_v7  ;;  %364 = vst [vmem:[%s716_s4 + $0x28] sm:$0xff] %v348_v14  ;;  %vm308_vm10 = vcmp.ge.f32.partialorder %v292_v10, 0.0  ;;  %v331_v18 = vmul.f32 %v630_v34, %v292_v10  ;;  %vm316_vm11 = vcmp.ge.f32.partialorder %v300_v11, 0.0  ;;  %v181_v20 = vpop.f32.mrf.mxu0  ;;  %v221_v21 = vpop.f32.mrf.mxu1 }
  0xf2   :  { %372 = vst [vmem:[%s716_s4 + $0x68] sm:$0xff] %v356_v15  ;;  %v339_v19 = vmul.f32 %v630_v34, %v300_v11  ;;  %vm311_vm12 = vcmp.ge.f32.partialorder %v295_v16, 0.0  ;;  %v334_v22 = vmul.f32 %v630_v34, %v295_v16  ;;  %vm319_vm13 = vcmp.ge.f32.partialorder %v303_v17, 0.0 }
  0xf3   :  { %v342_v23 = vmul.f32 %v630_v34, %v303_v17  ;;  %v347_v24 = vsel %vm308_vm10, %v292_v10, %v331_v18  ;;  %v294_v26 = vadd.f32 %v625_v32, %v181_v20  ;;  %v302_v27 = vadd.f32 %v625_v32, %v221_v21 }
  0xf4   :  { %v355_v25 = vsel %vm316_vm11, %v300_v11, %v339_v19  ;;  %363 = vst [vmem:[%s716_s4 + $0x20] sm:$0xff] %v347_v24  ;;  %v350_v28 = vsel %vm311_vm12, %v295_v16, %v334_v22 }
  0xf5   :  { %371 = vst [vmem:[%s716_s4 + $0x60] sm:$0xff] %v355_v25  ;;  %v358_v29 = vsel %vm319_vm13, %v303_v17, %v342_v23  ;;  %366 = vst [vmem:[%s716_s4 + $0x38] sm:$0xff] %v350_v28  ;;  %vm310_vm14 = vcmp.ge.f32.partialorder %v294_v26, 0.0  ;;  %v333_v30 = vmul.f32 %v630_v34, %v294_v26  ;;  %vm318_vm15 = vcmp.ge.f32.partialorder %v302_v27, 0.0 }
  0xf6   :  { %374 = vst [vmem:[%s716_s4 + $0x78] sm:$0xff] %v358_v29  ;;  %v341_v31 = vmul.f32 %v630_v34, %v302_v27 }
  0xf7   :  { %v349_v32 = vsel %vm310_vm14, %v294_v26, %v333_v30 }
  0xf8   :  { %v357_v33 = vsel %vm318_vm15, %v302_v27, %v341_v31  ;;  %365 = vst [vmem:[%s716_s4 + $0x30] sm:$0xff] %v349_v32 }
  0xf9   :  { %373 = vst [vmem:[%s716_s4 + $0x70] sm:$0xff] %v357_v33 }

// kernel: recurrent_projection.10
= control target key start
LH: loop header
LB: loop body
LE: loop exit
PB: predicated region body
PF: predicated region fallthrough
CT: control target
= control target key end

     0   :  { %s1371_s12 = smov 0   ;;  %s1373_s13 = smov 0   ;;  %s1702_s0 = inlined_call_operand.vmem [shape: f32[2,64,2], index: 0, kind: input, shape index: {}]   ;;  %s1703_s1 = inlined_call_operand.vmem [shape: f32[2,64,2], index: 1, kind: input, shape index: {}]   ;;  %s1704_s2 = inlined_call_operand.vmem [shape: f32[2,64,4], index: 2, kind: input, shape index: {}]   ;;  %s1705_s3 = inlined_call_operand.vmem [shape: f32[2,64,4], index: 3, kind: output, shape index: {}]  }
   0x1   :  { %s1375_s14 = smov 0  }
   0x2 LB: > { %s32_s15 = sadd.s32 1, %s1342_s13  ;;  %p1120_p0 = scmp.ge.s32.totalorder %s1346_s14, 1  ;;  %s1346_s14 = sphi %s1375_s14, %s13_s14   ;;  %s1342_s13 = sphi %s1373_s13, %s1707_s13   ;;  %s1338_s12 = sphi %s1371_s12, %s1706_s12  }
   0x3   : > { %p34_p1 = scmp.ge.s32.totalorder %s32_s15, 2  ;;  %p199_p2 = scmp.lt.s32.totalorder %s1346_s14, 3 }
   0x5   : > { %s1709_s15 = smov (%p34_p1, %s32_s15), 0  ;;  %p200_p3 = pnand %p1120_p0, %p199_p2 }
   0x6   : > { %p250_p4 = scmp.lt.s32.totalorder (!%p200_p3), %s1338_s12, 1 }
   0x7   : > { %203 = sbr.rel (%p200_p3) target bundleno = 845 (0x34d), region = 32 }
   0xc   : > { %s1711_s12 = smov (!%p250_p4, %s1338_s12), 1  ;;  %vm343_vm0 = vcmask 15360   ;;  %vm293_vm1 = vcmask 7168   ;;  %v1348_v16 = vmov -inf   ;;  %v498_v17 = vlaneseq }
   0xd   : > { %s1389_s16 = sshll.u32 %s1711_s12, 6  ;;  %294 = vst.msk [vmem:[#allocation2] sm:$0xff] %vm293_vm1, %v1348_v16  ;;  %295 = vst.msk [vmem:[#allocation2 + $0x8] sm:$0xff] %vm293_vm1, %v1348_v16  ;;  %vm519_vm3 = vcmask 523264   ;;  %v1349_v42 = vmov 0   ;;  %v1350_v44 = vmov 0.0  }
   0xe   : > { %s267_s19 = scalar_lea.vmem %s1703_s1, %s1389_s16  ;;  %s1399_s22 = scalar_lea.vmem %s1702_s0, %s1389_s16  ;;  %296 = vst.msk [vmem:[#allocation2 + $0x10] sm:$0xff] %vm293_vm1, %v1348_v16  ;;  %297 = vst.msk [vmem:[#allocation2 + $0x18] sm:$0xff] %vm293_vm1, %v1348_v16  ;;  %v499_v18 = vand.u32 127, %v498_v17  ;;  %1274 = vset.pattern.permute.xlu0 %v1349_v42  ;;  %1275 = vset.pattern.permute.xlu1 %v1349_v42  ;;  %vm310_vm4 = vcmask 31744  }
   0xf   : > { %v334_v0 = vld [vmem:[%s267_s19 + $0x38] sm:$0xff]  ;;  %v333_v1 = vld [vmem:[%s267_s19 + $0x30] sm:$0xff]  ;;  %v319_v2 = vld [vmem:[%s1399_s22] sm:$0xff]  ;;  %298 = vst.msk [vmem:[#allocation2 + $0x20] sm:$0xff] %vm293_vm1, %v1348_v16  ;;  %s1515_s25 = scalar_lea.vmem %s1704_s2, %s1389_s16  ;;  %s1675_s28 = scalar_lea.vmem %s1705_s3, %s1389_s16 }
  0x10   : > { %1191 = vmatprep.subr.msk.mxu0 %vm343_vm0, %v334_v0  ;;  %1207 = vmatprep.mubr.msk.f32.mxu0 %vm343_vm0, %v319_v2  ;;  %v332_v3 = vld [vmem:[%s267_s19 + $0x28] sm:$0xff]  ;;  %v331_v4 = vld [vmem:[%s267_s19 + $0x20] sm:$0xff]  ;;  %v330_v5 = vld [vmem:[%s267_s19 + $0x18] sm:$0xff]  ;;  %299 = vst.msk [vmem:[#allocation2 + $0x28] sm:$0xff] %vm293_vm1, %v1348_v16  ;;  %vm502_vm2 = vcmp.lt.s32.totalorder %v499_v18, 64 }
  0x11   : > { %1192 = vmatpush3.xpose.msk.msra.mxu0 %vm343_vm0, %v334_v0  ;;  %v329_v6 = vld [vmem:[%s267_s19 + $0x10] sm:$0xff]  ;;  %v328_v7 = vld [vmem:[%s267_s19 + $0x8] sm:$0xff]  ;;  %v327_v8 = vld [vmem:[%s267_s19] sm:$0xff]  ;;  %300 = vst.msk [vmem:[#allocation2 + $0x30] sm:$0xff] %vm293_vm1, %v1348_v16 }
  0x12   : > { %1193 = vmatprep.subr.msk.mxu0 %vm343_vm0, %v333_v1  ;;  %v320_v9 = vld [vmem:[%s1399_s22 + $0x8] sm:$0xff]  ;;  %v321_v10 = vld [vmem:[%s1399_s22 + $0x10] sm:$0xff]  ;;  %v322_v11 = vld [vmem:[%s1399_s22 + $0x18] sm:$0xff]  ;;  %301 = vst.msk [vmem:[#allocation2 + $0x38] sm:$0xff] %vm293_vm1, %v1348_v16 }
  0x13   : > { %v323_v12 = vld [vmem:[%s1399_s22 + $0x20] sm:$0xff]  ;;  %v324_v13 = vld [vmem:[%s1399_s22 + $0x28] sm:$0xff]  ;;  %v325_v14 = vld [vmem:[%s1399_s22 + $0x30] sm:$0xff]  ;;  %302 = vst.msk [vmem:[#allocation3] sm:$0xff] %vm293_vm1, %v1350_v44 }
  0x14   : > { %v326_v15 = vld [vmem:[%s1399_s22 + $0x38] sm:$0xff]  ;;  %303 = vst.msk [vmem:[#allocation3 + $0x8] sm:$0xff] %vm293_vm1, %v1350_v44  ;;  %304 = vst.msk [vmem:[#allocation3 + $0x10] sm:$0xff] %vm293_vm1, %v1350_v44  ;;  %v1497_v45 = vld [vmem:[#allocation2] sm:$0xff] }
  0x15   : > { %1194 = vmatpush3.xpose.msk.msra.mxu0 %vm343_vm0, %v333_v1  ;;  %305 = vst.msk [vmem:[#allocation3 + $0x18] sm:$0xff] %vm293_vm1, %v1350_v44  ;;  %306 = vst.msk [vmem:[#allocation3 + $0x20] sm:$0xff] %vm293_vm1, %v1350_v44  ;;  %v1502_v48 = vld [vmem:[#allocation2 + $0x8] sm:$0xff]  ;;  %v1504_v49 = vld [vmem:[#allocation2 + $0x10] sm:$0xff] }
  0x16   : > { %1195 = vmatprep.subr.msk.mxu0 %vm343_vm0, %v332_v3  ;;  %307 = vst.msk [vmem:[#allocation3 + $0x28] sm:$0xff] %vm293_vm1, %v1350_v44  ;;  %308 = vst.msk [vmem:[#allocation3 + $0x30] sm:$0xff] %vm293_vm1, %v1350_v44  ;;  %v342_v55 = vld [vmem:[%s1515_s25 + $0x38] sm:$0xff]  ;;  %v1526_v57 = vld [vmem:[#allocation2 + $0x20] sm:$0xff] }
  0x17   : > { %309 = vst.msk [vmem:[#allocation3 + $0x38] sm:$0xff] %vm293_vm1, %v1350_v44  ;;  %v1524_v56 = vld [vmem:[#allocation2 + $0x18] sm:$0xff]  ;;  %1219 = vmatprep.subr.mxu1 %v342_v55  ;;  %v341_v60 = vld [vmem:[%s1515_s25 + $0x30] sm:$0xff]  ;;  %v340_v1 = vld [vmem:[%s1515_s25 + $0x28] sm:$0xff] }
  0x18   : > { %1220 = vmatpush3.msra.mxu1 %v342_v55  ;;  %v1545_v2 = vld [vmem:[#allocation2 + $0x28] sm:$0xff]  ;;  %312 = vst.msk [vmem:[#allocation4 + $0x8] sm:$0xff] %vm310_vm4, %v1350_v44  ;;  %311 = vst.msk [vmem:[#allocation4] sm:$0xff] %vm310_vm4, %v1350_v44 }
  0x19   : > { %1196 = vmatpush3.xpose.msk.msra.mxu0 %vm343_vm0, %v332_v3  ;;  %1221 = vmatprep.subr.mxu1 %v341_v60  ;;  %v1547_v3 = vld [vmem:[#allocation2 + $0x30] sm:$0xff]  ;;  %v336_v18 = vld [vmem:[%s1515_s25 + $0x8] sm:$0xff]  ;;  %313 = vst.msk [vmem:[#allocation4 + $0x10] sm:$0xff] %vm310_vm4, %v1350_v44  ;;  %314 = vst.msk [vmem:[#allocation4 + $0x18] sm:$0xff] %vm310_vm4, %v1350_v44 }
  0x1a   : > { %1197 = vmatprep.subr.msk.mxu0 %vm343_vm0, %v331_v4  ;;  %1222 = vmatpush3.msra.mxu1 %v341_v60  ;;  %315 = vst.msk [vmem:[#allocation4 + $0x20] sm:$0xff] %vm310_vm4, %v1350_v44  ;;  %316 = vst.msk [vmem:[#allocation4 + $0x28] sm:$0xff] %vm310_vm4, %v1350_v44 }
  0x1b   : > { %1223 = vmatprep.subr.mxu1 %v340_v1  ;;  %317 = vst.msk [vmem:[#allocation4 + $0x30] sm:$0xff] %vm310_vm4, %v1350_v44  ;;  %318 = vst.msk [vmem:[#allocation4 + $0x38] sm:$0xff] %vm310_vm4, %v1350_v44 }
  0x1c   : > { %1224 = vmatpush3.msra.mxu1 %v340_v1 }
  0x1d   : > { %1198 = vmatpush3.xpose.msk.msra.mxu0 %vm343_vm0, %v331_v4 }
  0x1e   : > { %1199 = vmatprep.subr.msk.mxu0 %vm343_vm0, %v330_v5 }
  0x21   : > { %1200 = vmatpush3.xpose.msk.msra.mxu0 %vm343_vm0, %v330_v5 }
  0x22   : > { %1201 = vmatprep.subr.msk.mxu0 %vm343_vm0, %v329_v6 }
  0x25   : > { %1202 = vmatpush3.xpose.msk.msra.mxu0 %vm343_vm0, %v329_v6  ;;  %v339_v6 = vld [vmem:[%s1515_s25 + $0x20] sm:$0xff] }
  0x26   : > { %1203 = vmatprep.subr.msk.mxu0 %vm343_vm0, %v328_v7  ;;  %1225 = vmatprep.subr.mxu1 %v339_v6 }
  0x27   : > { %1226 = vmatpush3.msra.mxu1 %v339_v6 }
  0x29   : > { %1204 = vmatpush3.xpose.msk.msra.mxu0 %vm343_vm0, %v328_v7 }
  0x2a   : > { %1205 = vmatprep.subr.msk.mxu0 %vm343_vm0, %v327_v8 }
  0x2d   : > { %1206 = vmatpush3.xpose.msk.msra.mxu0 %vm343_vm0, %v327_v8 }
  0x30   : > { %1208 = vmatmul.mubr.msk.f32.vlgmr.msra.gmra.mxu0 %vm343_vm0, %v320_v9 }
  0x31   : > { %1210 = vmatprep.mubr.msk.f32.mxu0 %vm343_vm0, %v321_v10 }
  0x34   : > { %1211 = vmatmul.mubr.msk.f32.gmra.mxu0 %vm343_vm0, %v322_v11  ;;  %v338_v11 = vld [vmem:[%s1515_s25 + $0x18] sm:$0xff] }
  0x35   : > { %1213 = vmatprep.mubr.msk.f32.mxu0 %vm343_vm0, %v323_v12  ;;  %v1566_v12 = vld [vmem:[#allocation2 + $0x38] sm:$0xff]  ;;  %1227 = vmatprep.subr.mxu1 %v338_v11 }
  0x36   : > { %1228 = vmatpush3.msra.mxu1 %v338_v11 }
  0x38   : > { %1214 = vmatmul.mubr.msk.f32.gmra.mxu0 %vm343_vm0, %v324_v13 }
  0x39   : > { %1216 = vmatprep.mubr.msk.f32.mxu0 %vm343_vm0, %v325_v14 }
  0x3c   : > { %1217 = vmatmul.mubr.msk.f32.gmra.mxu0 %vm343_vm0, %v326_v15  ;;  %v337_v15 = vld [vmem:[%s1515_s25 + $0x10] sm:$0xff] }
  0x3d   : > { %1229 = vmatprep.subr.mxu1 %v337_v15 }
  0x3e   : > { %1230 = vmatpush3.msra.mxu1 %v337_v15 }
  0x3f   : > { %1231 = vmatprep.subr.mxu1 %v336_v18 }
  0x40   : > { %1232 = vmatpush3.msra.mxu1 %v336_v18 }
  0xf0   : > { %v1209_v19 = vpop.f32.mrf.mxu0 }
  0xf1   : > { %v1447_v24 = vsel %vm502_vm2, %v1209_v19, -1e+30 }
  0xf2   : > { %v458_v20 = vpop.f32.mrf.mxu0  ;;  %v523_v27 = vsel %vm519_vm3, %v1447_v24, -inf }
  0xf3   : > { %v1442_v21 = vsel %vm502_vm2, %v458_v20, -1e+30  ;;  %v335_v20 = vld [vmem:[%s1515_s25] sm:$0xff] }
  0xf4   : > { %v1212_v22 = vpop.f32.mrf.mxu0  ;;  %v520_v23 = vsel %vm519_vm3, %v1442_v21, -inf  ;;  %1233 = vmatprep.subr.mxu1 %v335_v20 }
  0xf5   : > { %521 = vmax.xlane.f32.xlu0 %v520_v23  ;;  %v1457_v30 = vsel %vm502_vm2, %v1212_v22, -1e+30  ;;  %1234 = vmatpush3.msra.mxu1 %v335_v20 }
  0xf6   : > { %v468_v25 = vpop.f32.mrf.mxu0  ;;  %v529_v34 = vsel %vm519_vm3, %v1457_v30, -inf }
  0xf7   : > { %v1450_v26 = vsel %vm502_vm2, %v468_v25, -1e+30 }
  0xf8   : > { %v526_v28 = vsel %vm519_vm3, %v1450_v26, -inf  ;;  %v1215_v29 = vpop.f32.mrf.mxu0 }
  0xf9   : > { %524 = vmax.xlane.f32.xlu0 %v523_v27  ;;  %527 = vmax.xlane.f32.xlu1 %v526_v28  ;;  %v1460_v32 = vsel %vm502_vm2, %v1215_v29, -1e+30 }
  0xfa   : > { %v478_v31 = vpop.f32.mrf.mxu0  ;;  %v535_v37 = vsel %vm519_vm3, %v1460_v32, -inf }
  0xfb   : > { %v1463_v33 = vsel %vm502_vm2, %v478_v31, -1e+30 }
  0xfc   : > { %v532_v35 = vsel %vm519_vm3, %v1463_v33, -inf  ;;  %v1218_v36 = vpop.f32.mrf.mxu0 }
  0xfd   : > { %530 = vmax.xlane.f32.xlu1 %v529_v34  ;;  %533 = vmax.xlane.f32.xlu0 %v532_v35  ;;  %v1472_v39 = vsel %vm502_vm2, %v1218_v36, -1e+30 }
  0xfe   : > { %v488_v38 = vpop.f32.mrf.mxu0  ;;  %v541_v43 = vsel %vm519_vm3, %v1472_v39, -inf }
  0xff   : > { %v1475_v40 = vsel %vm502_vm2, %v488_v38, -1e+30 }
 0x100   : > { %v538_v41 = vsel %vm519_vm3, %v1475_v40, -inf }
 0x101   : > { %536 = vmax.xlane.f32.xlu1 %v535_v37  ;;  %539 = vmax.xlane.f32.xlu0 %v538_v41 }
 0x105   : > { %542 = vmax.xlane.f32.xlu1 %v541_v43 }
 0x17e   : > { %v522_v46 = vpop.xlane.xlu0 %521 }
 0x17f   : > { %v1500_v47 = vmax.f32 %v1497_v45, %v522_v46 }
 0x181   : > { %v552_v50 = vsub.f32 %v1497_v45, %v1500_v47  ;;  %899 = vst.msk [vmem:[#allocation2] sm:$0xff] %vm293_vm1, %v1500_v47  ;;  %578 = vperm.xlu0 %1274, %v1500_v47  }
 0x182   : > { %v525_v51 = vpop.xlane.xlu0 %524  ;;  %v528_v52 = vpop.xlane.xlu1 %527 }
 0x183   : > { %v1518_v53 = vmax.f32 %v1502_v48, %v525_v51  ;;  %v1521_v54 = vmax.f32 %v1504_v49, %v528_v52 }
 0x185   : > { %v553_v58 = vsub.f32 %v1502_v48, %v1518_v53  ;;  %900 = vst.msk [vmem:[#allocation2 + $0x8] sm:$0xff] %vm293_vm1, %v1518_v53  ;;  %v554_v59 = vsub.f32 %v1504_v49, %v1521_v54  ;;  %901 = vst.msk [vmem:[#allocation2 + $0x10] sm:$0xff] %vm293_vm1, %v1521_v54  ;;  %583 = vperm.xlu1 %1275, %v1518_v53  }
 0x186   : > { %v531_v61 = vpop.xlane.xlu1 %530  ;;  %v534_v62 = vpop.xlane.xlu0 %533 }
 0x187   : > { %v1539_v63 = vmax.f32 %v1524_v56, %v531_v61  ;;  %v1542_v0 = vmax.f32 %v1526_v57, %v534_v62 }
 0x189   : > { %v555_v4 = vsub.f32 %v1524_v56, %v1539_v63  ;;  %902 = vst.msk [vmem:[#allocation2 + $0x18] sm:$0xff] %vm293_vm1, %v1539_v63  ;;  %593 = vperm.xlu1 %1275, %v1539_v63   ;;  %v556_v5 = vsub.f32 %v1526_v57, %v1542_v0  ;;  %903 = vst.msk [vmem:[#allocation2 + $0x20] sm:$0xff] %vm293_vm1, %v1542_v0 }
 0x18a   : > { %v537_v7 = vpop.xlane.xlu1 %536  ;;  %v540_v8 = vpop.xlane.xlu0 %539 }
 0x18b   : > { %v1560_v9 = vmax.f32 %v1545_v2, %v537_v7  ;;  %v1563_v10 = vmax.f32 %v1547_v3, %v540_v8  ;;  %v566_v48 = vmul.f32 1.442695, %v555_v4  ;;  %v568_v53 = vmul.f32 1.442695, %v556_v5  ;;  %v641_v4 = vld [vmem:[#allocation3 + $0x8] sm:$0xff] }
 0x18d   : > { %588 = vperm.xlu1 %1275, %v1521_v54   ;;  %v557_v13 = vsub.f32 %v1545_v2, %v1560_v9  ;;  %904 = vst.msk [vmem:[#allocation2 + $0x28] sm:$0xff] %vm293_vm1, %v1560_v9  ;;  %v558_v14 = vsub.f32 %v1547_v3, %v1563_v10  ;;  %905 = vst.msk [vmem:[#allocation2 + $0x30] sm:$0xff] %vm293_vm1, %v1563_v10 }
 0x18e   : > { %v543_v16 = vpop.xlane.xlu1 %542 }
 0x18f   : > { %v1579_v17 = vmax.f32 %v1566_v12, %v543_v16  ;;  %v570_v45 = vmul.f32 1.442695, %v557_v13  ;;  %v572_v47 = vmul.f32 1.442695, %v558_v14 }
 0x191   : > { %603 = vperm.xlu1 %1275, %v1560_v9   ;;  %v559_v19 = vsub.f32 %v1566_v12, %v1579_v17  ;;  %906 = vst.msk [vmem:[#allocation2 + $0x38] sm:$0xff] %vm293_vm1, %v1579_v17  ;;  %v643_v12 = vld [vmem:[#allocation3 + $0x18] sm:$0xff] }
 0x193   : > { %v574_v49 = vmul.f32 1.442695, %v559_v19  ;;  %v642_v19 = vld [vmem:[#allocation3 + $0x10] sm:$0xff] }
 0x195   : > { %598 = vperm.xlu1 %1275, %v1542_v0   ;;  %v640_v0 = vld [vmem:[#allocation3] sm:$0xff] }
 0x199   : > { %608 = vperm.xlu1 %1275, %v1563_v10  }
 0x19d   : > { %613 = vperm.xlu1 %1275, %v1579_v17  }
 0x1fc   : > { %v579_v22 = vpop.permute.xlu0 %578 }
 0x1fd   : > { %v616_v23 = vsub.f32 %v1442_v21, %v579_v22  ;;  %v562_v22 = vmul.f32 1.442695, %v553_v58 }
 0x1ff   : > { %v624_v25 = vmul.f32 1.442695, %v616_v23 }
 0x200   : > { %v584_v27 = vpop.permute.xlu1 %583 }
 0x201   : > { %1276 = vpow2.f32 %v624_v25  ;;  %v617_v28 = vsub.f32 %v1447_v24, %v584_v27  ;;  %v560_v25 = vmul.f32 1.442695, %v552_v50  ;;  %v564_v27 = vmul.f32 1.442695, %v554_v59 }
 0x203   : > { %v626_v29 = vmul.f32 1.442695, %v617_v28 }
 0x204   : > { %v594_v31 = vpop.permute.xlu1 %593 }
 0x205   : > { %1278 = vpow2.f32 %v626_v29  ;;  %v619_v34 = vsub.f32 %v1457_v30, %v594_v31 }
 0x207   : > { %v630_v35 = vmul.f32 1.442695, %v619_v34 }
 0x208   : > { %v589_v36 = vpop.permute.xlu1 %588 }
 0x209   : > { %1280 = vpow2.f32 %v630_v35  ;;  %v618_v37 = vsub.f32 %v1450_v26, %v589_v36  ;;  %v645_v35 = vld [vmem:[#allocation3 + $0x28] sm:$0xff] }
 0x20b   : > { %v628_v38 = vmul.f32 1.442695, %v618_v37 }
 0x20c   : > { %v604_v41 = vpop.permute.xlu1 %603 }
 0x20d   : > { %1282 = vpow2.f32 %v628_v38  ;;  %v621_v21 = vsub.f32 %v1460_v32, %v604_v41 }
 0x20e   : > { %v1277_v42 = vpop.eup %1276 }
 0x20f   : > { %v634_v43 = vmul.f32 1.442695, %v621_v21  ;;  %1235 = vmatprep.mubr.msk.f32.mxu1 %vm519_vm3, %v1277_v42  ;;  %v656_v24 = vsel %vm519_vm3, %v1277_v42, 0.0  ;;  %v644_v21 = vld [vmem:[#allocation3 + $0x20] sm:$0xff] }
 0x210   : > { %v599_v46 = vpop.permute.xlu1 %598  ;;  %657 = vadd.xlane.f32.xlu1 %v656_v24 }
 0x211   : > { %1284 = vpow2.f32 %v634_v43  ;;  %v620_v30 = vsub.f32 %v1463_v33, %v599_v46 }
 0x212   : > { %v1279_v51 = vpop.eup %1278 }
 0x213   : > { %v632_v52 = vmul.f32 1.442695, %v620_v30  ;;  %1236 = vmatmul.mubr.msk.f32.vlgmr.msra.gmra.mxu1 %vm519_vm3, %v1279_v51  ;;  %v659_v26 = vsel %vm519_vm3, %v1279_v51, 0.0  ;;  %v646_v30 = vld [vmem:[#allocation3 + $0x30] sm:$0xff] }
 0x214   : > { %660 = vadd.xlane.f32.xlu0 %v659_v26  ;;  %v609_v55 = vpop.permute.xlu1 %608 }
 0x215   : > { %1286 = vpow2.f32 %v632_v52  ;;  %v622_v32 = vsub.f32 %v1475_v40, %v609_v55 }
 0x216   : > { %v1281_v60 = vpop.eup %1280 }
 0x217   : > { %v636_v61 = vmul.f32 1.442695, %v622_v32  ;;  %v665_v62 = vsel %vm519_vm3, %v1281_v60, 0.0 }
 0x218   : > { %v614_v1 = vpop.permute.xlu1 %613  ;;  %666 = vadd.xlane.f32.xlu1 %v665_v62 }
 0x219   : > { %1288 = vpow2.f32 %v636_v61  ;;  %v623_v33 = vsub.f32 %v1472_v39, %v614_v1 }
 0x21a   : > { %v1283_v6 = vpop.eup %1282 }
 0x21b   : > { %v638_v7 = vmul.f32 1.442695, %v623_v33  ;;  %1238 = vmatprep.mubr.msk.f32.mxu1 %vm519_vm3, %v1283_v6  ;;  %v662_v8 = vsel %vm519_vm3, %v1283_v6, 0.0 }
 0x21c   : > { %663 = vadd.xlane.f32.xlu0 %v662_v8  ;;  %1239 = vmatmul.mubr.msk.f32.gmra.mxu1 %vm519_vm3, %v1281_v60  ;;  %v647_v60 = vld [vmem:[#allocation3 + $0x38] sm:$0xff] }
 0x21d   : > { %1290 = vpow2.f32 %v638_v7 }
 0x21e   : > { %v1285_v40 = vpop.eup %1284  ;;  %1292 = vpow2.f32 %v562_v22 }
 0x21f   : > { %v671_v11 = vsel %vm519_vm3, %v1285_v40, 0.0  ;;  %1294 = vpow2.f32 %v560_v25 }
 0x220   : > { %672 = vadd.xlane.f32.xlu1 %v671_v11  ;;  %1296 = vpow2.f32 %v564_v27  ;;  %v697_v27 = vld [vmem:[#allocation4] sm:$0xff] }
 0x221   : > { %1298 = vpow2.f32 %v566_v48 }
 0x222   : > { %v1287_v15 = vpop.eup %1286  ;;  %1300 = vpow2.f32 %v568_v53 }
 0x223   : > { %1241 = vmatprep.mubr.msk.f32.mxu1 %vm519_vm3, %v1287_v15  ;;  %v668_v16 = vsel %vm519_vm3, %v1287_v15, 0.0  ;;  %1302 = vpow2.f32 %v570_v45 }
 0x224   : > { %669 = vadd.xlane.f32.xlu0 %v668_v16  ;;  %1242 = vmatmul.mubr.msk.f32.gmra.mxu1 %vm519_vm3, %v1285_v40  ;;  %1304 = vpow2.f32 %v572_v47 }
 0x225   : > { %1306 = vpow2.f32 %v574_v49 }
 0x226   : > { %v1289_v39 = vpop.eup %1288 }
 0x227   : > { %1244 = vmatprep.mubr.msk.f32.mxu1 %vm519_vm3, %v1289_v39  ;;  %v674_v18 = vsel %vm519_vm3, %v1289_v39, 0.0 }
 0x228   : > { %675 = vadd.xlane.f32.xlu0 %v674_v18 }
 0x22a   : > { %v1291_v20 = vpop.eup %1290 }
 0x22b   : > { %1245 = vmatmul.mubr.msk.f32.gmra.mxu1 %vm519_vm3, %v1291_v20  ;;  %v677_v23 = vsel %vm519_vm3, %v1291_v20, 0.0  ;;  %v1293_v50 = vpop.eup %1292 }
 0x22c   : > { %678 = vadd.xlane.f32.xlu1 %v677_v23  ;;  %v1295_v54 = vpop.eup %1294  ;;  %v649_v9 = vmul.f32 %v1293_v50, %v641_v4  ;;  %v698_v23 = vld [vmem:[#allocation4 + $0x8] sm:$0xff] }
 0x22d   : > { %v1297_v44 = vpop.eup %1296  ;;  %v648_v2 = vmul.f32 %v1295_v54, %v640_v0 }
 0x22e   : > { %v1299_v56 = vpop.eup %1298  ;;  %v650_v31 = vmul.f32 %v1297_v44, %v642_v19 }
 0x22f   : > { %v1301_v57 = vpop.eup %1300  ;;  %v651_v14 = vmul.f32 %v1299_v56, %v643_v12 }
 0x230   : > { %v1303_v58 = vpop.eup %1302  ;;  %v652_v24 = vmul.f32 %v1301_v57, %v644_v21 }
 0x231   : > { %v1305_v59 = vpop.eup %1304  ;;  %v653_v38 = vmul.f32 %v1303_v58, %v645_v35  ;;  %v703_v35 = vld [vmem:[#allocation4 + $0x30] sm:$0xff] }
 0x232   : > { %v1307_v63 = vpop.eup %1306  ;;  %v654_v26 = vmul.f32 %v1305_v59, %v646_v30 }
 0x233   : > { %v655_v1 = vmul.f32 %v1307_v63, %v647_v60 }
 0x23d   : > { %712 = vperm.xlu1 %1275, %v1293_v50  }
 0x23e   : > { %707 = vperm.xlu0 %1274, %v1295_v54  }
 0x241   : > { %717 = vperm.xlu1 %1275, %v1297_v44   ;;  %v700_v44 = vld [vmem:[#allocation4 + $0x18] sm:$0xff] }
 0x242   : > { %722 = vperm.xlu0 %1274, %v1299_v56  }
 0x245   : > { %727 = vperm.xlu1 %1275, %v1301_v57   ;;  %v699_v57 = vld [vmem:[#allocation4 + $0x10] sm:$0xff] }
 0x246   : > { %732 = vperm.xlu0 %1274, %v1303_v58  }
 0x249   : > { %737 = vperm.xlu1 %1275, %v1305_v59  }
 0x24a   : > { %742 = vperm.xlu0 %1274, %v1307_v63  }
 0x299   : > { %v658_v3 = vpop.xlane.xlu1 %657 }
 0x29a   : > { %v680_v5 = vadd.f32 %v658_v3, %v648_v2 }
 0x29c   : > { %689 = vst.msk [vmem:[#allocation3] sm:$0xff] %vm293_vm1, %v680_v5  ;;  %v702_v5 = vld [vmem:[#allocation4 + $0x28] sm:$0xff] }
 0x29d   : > { %v661_v10 = vpop.xlane.xlu0 %660 }
 0x29e   : > { %v681_v13 = vadd.f32 %v661_v10, %v649_v9  ;;  %v701_v10 = vld [vmem:[#allocation4 + $0x20] sm:$0xff] }
 0x2a0   : > { %690 = vst.msk [vmem:[#allocation3 + $0x8] sm:$0xff] %vm293_vm1, %v681_v13 }
 0x2a1   : > { %v667_v17 = vpop.xlane.xlu1 %666 }
 0x2a2   : > { %v683_v28 = vadd.f32 %v667_v17, %v651_v14 }
 0x2a3   : > { %v918_v29 = vld [vmem:[#allocation3] sm:$0xff] }
 0x2a4   : > { %692 = vst.msk [vmem:[#allocation3 + $0x18] sm:$0xff] %vm293_vm1, %v683_v28  ;;  %1308 = vrcp.f32 %v918_v29  ;;  %v704_v29 = vld [vmem:[#allocation4 + $0x38] sm:$0xff] }
 0x2a5   : > { %v664_v34 = vpop.xlane.xlu0 %663 }
 0x2a6   : > { %v682_v36 = vadd.f32 %v664_v34, %v650_v31 }
 0x2a7   : > { %v919_v37 = vld [vmem:[#allocation3 + $0x8] sm:$0xff] }
 0x2a8   : > { %691 = vst.msk [vmem:[#allocation3 + $0x10] sm:$0xff] %vm293_vm1, %v682_v36  ;;  %1310 = vrcp.f32 %v919_v37 }
 0x2a9   : > { %v673_v41 = vpop.xlane.xlu1 %672 }
 0x2aa   : > { %v685_v42 = vadd.f32 %v673_v41, %v653_v38 }
 0x2ab   : > { %v921_v43 = vld [vmem:[#allocation3 + $0x18] sm:$0xff] }
 0x2ac   : > { %694 = vst.msk [vmem:[#allocation3 + $0x28] sm:$0xff] %vm293_vm1, %v685_v42  ;;  %1312 = vrcp.f32 %v921_v43 }
 0x2ad   : > { %v670_v46 = vpop.xlane.xlu0 %669 }
 0x2ae   : > { %v684_v51 = vadd.f32 %v670_v46, %v652_v24 }
 0x2af   : > { %v920_v52 = vld [vmem:[#allocation3 + $0x10] sm:$0xff] }
 0x2b0   : > { %693 = vst.msk [vmem:[#allocation3 + $0x20] sm:$0xff] %vm293_vm1, %v684_v51  ;;  %1314 = vrcp.f32 %v920_v52 }
 0x2b1   : > { %v1309_v55 = vpop.eup %1308  ;;  %v676_v32 = vpop.xlane.xlu0 %675 }
 0x2b2   : > { %v686_v61 = vadd.f32 %v676_v32, %v654_v26  ;;  %936 = vperm.xlu1 %1275, %v1309_v55  }
 0x2b3   : > { %v923_v62 = vld [vmem:[#allocation3 + $0x28] sm:$0xff] }
 0x2b4   : > { %695 = vst.msk [vmem:[#allocation3 + $0x30] sm:$0xff] %vm293_vm1, %v686_v61  ;;  %1316 = vrcp.f32 %v923_v62 }
 0x2b5   : > { %v1311_v33 = vpop.eup %1310  ;;  %v679_v6 = vpop.xlane.xlu1 %678 }
 0x2b6   : > { %v687_v7 = vadd.f32 %v679_v6, %v655_v1  ;;  %941 = vperm.xlu0 %1274, %v1311_v33  }
 0x2b7   : > { %v922_v8 = vld [vmem:[#allocation3 + $0x20] sm:$0xff] }
 0x2b8   : > { %696 = vst.msk [vmem:[#allocation3 + $0x38] sm:$0xff] %vm293_vm1, %v687_v7  ;;  %1318 = vrcp.f32 %v922_v8 }
 0x2b9   : > { %v1313_v40 = vpop.eup %1312  ;;  %v713_v25 = vpop.permute.xlu1 %712 }
 0x2ba   : > { %951 = vperm.xlu0 %1274, %v1313_v40   ;;  %v708_v48 = vpop.permute.xlu0 %707  ;;  %v746_v53 = vmul.f32 %v713_v25, %v698_v23 }
 0x2bb   : > { %v924_v11 = vld [vmem:[#allocation3 + $0x30] sm:$0xff]  ;;  %v745_v47 = vmul.f32 %v708_v48, %v697_v27 }
 0x2bc   : > { %1320 = vrcp.f32 %v924_v11 }
 0x2bd   : > { %v1315_v15 = vpop.eup %1314  ;;  %v718_v58 = vpop.permute.xlu1 %717 }
 0x2be   : > { %946 = vperm.xlu1 %1275, %v1315_v15   ;;  %v723_v56 = vpop.permute.xlu0 %722  ;;  %v747_v0 = vmul.f32 %v718_v58, %v699_v57 }
 0x2bf   : > { %v925_v16 = vld [vmem:[#allocation3 + $0x38] sm:$0xff]  ;;  %v748_v59 = vmul.f32 %v723_v56, %v700_v44 }
 0x2c0   : > { %1322 = vrcp.f32 %v925_v16 }
 0x2c1   : > { %v1317_v39 = vpop.eup %1316  ;;  %v728_v12 = vpop.permute.xlu1 %727 }
 0x2c2   : > { %961 = vperm.xlu0 %1274, %v1317_v39   ;;  %v733_v9 = vpop.permute.xlu0 %732  ;;  %v749_v17 = vmul.f32 %v728_v12, %v701_v10 }
 0x2c3   : > { %v750_v13 = vmul.f32 %v733_v9, %v702_v5 }
 0x2c5   : > { %v1319_v18 = vpop.eup %1318  ;;  %v738_v36 = vpop.permute.xlu1 %737 }
 0x2c6   : > { %956 = vperm.xlu1 %1275, %v1319_v18   ;;  %v743_v31 = vpop.permute.xlu0 %742  ;;  %v751_v41 = vmul.f32 %v738_v36, %v703_v35 }
 0x2c7   : > { %v752_v37 = vmul.f32 %v743_v31, %v704_v29 }
 0x2c9   : > { %v1321_v20 = vpop.eup %1320 }
 0x2ca   : > { %966 = vperm.xlu1 %1275, %v1321_v20  }
 0x2cd   : > { %v1323_v22 = vpop.eup %1322 }
 0x2ce   : > { %971 = vperm.xlu0 %1274, %v1323_v22  }
 0x2d3   : > { %v1237_v45 = vpop.f32.mrf.mxu1 }
 0x2d4   : > { %v883_v49 = vadd.f32 %v1237_v45, %v746_v53 }
 0x2d5   : > { %v843_v50 = vpop.f32.mrf.mxu1 }
 0x2d6   : > { %892 = vst.msk [vmem:[#allocation4 + $0x8] sm:$0xff] %vm310_vm4, %v883_v49  ;;  %v882_v54 = vadd.f32 %v843_v50, %v745_v47 }
 0x2d8   : > { %891 = vst.msk [vmem:[#allocation4] sm:$0xff] %vm310_vm4, %v882_v54 }
 0x2dc   : > { %v1240_v63 = vpop.f32.mrf.mxu1 }
 0x2dd   : > { %v885_v2 = vadd.f32 %v1240_v63, %v748_v59  ;;  %v911_v51 = vld [vmem:[#allocation4 + $0x8] sm:$0xff] }
 0x2de   : > { %v853_v3 = vpop.f32.mrf.mxu1 }
 0x2df   : > { %894 = vst.msk [vmem:[#allocation4 + $0x18] sm:$0xff] %vm310_vm4, %v885_v2  ;;  %v884_v4 = vadd.f32 %v853_v3, %v747_v0  ;;  %v910_v46 = vld [vmem:[#allocation4] sm:$0xff] }
 0x2e1   : > { %893 = vst.msk [vmem:[#allocation4 + $0x10] sm:$0xff] %vm310_vm4, %v884_v4 }
 0x2e4   : > { %v1243_v14 = vpop.f32.mrf.mxu1 }
 0x2e5   : > { %v887_v19 = vadd.f32 %v1243_v14, %v750_v13 }
 0x2e6   : > { %v863_v28 = vpop.f32.mrf.mxu1  ;;  %v913_v55 = vld [vmem:[#allocation4 + $0x18] sm:$0xff] }
 0x2e7   : > { %896 = vst.msk [vmem:[#allocation4 + $0x28] sm:$0xff] %vm310_vm4, %v887_v19  ;;  %v886_v34 = vadd.f32 %v863_v28, %v749_v17 }
 0x2e8   : > { %v912_v61 = vld [vmem:[#allocation4 + $0x10] sm:$0xff] }
 0x2e9   : > { %895 = vst.msk [vmem:[#allocation4 + $0x20] sm:$0xff] %vm310_vm4, %v886_v34 }
 0x2eb   : > { %v1246_v38 = vpop.f32.mrf.mxu1 }
 0x2ec   : > { %v889_v21 = vadd.f32 %v1246_v38, %v752_v37 }
 0x2ed   : > { %v873_v42 = vpop.f32.mrf.mxu1 }
 0x2ee   : > { %898 = vst.msk [vmem:[#allocation4 + $0x38] sm:$0xff] %vm310_vm4, %v889_v21  ;;  %v888_v43 = vadd.f32 %v873_v42, %v751_v41  ;;  %v915_v33 = vld [vmem:[#allocation4 + $0x28] sm:$0xff] }
 0x2f0   : > { %897 = vst.msk [vmem:[#allocation4 + $0x30] sm:$0xff] %vm310_vm4, %v888_v43  ;;  %v914_v8 = vld [vmem:[#allocation4 + $0x20] sm:$0xff] }
 0x2f5   : > { %v917_v18 = vld [vmem:[#allocation4 + $0x38] sm:$0xff] }
 0x2f7   : > { %v916_v15 = vld [vmem:[#allocation4 + $0x30] sm:$0xff] }
 0x32d   : > { %v937_v24 = vpop.permute.xlu1 %936 }
 0x32e   : > { %v974_v30 = vmul.f32 %v937_v24, %v910_v46 }
 0x330   : > { %982 = vst.msk [vmem:[%s1675_s28] sm:$0xff] %vm310_vm4, %v974_v30 }
 0x331   : > { %v942_v52 = vpop.permute.xlu0 %941 }
 0x332   : > { %v975_v26 = vmul.f32 %v942_v52, %v911_v51 }
 0x334   : > { %983 = vst.msk [vmem:[%s1675_s28 + $0x8] sm:$0xff] %vm310_vm4, %v975_v26 }
 0x335   : > { %v952_v32 = vpop.permute.xlu0 %951 }
 0x336   : > { %v977_v60 = vmul.f32 %v952_v32, %v913_v55 }
 0x338   : > { %985 = vst.msk [vmem:[%s1675_s28 + $0x18] sm:$0xff] %vm310_vm4, %v977_v60 }
 0x339   : > { %v947_v62 = vpop.permute.xlu1 %946 }
 0x33a   : > { %v976_v1 = vmul.f32 %v947_v62, %v912_v61 }
 0x33c   : > { %984 = vst.msk [vmem:[%s1675_s28 + $0x10] sm:$0xff] %vm310_vm4, %v976_v1 }
 0x33d   : > { %v962_v6 = vpop.permute.xlu0 %961 }
 0x33e   : > { %v979_v7 = vmul.f32 %v962_v6, %v915_v33 }
 0x340   : > { %987 = vst.msk [vmem:[%s1675_s28 + $0x28] sm:$0xff] %vm310_vm4, %v979_v7 }
 0x341   : > { %v957_v40 = vpop.permute.xlu1 %956 }
 0x342   : > { %v978_v11 = vmul.f32 %v957_v40, %v914_v8 }
 0x344   : > { %986 = vst.msk [vmem:[%s1675_s28 + $0x20] sm:$0xff] %vm310_vm4, %v978_v11 }
 0x345   : > { %v967_v16 = vpop.permute.xlu1 %966 }
 0x346   : > { %v980_v39 = vmul.f32 %v967_v16, %v916_v15 }
 0x348   : > { %988 = vst.msk [vmem:[%s1675_s28 + $0x30] sm:$0xff] %vm310_vm4, %v980_v39 }
 0x349   : > { %v972_v20 = vpop.permute.xlu0 %971 }
 0x34a   : > { %v981_v22 = vmul.f32 %v972_v20, %v917_v18 }
 0x34c   : > { %989 = vst.msk [vmem:[%s1675_s28 + $0x38] sm:$0xff] %vm310_vm4, %v981_v22 }
 0x34d PF: > { %s13_s14 = sadd.s32 1, %s1346_s14   ;;  %s1706_s12 = smov %s1342_s13 }
 0x34e   : > { %p10_p5 = scmp.ge.s32.totalorder %s13_s14, 4   ;;  %s1707_s13 = smov %s1709_s15 }
 0x350   :  { %12 = sbr.rel (!%p10_p5) target bundleno = 2 (0x2), region = 76 }

// kernel: recurrent_projection.12
= control target key start
LH: loop header
LB: loop body
LE: loop exit
PB: predicated region body
PF: predicated region fallthrough
CT: control target
= control target key end

     0   :  { %s1286_s15 = smov 0   ;;  %s1288_s16 = smov 0   ;;  %s1519_s0 = inlined_call_operand.vmem [shape: f32[512,128], index: 0, kind: input, shape index: {}]   ;;  %s1520_s1 = inlined_call_operand.vmem [shape: f32[128,128], index: 1, kind: input, shape index: {}]   ;;  %s1521_s2 = inlined_call_operand.vmem [shape: f32[1,128], index: 2, kind: input, shape index: {}]   ;;  %s1522_s3 = inlined_call_operand.vmem [shape: f32[1,128], index: 3, kind: input, shape index: {}]   ;;  %s1523_s4 = inlined_call_operand.vmem [shape: f32[512,128], index: 4, kind: output, shape index: {}]  }
   0x1   :  { %s1290_s17 = smov 0  }
   0x2 LB: > { %s33_s18 = sadd.s32 1, %s1255_s16  ;;  %p1044_p0 = scmp.ge.s32.totalorder %s1259_s17, 1  ;;  %s1259_s17 = sphi %s1290_s17, %s14_s17   ;;  %s1255_s16 = sphi %s1288_s16, %s1525_s16   ;;  %s1251_s15 = sphi %s1286_s15, %s1524_s15  }
   0x3   : > { %p35_p1 = scmp.ge.s32.totalorder %s33_s18, 2  ;;  %p221_p2 = scmp.lt.s32.totalorder %s1259_s17, 3 }
   0x5   : > { %s1527_s18 = smov (%p35_p1, %s33_s18), 0  ;;  %p222_p3 = pnand %p1044_p0, %p221_p2 }
   0x6   : > { %s1045_s9 = sshll.u32 (!%p222_p3), %s1251_s15, 5 }
   0x7   : > { %225 = sbr.rel (%p222_p3) target bundleno = 277 (0x115), region = 36  ;;  %p268_p4 = scmp.lt.s32.totalorder (!%p222_p3), %s1045_s9, 63 }
   0xc   : > { %v415_v0 = vld [vmem:[%s1520_s1 + $0x78] sm:$0xff]  ;;  %v414_v1 = vld [vmem:[%s1520_s1 + $0x70] sm:$0xff]  ;;  %v413_v2 = vld [vmem:[%s1520_s1 + $0x68] sm:$0xff]  ;;  %s1529_s9 = smov (!%p268_p4, %s1045_s9), 63 }
   0xd   : > { %1101 = vmatprep.subr.mxu0 %v415_v0  ;;  %1181 = vmatprep.subr.mxu1 %v415_v0  ;;  %v412_v3 = vld [vmem:[%s1520_s1 + $0x60] sm:$0xff]  ;;  %v411_v4 = vld [vmem:[%s1520_s1 + $0x58] sm:$0xff]  ;;  %v410_v5 = vld [vmem:[%s1520_s1 + $0x50] sm:$0xff]  ;;  %s1046_s25 = sshll.u32 %s1529_s9, 3 }
   0xe   : > { %1102 = vmatpush3.msra.mxu0 %v415_v0  ;;  %1197 = vmatpush3.msra.mxu1 %v415_v0  ;;  %v409_v6 = vld [vmem:[%s1520_s1 + $0x48] sm:$0xff]  ;;  %v408_v7 = vld [vmem:[%s1520_s1 + $0x40] sm:$0xff]  ;;  %v407_v8 = vld [vmem:[%s1520_s1 + $0x38] sm:$0xff]  ;;  %s1360_s30 = scalar_lea.vmem %s1519_s0, %s1046_s25  ;;  %s1414_s14 = scalar_lea.vmem %s1523_s4, %s1046_s25 }
   0xf   : > { %1103 = vmatprep.subr.mxu0 %v414_v1  ;;  %1182 = vmatprep.subr.mxu1 %v414_v1  ;;  %v406_v9 = vld [vmem:[%s1520_s1 + $0x30] sm:$0xff]  ;;  %v405_v10 = vld [vmem:[%s1520_s1 + $0x28] sm:$0xff]  ;;  %v404_v11 = vld [vmem:[%s1520_s1 + $0x20] sm:$0xff] }
  0x10   : > { %1104 = vmatpush3.msra.mxu0 %v414_v1  ;;  %1198 = vmatpush3.msra.mxu1 %v414_v1  ;;  %v403_v12 = vld [vmem:[%s1520_s1 + $0x18] sm:$0xff]  ;;  %v402_v13 = vld [vmem:[%s1520_s1 + $0x10] sm:$0xff]  ;;  %v401_v14 = vld [vmem:[%s1520_s1 + $0x8] sm:$0xff] }
  0x11   : > { %1105 = vmatprep.subr.mxu0 %v413_v2  ;;  %1183 = vmatprep.subr.mxu1 %v413_v2  ;;  %v400_v15 = vld [vmem:[%s1520_s1] sm:$0xff]  ;;  %v369_v18 = vld [vmem:[%s1360_s30 + $0x8] sm:$0xff]  ;;  %v370_v20 = vld [vmem:[%s1360_s30 + $0x10] sm:$0xff] }
  0x12   : > { %1106 = vmatpush3.msra.mxu0 %v413_v2  ;;  %1199 = vmatpush3.msra.mxu1 %v413_v2  ;;  %v368_v16 = vld [vmem:[%s1360_s30] sm:$0xff]  ;;  %v385_v19 = vld [vmem:[%s1360_s30 + $0x88] sm:$0xff]  ;;  %v386_v21 = vld [vmem:[%s1360_s30 + $0x90] sm:$0xff] }
  0x13   : > { %1107 = vmatprep.subr.mxu0 %v412_v3  ;;  %1184 = vmatprep.subr.mxu1 %v412_v3  ;;  %v384_v17 = vld [vmem:[%s1360_s30 + $0x80] sm:$0xff]  ;;  %v371_v22 = vld [vmem:[%s1360_s30 + $0x18] sm:$0xff]  ;;  %v373_v26 = vld [vmem:[%s1360_s30 + $0x28] sm:$0xff] }
  0x14   : > { %1108 = vmatpush3.msra.mxu0 %v412_v3  ;;  %1200 = vmatpush3.msra.mxu1 %v412_v3  ;;  %v387_v23 = vld [vmem:[%s1360_s30 + $0x98] sm:$0xff]  ;;  %v372_v24 = vld [vmem:[%s1360_s30 + $0x20] sm:$0xff]  ;;  %v389_v27 = vld [vmem:[%s1360_s30 + $0xa8] sm:$0xff] }
  0x15   : > { %1109 = vmatprep.subr.mxu0 %v411_v4  ;;  %1185 = vmatprep.subr.mxu1 %v411_v4  ;;  %v388_v25 = vld [vmem:[%s1360_s30 + $0xa0] sm:$0xff]  ;;  %v374_v28 = vld [vmem:[%s1360_s30 + $0x30] sm:$0xff]  ;;  %v375_v30 = vld [vmem:[%s1360_s30 + $0x38] sm:$0xff] }
  0x16   : > { %1110 = vmatpush3.msra.mxu0 %v411_v4  ;;  %1201 = vmatpush3.msra.mxu1 %v411_v4  ;;  %v390_v29 = vld [vmem:[%s1360_s30 + $0xb0] sm:$0xff]  ;;  %v391_v31 = vld [vmem:[%s1360_s30 + $0xb8] sm:$0xff]  ;;  %v376_v32 = vld [vmem:[%s1360_s30 + $0x40] sm:$0xff] }
  0x17   : > { %1111 = vmatprep.subr.mxu0 %v410_v5  ;;  %1186 = vmatprep.subr.mxu1 %v410_v5  ;;  %v392_v33 = vld [vmem:[%s1360_s30 + $0xc0] sm:$0xff]  ;;  %v377_v34 = vld [vmem:[%s1360_s30 + $0x48] sm:$0xff]  ;;  %v378_v36 = vld [vmem:[%s1360_s30 + $0x50] sm:$0xff] }
  0x18   : > { %1112 = vmatpush3.msra.mxu0 %v410_v5  ;;  %1202 = vmatpush3.msra.mxu1 %v410_v5  ;;  %v393_v35 = vld [vmem:[%s1360_s30 + $0xc8] sm:$0xff]  ;;  %v394_v37 = vld [vmem:[%s1360_s30 + $0xd0] sm:$0xff]  ;;  %v379_v38 = vld [vmem:[%s1360_s30 + $0x58] sm:$0xff] }
  0x19   : > { %1113 = vmatprep.subr.mxu0 %v409_v6  ;;  %1187 = vmatprep.subr.mxu1 %v409_v6  ;;  %v395_v39 = vld [vmem:[%s1360_s30 + $0xd8] sm:$0xff]  ;;  %v380_v40 = vld [vmem:[%s1360_s30 + $0x60] sm:$0xff]  ;;  %v381_v42 = vld [vmem:[%s1360_s30 + $0x68] sm:$0xff] }
  0x1a   : > { %1114 = vmatpush3.msra.mxu0 %v409_v6  ;;  %1203 = vmatpush3.msra.mxu1 %v409_v6  ;;  %v396_v41 = vld [vmem:[%s1360_s30 + $0xe0] sm:$0xff]  ;;  %v397_v43 = vld [vmem:[%s1360_s30 + $0xe8] sm:$0xff]  ;;  %v382_v44 = vld [vmem:[%s1360_s30 + $0x70] sm:$0xff] }
  0x1b   : > { %1115 = vmatprep.subr.mxu0 %v408_v7  ;;  %1188 = vmatprep.subr.mxu1 %v408_v7  ;;  %v398_v45 = vld [vmem:[%s1360_s30 + $0xf0] sm:$0xff]  ;;  %v383_v46 = vld [vmem:[%s1360_s30 + $0x78] sm:$0xff]  ;;  %v1400_v48 = vld [vmem:[%s1521_s2] ss:$0 sm:$0xff] }
  0x1c   : > { %1116 = vmatpush3.msra.mxu0 %v408_v7  ;;  %1204 = vmatpush3.msra.mxu1 %v408_v7  ;;  %v399_v47 = vld [vmem:[%s1360_s30 + $0xf8] sm:$0xff]  ;;  %v1405_v50 = vld [vmem:[%s1522_s3] ss:$0 sm:$0xff] }
  0x1d   : > { %1117 = vmatprep.subr.mxu0 %v407_v8  ;;  %1189 = vmatprep.subr.mxu1 %v407_v8 }
  0x1e   : > { %1118 = vmatpush3.msra.mxu0 %v407_v8  ;;  %1205 = vmatpush3.msra.mxu1 %v407_v8 }
  0x1f   : > { %1119 = vmatprep.subr.mxu0 %v406_v9  ;;  %1190 = vmatprep.subr.mxu1 %v406_v9 }
  0x20   : > { %1120 = vmatpush3.msra.mxu0 %v406_v9  ;;  %1206 = vmatpush3.msra.mxu1 %v406_v9 }
  0x21   : > { %1121 = vmatprep.subr.mxu0 %v405_v10  ;;  %1191 = vmatprep.subr.mxu1 %v405_v10 }
  0x22   : > { %1122 = vmatpush3.msra.mxu0 %v405_v10  ;;  %1207 = vmatpush3.msra.mxu1 %v405_v10 }
  0x23   : > { %1123 = vmatprep.subr.mxu0 %v404_v11  ;;  %1192 = vmatprep.subr.mxu1 %v404_v11 }
  0x24   : > { %1124 = vmatpush3.msra.mxu0 %v404_v11  ;;  %1208 = vmatpush3.msra.mxu1 %v404_v11 }
  0x25   : > { %1125 = vmatprep.subr.mxu0 %v403_v12  ;;  %1193 = vmatprep.subr.mxu1 %v403_v12 }
  0x26   : > { %1126 = vmatpush3.msra.mxu0 %v403_v12  ;;  %1209 = vmatpush3.msra.mxu1 %v403_v12 }
  0x27   : > { %1127 = vmatprep.subr.mxu0 %v402_v13  ;;  %1194 = vmatprep.subr.mxu1 %v402_v13 }
  0x28   : > { %1128 = vmatpush3.msra.mxu0 %v402_v13  ;;  %1210 = vmatpush3.msra.mxu1 %v402_v13 }
  0x29   : > { %1129 = vmatprep.subr.mxu0 %v401_v14  ;;  %1195 = vmatprep.subr.mxu1 %v401_v14 }
  0x2a   : > { %1130 = vmatpush3.msra.mxu0 %v401_v14  ;;  %1211 = vmatpush3.msra.mxu1 %v401_v14 }
  0x2b   : > { %1131 = vmatprep.subr.mxu0 %v400_v15  ;;  %1196 = vmatprep.subr.mxu1 %v400_v15 }
  0x2c   : > { %1132 = vmatpush3.msra.mxu0 %v400_v15  ;;  %1212 = vmatpush3.msra.mxu1 %v400_v15 }
  0x2d   : > { %1133 = vmatprep.mubr.f32.mxu0 %v368_v16  ;;  %1157 = vmatprep.mubr.f32.mxu1 %v384_v17 }
  0x2e   : > { %1134 = vmatmul.mubr.f32.vlgmr.msra.gmra.mxu0 %v369_v18  ;;  %1158 = vmatmul.mubr.f32.vlgmr.msra.gmra.mxu1 %v385_v19 }
  0x2f   : > { %1136 = vmatprep.mubr.f32.mxu0 %v370_v20  ;;  %1160 = vmatprep.mubr.f32.mxu1 %v386_v21 }
  0x32   : > { %1137 = vmatmul.mubr.f32.gmra.mxu0 %v371_v22  ;;  %1161 = vmatmul.mubr.f32.gmra.mxu1 %v387_v23 }
  0x33   : > { %1139 = vmatprep.mubr.f32.mxu0 %v372_v24  ;;  %1163 = vmatprep.mubr.f32.mxu1 %v388_v25 }
  0x36   : > { %1140 = vmatmul.mubr.f32.gmra.mxu0 %v373_v26  ;;  %1164 = vmatmul.mubr.f32.gmra.mxu1 %v389_v27 }
  0x37   : > { %1142 = vmatprep.mubr.f32.mxu0 %v374_v28  ;;  %1166 = vmatprep.mubr.f32.mxu1 %v390_v29 }
  0x3a   : > { %1143 = vmatmul.mubr.f32.gmra.mxu0 %v375_v30  ;;  %1167 = vmatmul.mubr.f32.gmra.mxu1 %v391_v31 }
  0x3b   : > { %1145 = vmatprep.mubr.f32.mxu0 %v376_v32  ;;  %1169 = vmatprep.mubr.f32.mxu1 %v392_v33 }
  0x3e   : > { %1146 = vmatmul.mubr.f32.gmra.mxu0 %v377_v34  ;;  %1170 = vmatmul.mubr.f32.gmra.mxu1 %v393_v35 }
  0x3f   : > { %1148 = vmatprep.mubr.f32.mxu0 %v378_v36  ;;  %1172 = vmatprep.mubr.f32.mxu1 %v394_v37 }
  0x42   : > { %1149 = vmatmul.mubr.f32.gmra.mxu0 %v379_v38  ;;  %1173 = vmatmul.mubr.f32.gmra.mxu1 %v395_v39 }
  0x43   : > { %1151 = vmatprep.mubr.f32.mxu0 %v380_v40  ;;  %1175 = vmatprep.mubr.f32.mxu1 %v396_v41 }
  0x46   : > { %1152 = vmatmul.mubr.f32.gmra.mxu0 %v381_v42  ;;  %1176 = vmatmul.mubr.f32.gmra.mxu1 %v397_v43 }
  0x47   : > { %1154 = vmatprep.mubr.f32.mxu0 %v382_v44  ;;  %1178 = vmatprep.mubr.f32.mxu1 %v398_v45 }
  0x4a   : > { %1155 = vmatmul.mubr.f32.gmra.mxu0 %v383_v46  ;;  %1179 = vmatmul.mubr.f32.gmra.mxu1 %v399_v47 }
  0xee   : > { %v1135_v49 = vpop.f32.mrf.mxu0  ;;  %v1159_v51 = vpop.f32.mrf.mxu1 }
  0xef   : > { %v748_v52 = vadd.f32 %v1135_v49, %v1400_v48  ;;  %v764_v53 = vadd.f32 %v1159_v51, %v1400_v48 }
  0xf0   : > { %v482_v54 = vpop.f32.mrf.mxu0  ;;  %v562_v55 = vpop.f32.mrf.mxu1 }
  0xf1   : > { %vm780_vm0 = vcmp.ge.f32.partialorder %v748_v52, 0.0  ;;  %v819_v56 = vmul.f32 %v1405_v50, %v748_v52  ;;  %vm796_vm1 = vcmp.ge.f32.partialorder %v764_v53, 0.0  ;;  %v835_v57 = vmul.f32 %v1405_v50, %v764_v53 }
  0xf2   : > { %v747_v58 = vadd.f32 %v1400_v48, %v482_v54  ;;  %v763_v59 = vadd.f32 %v1400_v48, %v562_v55  ;;  %v1138_v60 = vpop.f32.mrf.mxu0  ;;  %v1162_v61 = vpop.f32.mrf.mxu1 }
  0xf3   : > { %v851_v62 = vsel %vm780_vm0, %v748_v52, %v819_v56  ;;  %v867_v63 = vsel %vm796_vm1, %v764_v53, %v835_v57  ;;  %v750_v0 = vadd.f32 %v1138_v60, %v1400_v48  ;;  %v766_v1 = vadd.f32 %v1162_v61, %v1400_v48 }
  0xf4   : > { %883 = vst [vmem:[%s1414_s14 + $0x8] sm:$0xff] %v851_v62  ;;  %899 = vst [vmem:[%s1414_s14 + $0x88] sm:$0xff] %v867_v63  ;;  %vm779_vm2 = vcmp.ge.f32.partialorder %v747_v58, 0.0  ;;  %v818_v2 = vmul.f32 %v1405_v50, %v747_v58  ;;  %vm795_vm3 = vcmp.ge.f32.partialorder %v763_v59, 0.0  ;;  %v834_v3 = vmul.f32 %v1405_v50, %v763_v59  ;;  %v492_v4 = vpop.f32.mrf.mxu0  ;;  %v572_v5 = vpop.f32.mrf.mxu1 }
  0xf5   : > { %vm782_vm4 = vcmp.ge.f32.partialorder %v750_v0, 0.0  ;;  %v821_v6 = vmul.f32 %v1405_v50, %v750_v0  ;;  %vm798_vm5 = vcmp.ge.f32.partialorder %v766_v1, 0.0  ;;  %v837_v7 = vmul.f32 %v1405_v50, %v766_v1 }
  0xf6   : > { %v850_v8 = vsel %vm779_vm2, %v747_v58, %v818_v2  ;;  %v866_v9 = vsel %vm795_vm3, %v763_v59, %v834_v3  ;;  %v749_v10 = vadd.f32 %v1400_v48, %v492_v4  ;;  %v765_v11 = vadd.f32 %v1400_v48, %v572_v5  ;;  %v1141_v12 = vpop.f32.mrf.mxu0  ;;  %v1165_v13 = vpop.f32.mrf.mxu1 }
  0xf7   : > { %882 = vst [vmem:[%s1414_s14] sm:$0xff] %v850_v8  ;;  %898 = vst [vmem:[%s1414_s14 + $0x80] sm:$0xff] %v866_v9  ;;  %v853_v14 = vsel %vm782_vm4, %v750_v0, %v821_v6  ;;  %v869_v15 = vsel %vm798_vm5, %v766_v1, %v837_v7  ;;  %v752_v16 = vadd.f32 %v1141_v12, %v1400_v48 }
  0xf8   : > { %v768_v17 = vadd.f32 %v1165_v13, %v1400_v48  ;;  %885 = vst [vmem:[%s1414_s14 + $0x18] sm:$0xff] %v853_v14  ;;  %901 = vst [vmem:[%s1414_s14 + $0x98] sm:$0xff] %v869_v15  ;;  %vm781_vm6 = vcmp.ge.f32.partialorder %v749_v10, 0.0  ;;  %v820_v18 = vmul.f32 %v1405_v50, %v749_v10  ;;  %vm797_vm7 = vcmp.ge.f32.partialorder %v765_v11, 0.0  ;;  %v502_v20 = vpop.f32.mrf.mxu0  ;;  %v582_v21 = vpop.f32.mrf.mxu1 }
  0xf9   : > { %v836_v19 = vmul.f32 %v1405_v50, %v765_v11  ;;  %vm784_vm8 = vcmp.ge.f32.partialorder %v752_v16, 0.0  ;;  %v823_v22 = vmul.f32 %v1405_v50, %v752_v16  ;;  %v751_v26 = vadd.f32 %v1400_v48, %v502_v20 }
  0xfa   : > { %vm800_vm9 = vcmp.ge.f32.partialorder %v768_v17, 0.0  ;;  %v839_v23 = vmul.f32 %v1405_v50, %v768_v17  ;;  %v852_v24 = vsel %vm781_vm6, %v749_v10, %v820_v18  ;;  %v767_v27 = vadd.f32 %v1400_v48, %v582_v21  ;;  %v1144_v28 = vpop.f32.mrf.mxu0  ;;  %v1168_v29 = vpop.f32.mrf.mxu1 }
  0xfb   : > { %v868_v25 = vsel %vm797_vm7, %v765_v11, %v836_v19  ;;  %884 = vst [vmem:[%s1414_s14 + $0x10] sm:$0xff] %v852_v24  ;;  %v855_v30 = vsel %vm784_vm8, %v752_v16, %v823_v22  ;;  %v754_v32 = vadd.f32 %v1144_v28, %v1400_v48  ;;  %v770_v33 = vadd.f32 %v1168_v29, %v1400_v48 }
  0xfc   : > { %900 = vst [vmem:[%s1414_s14 + $0x90] sm:$0xff] %v868_v25  ;;  %v871_v31 = vsel %vm800_vm9, %v768_v17, %v839_v23  ;;  %887 = vst [vmem:[%s1414_s14 + $0x28] sm:$0xff] %v855_v30  ;;  %vm783_vm10 = vcmp.ge.f32.partialorder %v751_v26, 0.0  ;;  %v822_v34 = vmul.f32 %v1405_v50, %v751_v26  ;;  %vm799_vm11 = vcmp.ge.f32.partialorder %v767_v27, 0.0  ;;  %v512_v36 = vpop.f32.mrf.mxu0  ;;  %v592_v37 = vpop.f32.mrf.mxu1 }
  0xfd   : > { %903 = vst [vmem:[%s1414_s14 + $0xa8] sm:$0xff] %v871_v31  ;;  %v838_v35 = vmul.f32 %v1405_v50, %v767_v27  ;;  %vm786_vm12 = vcmp.ge.f32.partialorder %v754_v32, 0.0  ;;  %v825_v38 = vmul.f32 %v1405_v50, %v754_v32  ;;  %vm802_vm13 = vcmp.ge.f32.partialorder %v770_v33, 0.0 }
  0xfe   : > { %v841_v39 = vmul.f32 %v1405_v50, %v770_v33  ;;  %v854_v40 = vsel %vm783_vm10, %v751_v26, %v822_v34  ;;  %v753_v42 = vadd.f32 %v1400_v48, %v512_v36  ;;  %v769_v43 = vadd.f32 %v1400_v48, %v592_v37  ;;  %v1147_v44 = vpop.f32.mrf.mxu0  ;;  %v1171_v45 = vpop.f32.mrf.mxu1 }
  0xff   : > { %v870_v41 = vsel %vm799_vm11, %v767_v27, %v838_v35  ;;  %886 = vst [vmem:[%s1414_s14 + $0x20] sm:$0xff] %v854_v40  ;;  %v857_v46 = vsel %vm786_vm12, %v754_v32, %v825_v38  ;;  %v756_v49 = vadd.f32 %v1147_v44, %v1400_v48  ;;  %v772_v51 = vadd.f32 %v1171_v45, %v1400_v48 }
 0x100   : > { %902 = vst [vmem:[%s1414_s14 + $0xa0] sm:$0xff] %v870_v41  ;;  %v873_v47 = vsel %vm802_vm13, %v770_v33, %v841_v39  ;;  %889 = vst [vmem:[%s1414_s14 + $0x38] sm:$0xff] %v857_v46  ;;  %vm785_vm14 = vcmp.ge.f32.partialorder %v753_v42, 0.0  ;;  %v824_v52 = vmul.f32 %v1405_v50, %v753_v42  ;;  %vm801_vm15 = vcmp.ge.f32.partialorder %v769_v43, 0.0  ;;  %v522_v54 = vpop.f32.mrf.mxu0  ;;  %v602_v55 = vpop.f32.mrf.mxu1 }
 0x101   : > { %905 = vst [vmem:[%s1414_s14 + $0xb8] sm:$0xff] %v873_v47  ;;  %v840_v53 = vmul.f32 %v1405_v50, %v769_v43  ;;  %vm788_vm0 = vcmp.ge.f32.partialorder %v756_v49, 0.0  ;;  %v827_v56 = vmul.f32 %v1405_v50, %v756_v49  ;;  %vm804_vm1 = vcmp.ge.f32.partialorder %v772_v51, 0.0 }
 0x102   : > { %v843_v57 = vmul.f32 %v1405_v50, %v772_v51  ;;  %v856_v58 = vsel %vm785_vm14, %v753_v42, %v824_v52  ;;  %v755_v60 = vadd.f32 %v1400_v48, %v522_v54  ;;  %v771_v61 = vadd.f32 %v1400_v48, %v602_v55  ;;  %v1150_v62 = vpop.f32.mrf.mxu0  ;;  %v1174_v63 = vpop.f32.mrf.mxu1 }
 0x103   : > { %v872_v59 = vsel %vm801_vm15, %v769_v43, %v840_v53  ;;  %888 = vst [vmem:[%s1414_s14 + $0x30] sm:$0xff] %v856_v58  ;;  %v859_v0 = vsel %vm788_vm0, %v756_v49, %v827_v56  ;;  %v758_v2 = vadd.f32 %v1150_v62, %v1400_v48  ;;  %v774_v3 = vadd.f32 %v1174_v63, %v1400_v48 }
 0x104   : > { %904 = vst [vmem:[%s1414_s14 + $0xb0] sm:$0xff] %v872_v59  ;;  %v875_v1 = vsel %vm804_vm1, %v772_v51, %v843_v57  ;;  %891 = vst [vmem:[%s1414_s14 + $0x48] sm:$0xff] %v859_v0  ;;  %vm787_vm2 = vcmp.ge.f32.partialorder %v755_v60, 0.0  ;;  %v826_v4 = vmul.f32 %v1405_v50, %v755_v60  ;;  %vm803_vm3 = vcmp.ge.f32.partialorder %v771_v61, 0.0  ;;  %v532_v6 = vpop.f32.mrf.mxu0  ;;  %v612_v7 = vpop.f32.mrf.mxu1 }
 0x105   : > { %907 = vst [vmem:[%s1414_s14 + $0xc8] sm:$0xff] %v875_v1  ;;  %v842_v5 = vmul.f32 %v1405_v50, %v771_v61  ;;  %vm790_vm4 = vcmp.ge.f32.partialorder %v758_v2, 0.0  ;;  %v829_v8 = vmul.f32 %v1405_v50, %v758_v2  ;;  %vm806_vm5 = vcmp.ge.f32.partialorder %v774_v3, 0.0 }
 0x106   : > { %v845_v9 = vmul.f32 %v1405_v50, %v774_v3  ;;  %v858_v10 = vsel %vm787_vm2, %v755_v60, %v826_v4  ;;  %v757_v12 = vadd.f32 %v1400_v48, %v532_v6  ;;  %v773_v13 = vadd.f32 %v1400_v48, %v612_v7  ;;  %v1153_v14 = vpop.f32.mrf.mxu0  ;;  %v1177_v15 = vpop.f32.mrf.mxu1 }
 0x107   : > { %v874_v11 = vsel %vm803_vm3, %v771_v61, %v842_v5  ;;  %890 = vst [vmem:[%s1414_s14 + $0x40] sm:$0xff] %v858_v10  ;;  %v861_v16 = vsel %vm790_vm4, %v758_v2, %v829_v8  ;;  %v760_v18 = vadd.f32 %v1153_v14, %v1400_v48  ;;  %v776_v19 = vadd.f32 %v1177_v15, %v1400_v48 }
 0x108   : > { %906 = vst [vmem:[%s1414_s14 + $0xc0] sm:$0xff] %v874_v11  ;;  %v877_v17 = vsel %vm806_vm5, %v774_v3, %v845_v9  ;;  %893 = vst [vmem:[%s1414_s14 + $0x58] sm:$0xff] %v861_v16  ;;  %vm789_vm6 = vcmp.ge.f32.partialorder %v757_v12, 0.0  ;;  %v828_v20 = vmul.f32 %v1405_v50, %v757_v12  ;;  %vm805_vm7 = vcmp.ge.f32.partialorder %v773_v13, 0.0  ;;  %v542_v22 = vpop.f32.mrf.mxu0  ;;  %v622_v23 = vpop.f32.mrf.mxu1 }
 0x109   : > { %909 = vst [vmem:[%s1414_s14 + $0xd8] sm:$0xff] %v877_v17  ;;  %v844_v21 = vmul.f32 %v1405_v50, %v773_v13  ;;  %vm792_vm8 = vcmp.ge.f32.partialorder %v760_v18, 0.0  ;;  %v831_v24 = vmul.f32 %v1405_v50, %v760_v18  ;;  %vm808_vm9 = vcmp.ge.f32.partialorder %v776_v19, 0.0 }
 0x10a   : > { %v847_v25 = vmul.f32 %v1405_v50, %v776_v19  ;;  %v860_v26 = vsel %vm789_vm6, %v757_v12, %v828_v20  ;;  %v759_v28 = vadd.f32 %v1400_v48, %v542_v22  ;;  %v775_v29 = vadd.f32 %v1400_v48, %v622_v23  ;;  %v1156_v30 = vpop.f32.mrf.mxu0  ;;  %v1180_v31 = vpop.f32.mrf.mxu1 }
 0x10b   : > { %v876_v27 = vsel %vm805_vm7, %v773_v13, %v844_v21  ;;  %892 = vst [vmem:[%s1414_s14 + $0x50] sm:$0xff] %v860_v26  ;;  %v863_v32 = vsel %vm792_vm8, %v760_v18, %v831_v24  ;;  %v762_v34 = vadd.f32 %v1156_v30, %v1400_v48  ;;  %v778_v35 = vadd.f32 %v1180_v31, %v1400_v48 }
 0x10c   : > { %908 = vst [vmem:[%s1414_s14 + $0xd0] sm:$0xff] %v876_v27  ;;  %v879_v33 = vsel %vm808_vm9, %v776_v19, %v847_v25  ;;  %895 = vst [vmem:[%s1414_s14 + $0x68] sm:$0xff] %v863_v32  ;;  %vm791_vm10 = vcmp.ge.f32.partialorder %v759_v28, 0.0  ;;  %v830_v36 = vmul.f32 %v1405_v50, %v759_v28  ;;  %vm807_vm11 = vcmp.ge.f32.partialorder %v775_v29, 0.0  ;;  %v552_v38 = vpop.f32.mrf.mxu0  ;;  %v632_v39 = vpop.f32.mrf.mxu1 }
 0x10d   : > { %911 = vst [vmem:[%s1414_s14 + $0xe8] sm:$0xff] %v879_v33  ;;  %v846_v37 = vmul.f32 %v1405_v50, %v775_v29  ;;  %vm794_vm12 = vcmp.ge.f32.partialorder %v762_v34, 0.0  ;;  %v833_v40 = vmul.f32 %v1405_v50, %v762_v34  ;;  %vm810_vm13 = vcmp.ge.f32.partialorder %v778_v35, 0.0 }
 0x10e   : > { %v849_v41 = vmul.f32 %v1405_v50, %v778_v35  ;;  %v862_v42 = vsel %vm791_vm10, %v759_v28, %v830_v36  ;;  %v761_v44 = vadd.f32 %v1400_v48, %v552_v38  ;;  %v777_v45 = vadd.f32 %v1400_v48, %v632_v39 }
 0x10f   : > { %v878_v43 = vsel %vm807_vm11, %v775_v29, %v846_v37  ;;  %894 = vst [vmem:[%s1414_s14 + $0x60] sm:$0xff] %v862_v42  ;;  %v865_v46 = vsel %vm794_vm12, %v762_v34, %v833_v40 }
 0x110   : > { %910 = vst [vmem:[%s1414_s14 + $0xe0] sm:$0xff] %v878_v43  ;;  %v881_v47 = vsel %vm810_vm13, %v778_v35, %v849_v41  ;;  %897 = vst [vmem:[%s1414_s14 + $0x78] sm:$0xff] %v865_v46  ;;  %vm793_vm14 = vcmp.ge.f32.partialorder %v761_v44, 0.0  ;;  %v832_v49 = vmul.f32 %v1405_v50, %v761_v44  ;;  %vm809_vm15 = vcmp.ge.f32.partialorder %v777_v45, 0.0 }
 0x111   : > { %913 = vst [vmem:[%s1414_s14 + $0xf8] sm:$0xff] %v881_v47  ;;  %v848_v51 = vmul.f32 %v1405_v50, %v777_v45 }
 0x112   : > { %v864_v52 = vsel %vm793_vm14, %v761_v44, %v832_v49 }
 0x113   : > { %v880_v53 = vsel %vm809_vm15, %v777_v45, %v848_v51  ;;  %896 = vst [vmem:[%s1414_s14 + $0x70] sm:$0xff] %v864_v52 }
 0x114   : > { %912 = vst [vmem:[%s1414_s14 + $0xf0] sm:$0xff] %v880_v53 }
 0x115 PF: > { %s14_s17 = sadd.s32 1, %s1259_s17   ;;  %s1524_s15 = smov %s1255_s16 }
 0x116   : > { %p11_p5 = scmp.ge.s32.totalorder %s14_s17, 4   ;;  %s1525_s16 = smov %s1527_s18 }
 0x118   :  { %13 = sbr.rel (!%p11_p5) target bundleno = 2 (0x2), region = 83 }

// kernel: recurrent_projection.13
= control target key start
LH: loop header
LB: loop body
LE: loop exit
PB: predicated region body
PF: predicated region fallthrough
CT: control target
= control target key end

     0   :  { %s1360_s18 = smov 0   ;;  %s1362_s19 = smov 0   ;;  %s1591_s0 = inlined_call_operand.vmem [shape: f32[512,128], index: 0, kind: input, shape index: {}]   ;;  %s1592_s1 = inlined_call_operand.vmem [shape: f32[128,128], index: 1, kind: input, shape index: {}]   ;;  %s1593_s2 = inlined_call_operand.vmem [shape: f32[1,128], index: 2, kind: input, shape index: {}]   ;;  %s1594_s3 = inlined_call_operand.vmem [shape: f32[1,128], index: 3, kind: input, shape index: {}]   ;;  %s1595_s4 = inlined_call_operand.vmem [shape: f32[512,128], index: 4, kind: input, shape index: {}]   ;;  %s1596_s5 = inlined_call_operand.vmem [shape: f32[512,128], index: 5, kind: output, shape index: {}]  }
   0x1   :  { %s1364_s20 = smov 0  }
   0x2 LB: > { %s34_s3 = sadd.s32 1, %s1324_s19  ;;  %p1112_p0 = scmp.ge.s32.totalorder %s1328_s20, 1  ;;  %s1328_s20 = sphi %s1364_s20, %s15_s20   ;;  %s1324_s19 = sphi %s1362_s19, %s1598_s19   ;;  %s1320_s18 = sphi %s1360_s18, %s1597_s18  }
   0x3   : > { %p36_p1 = scmp.ge.s32.totalorder %s34_s3, 2  ;;  %p262_p2 = scmp.lt.s32.totalorder %s1328_s20, 3 }
   0x5   : > { %s1600_s3 = smov (%p36_p1, %s34_s3), 0  ;;  %p263_p3 = pnand %p1112_p0, %p262_p2 }
   0x6   : > { %s1113_s12 = sshll.u32 (!%p263_p3), %s1320_s18, 5 }
   0x7   : > { %266 = sbr.rel (%p263_p3) target bundleno = 274 (0x112), region = 40  ;;  %p319_p4 = scmp.lt.s32.totalorder (!%p263_p3), %s1113_s12, 63 }
   0xc   : > { %v475_v0 = vld [vmem:[%s1592_s1 + $0x78] sm:$0xff]  ;;  %v474_v1 = vld [vmem:[%s1592_s1 + $0x70] sm:$0xff]  ;;  %v473_v2 = vld [vmem:[%s1592_s1 + $0x68] sm:$0xff]  ;;  %s1602_s12 = smov (!%p319_p4, %s1113_s12), 63 }
   0xd   : > { %1170 = vmatprep.subr.mxu0 %v475_v0  ;;  %1250 = vmatprep.subr.mxu1 %v475_v0  ;;  %v472_v3 = vld [vmem:[%s1592_s1 + $0x60] sm:$0xff]  ;;  %v471_v4 = vld [vmem:[%s1592_s1 + $0x58] sm:$0xff]  ;;  %v470_v5 = vld [vmem:[%s1592_s1 + $0x50] sm:$0xff]  ;;  %s1423_s27 = sshll.u32 %s1602_s12, 3 }
   0xe   : > { %1171 = vmatpush3.msra.mxu0 %v475_v0  ;;  %1266 = vmatpush3.msra.mxu1 %v475_v0  ;;  %v469_v6 = vld [vmem:[%s1592_s1 + $0x48] sm:$0xff]  ;;  %v468_v7 = vld [vmem:[%s1592_s1 + $0x40] sm:$0xff]  ;;  %v467_v8 = vld [vmem:[%s1592_s1 + $0x38] sm:$0xff]  ;;  %s1432_s7 = scalar_lea.vmem %s1591_s0, %s1423_s27  ;;  %s1473_s12 = scalar_lea.vmem %s1595_s4, %s1423_s27 }
   0xf   : > { %1172 = vmatprep.subr.mxu0 %v474_v1  ;;  %1251 = vmatprep.subr.mxu1 %v474_v1  ;;  %v466_v9 = vld [vmem:[%s1592_s1 + $0x30] sm:$0xff]  ;;  %v465_v10 = vld [vmem:[%s1592_s1 + $0x28] sm:$0xff]  ;;  %v464_v11 = vld [vmem:[%s1592_s1 + $0x20] sm:$0xff]  ;;  %s1494_s17 = scalar_lea.vmem %s1596_s5, %s1423_s27 }
  0x10   : > { %1173 = vmatpush3.msra.mxu0 %v474_v1  ;;  %1267 = vmatpush3.msra.mxu1 %v474_v1  ;;  %v463_v12 = vld [vmem:[%s1592_s1 + $0x18] sm:$0xff]  ;;  %v462_v13 = vld [vmem:[%s1592_s1 + $0x10] sm:$0xff]  ;;  %v461_v14 = vld [vmem:[%s1592_s1 + $0x8] sm:$0xff] }
  0x11   : > { %1174 = vmatprep.subr.mxu0 %v473_v2  ;;  %1252 = vmatprep.subr.mxu1 %v473_v2  ;;  %v460_v15 = vld [vmem:[%s1592_s1] sm:$0xff]  ;;  %v429_v18 = vld [vmem:[%s1432_s7 + $0x8] sm:$0xff]  ;;  %v430_v20 = vld [vmem:[%s1432_s7 + $0x10] sm:$0xff] }
  0x12   : > { %1175 = vmatpush3.msra.mxu0 %v473_v2  ;;  %1268 = vmatpush3.msra.mxu1 %v473_v2  ;;  %v428_v16 = vld [vmem:[%s1432_s7] sm:$0xff]  ;;  %v445_v19 = vld [vmem:[%s1432_s7 + $0x88] sm:$0xff]  ;;  %v446_v21 = vld [vmem:[%s1432_s7 + $0x90] sm:$0xff] }
  0x13   : > { %1176 = vmatprep.subr.mxu0 %v472_v3  ;;  %1253 = vmatprep.subr.mxu1 %v472_v3  ;;  %v444_v17 = vld [vmem:[%s1432_s7 + $0x80] sm:$0xff]  ;;  %v431_v22 = vld [vmem:[%s1432_s7 + $0x18] sm:$0xff]  ;;  %v433_v26 = vld [vmem:[%s1432_s7 + $0x28] sm:$0xff] }
  0x14   : > { %1177 = vmatpush3.msra.mxu0 %v472_v3  ;;  %1269 = vmatpush3.msra.mxu1 %v472_v3  ;;  %v447_v23 = vld [vmem:[%s1432_s7 + $0x98] sm:$0xff]  ;;  %v432_v24 = vld [vmem:[%s1432_s7 + $0x20] sm:$0xff]  ;;  %v449_v27 = vld [vmem:[%s1432_s7 + $0xa8] sm:$0xff] }
  0x15   : > { %1178 = vmatprep.subr.mxu0 %v471_v4  ;;  %1254 = vmatprep.subr.mxu1 %v471_v4  ;;  %v448_v25 = vld [vmem:[%s1432_s7 + $0xa0] sm:$0xff]  ;;  %v434_v28 = vld [vmem:[%s1432_s7 + $0x30] sm:$0xff]  ;;  %v435_v30 = vld [vmem:[%s1432_s7 + $0x38] sm:$0xff] }
  0x16   : > { %1179 = vmatpush3.msra.mxu0 %v471_v4  ;;  %1270 = vmatpush3.msra.mxu1 %v471_v4  ;;  %v450_v29 = vld [vmem:[%s1432_s7 + $0xb0] sm:$0xff]  ;;  %v451_v31 = vld [vmem:[%s1432_s7 + $0xb8] sm:$0xff]  ;;  %v436_v32 = vld [vmem:[%s1432_s7 + $0x40] sm:$0xff] }
  0x17   : > { %1180 = vmatprep.subr.mxu0 %v470_v5  ;;  %1255 = vmatprep.subr.mxu1 %v470_v5  ;;  %v452_v33 = vld [vmem:[%s1432_s7 + $0xc0] sm:$0xff]  ;;  %v437_v34 = vld [vmem:[%s1432_s7 + $0x48] sm:$0xff]  ;;  %v438_v36 = vld [vmem:[%s1432_s7 + $0x50] sm:$0xff] }
  0x18   : > { %1181 = vmatpush3.msra.mxu0 %v470_v5  ;;  %1271 = vmatpush3.msra.mxu1 %v470_v5  ;;  %v453_v35 = vld [vmem:[%s1432_s7 + $0xc8] sm:$0xff]  ;;  %v454_v37 = vld [vmem:[%s1432_s7 + $0xd0] sm:$0xff]  ;;  %v439_v38 = vld [vmem:[%s1432_s7 + $0x58] sm:$0xff] }
  0x19   : > { %1182 = vmatprep.subr.mxu0 %v469_v6  ;;  %1256 = vmatprep.subr.mxu1 %v469_v6  ;;  %v455_v39 = vld [vmem:[%s1432_s7 + $0xd8] sm:$0xff]  ;;  %v440_v40 = vld [vmem:[%s1432_s7 + $0x60] sm:$0xff]  ;;  %v441_v42 = vld [vmem:[%s1432_s7 + $0x68] sm:$0xff] }
  0x1a   : > { %1183 = vmatpush3.msra.mxu0 %v469_v6  ;;  %1272 = vmatpush3.msra.mxu1 %v469_v6  ;;  %v456_v41 = vld [vmem:[%s1432_s7 + $0xe0] sm:$0xff]  ;;  %v457_v43 = vld [vmem:[%s1432_s7 + $0xe8] sm:$0xff]  ;;  %v442_v44 = vld [vmem:[%s1432_s7 + $0x70] sm:$0xff] }
  0x1b   : > { %1184 = vmatprep.subr.mxu0 %v468_v7  ;;  %1257 = vmatprep.subr.mxu1 %v468_v7  ;;  %v458_v45 = vld [vmem:[%s1432_s7 + $0xf0] sm:$0xff]  ;;  %v443_v46 = vld [vmem:[%s1432_s7 + $0x78] sm:$0xff]  ;;  %v840_v48 = vld [vmem:[%s1473_s12 + $0x8] sm:$0xff] }
  0x1c   : > { %1185 = vmatpush3.msra.mxu0 %v468_v7  ;;  %1273 = vmatpush3.msra.mxu1 %v468_v7  ;;  %v459_v47 = vld [vmem:[%s1432_s7 + $0xf8] sm:$0xff]  ;;  %v856_v49 = vld [vmem:[%s1473_s12 + $0x88] sm:$0xff]  ;;  %v1480_v50 = vld [vmem:[%s1593_s2] ss:$0 sm:$0xff]  ;;  %v872_v53 = vmul.f32 2.0, %v840_v48 }
  0x1d   : > { %1186 = vmatprep.subr.mxu0 %v467_v8  ;;  %1258 = vmatprep.subr.mxu1 %v467_v8  ;;  %v839_v51 = vld [vmem:[%s1473_s12] sm:$0xff]  ;;  %v888_v54 = vmul.f32 2.0, %v856_v49  ;;  %v842_v55 = vld [vmem:[%s1473_s12 + $0x18] sm:$0xff]  ;;  %v841_v63 = vld [vmem:[%s1473_s12 + $0x10] sm:$0xff] }
  0x1e   : > { %1187 = vmatpush3.msra.mxu0 %v467_v8  ;;  %1274 = vmatpush3.msra.mxu1 %v467_v8  ;;  %v855_v52 = vld [vmem:[%s1473_s12 + $0x80] sm:$0xff]  ;;  %v858_v56 = vld [vmem:[%s1473_s12 + $0x98] sm:$0xff]  ;;  %v871_v61 = vmul.f32 2.0, %v839_v51  ;;  %v857_v0 = vld [vmem:[%s1473_s12 + $0x90] sm:$0xff]  ;;  %v874_v3 = vmul.f32 2.0, %v842_v55 }
  0x1f   : > { %1188 = vmatprep.subr.mxu0 %v466_v9  ;;  %1259 = vmatprep.subr.mxu1 %v466_v9  ;;  %v887_v62 = vmul.f32 2.0, %v855_v52  ;;  %v890_v4 = vmul.f32 2.0, %v858_v56  ;;  %v848_v49 = vld [vmem:[%s1473_s12 + $0x48] sm:$0xff] }
  0x20   : > { %1189 = vmatpush3.msra.mxu0 %v466_v9  ;;  %1275 = vmatpush3.msra.mxu1 %v466_v9  ;;  %v844_v9 = vld [vmem:[%s1473_s12 + $0x28] sm:$0xff] }
  0x21   : > { %1190 = vmatprep.subr.mxu0 %v465_v10  ;;  %1260 = vmatprep.subr.mxu1 %v465_v10  ;;  %v864_v51 = vld [vmem:[%s1473_s12 + $0xc8] sm:$0xff] }
  0x22   : > { %1191 = vmatpush3.msra.mxu0 %v465_v10  ;;  %1276 = vmatpush3.msra.mxu1 %v465_v10  ;;  %v860_v10 = vld [vmem:[%s1473_s12 + $0xa8] sm:$0xff] }
  0x23   : > { %1192 = vmatprep.subr.mxu0 %v464_v11  ;;  %1261 = vmatprep.subr.mxu1 %v464_v11 }
  0x24   : > { %1193 = vmatpush3.msra.mxu0 %v464_v11  ;;  %1277 = vmatpush3.msra.mxu1 %v464_v11 }
  0x25   : > { %1194 = vmatprep.subr.mxu0 %v463_v12  ;;  %1262 = vmatprep.subr.mxu1 %v463_v12 }
  0x26   : > { %1195 = vmatpush3.msra.mxu0 %v463_v12  ;;  %1278 = vmatpush3.msra.mxu1 %v463_v12 }
  0x27   : > { %1196 = vmatprep.subr.mxu0 %v462_v13  ;;  %1263 = vmatprep.subr.mxu1 %v462_v13 }
  0x28   : > { %1197 = vmatpush3.msra.mxu0 %v462_v13  ;;  %1279 = vmatpush3.msra.mxu1 %v462_v13  ;;  %v873_v13 = vmul.f32 2.0, %v841_v63 }
  0x29   : > { %1198 = vmatprep.subr.mxu0 %v461_v14  ;;  %1264 = vmatprep.subr.mxu1 %v461_v14 }
  0x2a   : > { %1199 = vmatpush3.msra.mxu0 %v461_v14  ;;  %1280 = vmatpush3.msra.mxu1 %v461_v14  ;;  %v889_v14 = vmul.f32 2.0, %v857_v0  ;;  %v880_v0 = vmul.f32 2.0, %v848_v49 }
  0x2b   : > { %1200 = vmatprep.subr.mxu0 %v460_v15  ;;  %1265 = vmatprep.subr.mxu1 %v460_v15 }
  0x2c   : > { %1201 = vmatpush3.msra.mxu0 %v460_v15  ;;  %1281 = vmatpush3.msra.mxu1 %v460_v15 }
  0x2d   : > { %1202 = vmatprep.mubr.f32.mxu0 %v428_v16  ;;  %1226 = vmatprep.mubr.f32.mxu1 %v444_v17 }
  0x2e   : > { %1203 = vmatmul.mubr.f32.vlgmr.msra.gmra.mxu0 %v429_v18  ;;  %1227 = vmatmul.mubr.f32.vlgmr.msra.gmra.mxu1 %v445_v19  ;;  %v843_v19 = vld [vmem:[%s1473_s12 + $0x20] sm:$0xff] }
  0x2f   : > { %1205 = vmatprep.mubr.f32.mxu0 %v430_v20  ;;  %1229 = vmatprep.mubr.f32.mxu1 %v446_v21  ;;  %v859_v20 = vld [vmem:[%s1473_s12 + $0xa0] sm:$0xff] }
  0x32   : > { %1206 = vmatmul.mubr.f32.gmra.mxu0 %v431_v22  ;;  %1230 = vmatmul.mubr.f32.gmra.mxu1 %v447_v23  ;;  %v876_v23 = vmul.f32 2.0, %v844_v9 }
  0x33   : > { %1208 = vmatprep.mubr.f32.mxu0 %v432_v24  ;;  %1232 = vmatprep.mubr.f32.mxu1 %v448_v25  ;;  %v892_v24 = vmul.f32 2.0, %v860_v10 }
  0x36   : > { %1209 = vmatmul.mubr.f32.gmra.mxu0 %v433_v26  ;;  %1233 = vmatmul.mubr.f32.gmra.mxu1 %v449_v27 }
  0x37   : > { %1211 = vmatprep.mubr.f32.mxu0 %v434_v28  ;;  %1235 = vmatprep.mubr.f32.mxu1 %v450_v29  ;;  %v846_v29 = vld [vmem:[%s1473_s12 + $0x38] sm:$0xff] }
  0x3a   : > { %1212 = vmatmul.mubr.f32.gmra.mxu0 %v435_v30  ;;  %1236 = vmatmul.mubr.f32.gmra.mxu1 %v451_v31  ;;  %v862_v30 = vld [vmem:[%s1473_s12 + $0xb8] sm:$0xff] }
  0x3b   : > { %1214 = vmatprep.mubr.f32.mxu0 %v436_v32  ;;  %1238 = vmatprep.mubr.f32.mxu1 %v452_v33  ;;  %v875_v33 = vmul.f32 2.0, %v843_v19 }
  0x3e   : > { %1215 = vmatmul.mubr.f32.gmra.mxu0 %v437_v34  ;;  %1239 = vmatmul.mubr.f32.gmra.mxu1 %v453_v35  ;;  %v891_v34 = vmul.f32 2.0, %v859_v20 }
  0x3f   : > { %1217 = vmatprep.mubr.f32.mxu0 %v438_v36  ;;  %1241 = vmatprep.mubr.f32.mxu1 %v454_v37 }
  0x42   : > { %1218 = vmatmul.mubr.f32.gmra.mxu0 %v439_v38  ;;  %1242 = vmatmul.mubr.f32.gmra.mxu1 %v455_v39  ;;  %v845_v39 = vld [vmem:[%s1473_s12 + $0x30] sm:$0xff] }
  0x43   : > { %1220 = vmatprep.mubr.f32.mxu0 %v440_v40  ;;  %1244 = vmatprep.mubr.f32.mxu1 %v456_v41  ;;  %v861_v40 = vld [vmem:[%s1473_s12 + $0xb0] sm:$0xff] }
  0x44   : > { %v893_v55 = vmul.f32 2.0, %v861_v40 }
  0x46   : > { %1221 = vmatmul.mubr.f32.gmra.mxu0 %v441_v42  ;;  %1245 = vmatmul.mubr.f32.gmra.mxu1 %v457_v43  ;;  %v878_v43 = vmul.f32 2.0, %v846_v29 }
  0x47   : > { %1223 = vmatprep.mubr.f32.mxu0 %v442_v44  ;;  %1247 = vmatprep.mubr.f32.mxu1 %v458_v45  ;;  %v894_v44 = vmul.f32 2.0, %v862_v30 }
  0x4a   : > { %1224 = vmatmul.mubr.f32.gmra.mxu0 %v443_v46  ;;  %1248 = vmatmul.mubr.f32.gmra.mxu1 %v459_v47 }
  0xee   : > { %v1204_v57 = vpop.f32.mrf.mxu0  ;;  %v1228_v58 = vpop.f32.mrf.mxu1 }
  0xef   : > { %v808_v59 = vadd.f32 %v1204_v57, %v1480_v50  ;;  %v824_v60 = vadd.f32 %v1228_v58, %v1480_v50 }
  0xf0   : > { %v542_v1 = vpop.f32.mrf.mxu0  ;;  %v622_v2 = vpop.f32.mrf.mxu1 }
  0xf1   : > { %v904_v5 = vadd.f32 %v872_v53, %v808_v59  ;;  %v920_v6 = vadd.f32 %v888_v54, %v824_v60  ;;  %v807_v7 = vadd.f32 %v1480_v50, %v542_v1  ;;  %v823_v8 = vadd.f32 %v1480_v50, %v622_v2  ;;  %v847_v60 = vld [vmem:[%s1473_s12 + $0x40] sm:$0xff] }
  0xf2   : > { %v1207_v11 = vpop.f32.mrf.mxu0  ;;  %v1231_v12 = vpop.f32.mrf.mxu1  ;;  %v877_v54 = vmul.f32 2.0, %v845_v39  ;;  %v896_v1 = vmul.f32 2.0, %v864_v51  ;;  %v879_v10 = vmul.f32 2.0, %v847_v60 }
  0xf3   : > { %936 = vst [vmem:[%s1494_s17 + $0x8] sm:$0xff] %v904_v5  ;;  %952 = vst [vmem:[%s1494_s17 + $0x88] sm:$0xff] %v920_v6  ;;  %v903_v15 = vadd.f32 %v871_v61, %v807_v7  ;;  %v919_v16 = vadd.f32 %v887_v62, %v823_v8  ;;  %v810_v17 = vadd.f32 %v1207_v11, %v1480_v50  ;;  %v863_v61 = vld [vmem:[%s1473_s12 + $0xc0] sm:$0xff]  ;;  %v850_v6 = vld [vmem:[%s1473_s12 + $0x58] sm:$0xff] }
  0xf4   : > { %v826_v18 = vadd.f32 %v1231_v12, %v1480_v50  ;;  %v552_v21 = vpop.f32.mrf.mxu0  ;;  %v632_v22 = vpop.f32.mrf.mxu1  ;;  %v866_v7 = vld [vmem:[%s1473_s12 + $0xd8] sm:$0xff]  ;;  %v895_v11 = vmul.f32 2.0, %v863_v61  ;;  %v882_v20 = vmul.f32 2.0, %v850_v6 }
  0xf5   : > { %935 = vst [vmem:[%s1494_s17] sm:$0xff] %v903_v15  ;;  %951 = vst [vmem:[%s1494_s17 + $0x80] sm:$0xff] %v919_v16  ;;  %v906_v25 = vadd.f32 %v874_v3, %v810_v17  ;;  %v809_v27 = vadd.f32 %v1480_v50, %v552_v21  ;;  %v825_v28 = vadd.f32 %v1480_v50, %v632_v22  ;;  %v849_v16 = vld [vmem:[%s1473_s12 + $0x50] sm:$0xff]  ;;  %v898_v21 = vmul.f32 2.0, %v866_v7 }
  0xf6   : > { %v922_v26 = vadd.f32 %v890_v4, %v826_v18  ;;  %v1210_v31 = vpop.f32.mrf.mxu0  ;;  %v1234_v32 = vpop.f32.mrf.mxu1  ;;  %v865_v17 = vld [vmem:[%s1473_s12 + $0xd0] sm:$0xff]  ;;  %v881_v30 = vmul.f32 2.0, %v849_v16 }
  0xf7   : > { %938 = vst [vmem:[%s1494_s17 + $0x18] sm:$0xff] %v906_v25  ;;  %v905_v35 = vadd.f32 %v873_v13, %v809_v27  ;;  %v921_v36 = vadd.f32 %v889_v14, %v825_v28  ;;  %v812_v37 = vadd.f32 %v1210_v31, %v1480_v50  ;;  %v828_v38 = vadd.f32 %v1234_v32, %v1480_v50  ;;  %v868_v27 = vld [vmem:[%s1473_s12 + $0xe8] sm:$0xff] }
  0xf8   : > { %954 = vst [vmem:[%s1494_s17 + $0x98] sm:$0xff] %v922_v26  ;;  %v562_v41 = vpop.f32.mrf.mxu0  ;;  %v642_v42 = vpop.f32.mrf.mxu1  ;;  %v852_v26 = vld [vmem:[%s1473_s12 + $0x68] sm:$0xff]  ;;  %v897_v31 = vmul.f32 2.0, %v865_v17 }
  0xf9   : > { %937 = vst [vmem:[%s1494_s17 + $0x10] sm:$0xff] %v905_v35  ;;  %953 = vst [vmem:[%s1494_s17 + $0x90] sm:$0xff] %v921_v36  ;;  %v908_v45 = vadd.f32 %v876_v23, %v812_v37  ;;  %v924_v46 = vadd.f32 %v892_v24, %v828_v38  ;;  %v811_v47 = vadd.f32 %v1480_v50, %v562_v41  ;;  %v851_v36 = vld [vmem:[%s1473_s12 + $0x60] sm:$0xff]  ;;  %v884_v40 = vmul.f32 2.0, %v852_v26 }
  0xfa   : > { %v827_v48 = vadd.f32 %v1480_v50, %v642_v42  ;;  %v1213_v52 = vpop.f32.mrf.mxu0  ;;  %v1237_v53 = vpop.f32.mrf.mxu1  ;;  %v867_v37 = vld [vmem:[%s1473_s12 + $0xe0] sm:$0xff]  ;;  %v900_v41 = vmul.f32 2.0, %v868_v27  ;;  %v883_v51 = vmul.f32 2.0, %v851_v36 }
  0xfb   : > { %940 = vst [vmem:[%s1494_s17 + $0x28] sm:$0xff] %v908_v45  ;;  %956 = vst [vmem:[%s1494_s17 + $0xa8] sm:$0xff] %v924_v46  ;;  %v907_v56 = vadd.f32 %v875_v33, %v811_v47  ;;  %v814_v58 = vadd.f32 %v1213_v52, %v1480_v50  ;;  %v830_v59 = vadd.f32 %v1237_v53, %v1480_v50  ;;  %v854_v46 = vld [vmem:[%s1473_s12 + $0x78] sm:$0xff]  ;;  %v899_v52 = vmul.f32 2.0, %v867_v37 }
  0xfc   : > { %v923_v57 = vadd.f32 %v891_v34, %v827_v48  ;;  %v572_v62 = vpop.f32.mrf.mxu0  ;;  %v652_v63 = vpop.f32.mrf.mxu1  ;;  %v870_v47 = vld [vmem:[%s1473_s12 + $0xf8] sm:$0xff]  ;;  %v886_v61 = vmul.f32 2.0, %v854_v46 }
  0xfd   : > { %939 = vst [vmem:[%s1494_s17 + $0x20] sm:$0xff] %v907_v56  ;;  %v910_v2 = vadd.f32 %v878_v43, %v814_v58  ;;  %v926_v3 = vadd.f32 %v894_v44, %v830_v59  ;;  %v813_v4 = vadd.f32 %v1480_v50, %v572_v62  ;;  %v829_v5 = vadd.f32 %v1480_v50, %v652_v63  ;;  %v869_v58 = vld [vmem:[%s1473_s12 + $0xf0] sm:$0xff] }
  0xfe   : > { %955 = vst [vmem:[%s1494_s17 + $0xa0] sm:$0xff] %v923_v57  ;;  %v1216_v8 = vpop.f32.mrf.mxu0  ;;  %v1240_v9 = vpop.f32.mrf.mxu1  ;;  %v853_v57 = vld [vmem:[%s1473_s12 + $0x70] sm:$0xff]  ;;  %v902_v62 = vmul.f32 2.0, %v870_v47  ;;  %v901_v6 = vmul.f32 2.0, %v869_v58 }
  0xff   : > { %942 = vst [vmem:[%s1494_s17 + $0x38] sm:$0xff] %v910_v2  ;;  %958 = vst [vmem:[%s1494_s17 + $0xb8] sm:$0xff] %v926_v3  ;;  %v909_v12 = vadd.f32 %v877_v54, %v813_v4  ;;  %v925_v13 = vadd.f32 %v893_v55, %v829_v5  ;;  %v816_v14 = vadd.f32 %v1216_v8, %v1480_v50  ;;  %v885_v5 = vmul.f32 2.0, %v853_v57 }
 0x100   : > { %v832_v15 = vadd.f32 %v1240_v9, %v1480_v50  ;;  %v582_v18 = vpop.f32.mrf.mxu0  ;;  %v662_v19 = vpop.f32.mrf.mxu1 }
 0x101   : > { %941 = vst [vmem:[%s1494_s17 + $0x30] sm:$0xff] %v909_v12  ;;  %957 = vst [vmem:[%s1494_s17 + $0xb0] sm:$0xff] %v925_v13  ;;  %v912_v22 = vadd.f32 %v880_v0, %v816_v14  ;;  %v815_v24 = vadd.f32 %v1480_v50, %v582_v18  ;;  %v831_v25 = vadd.f32 %v1480_v50, %v662_v19 }
 0x102   : > { %v928_v23 = vadd.f32 %v896_v1, %v832_v15  ;;  %v1219_v28 = vpop.f32.mrf.mxu0  ;;  %v1243_v29 = vpop.f32.mrf.mxu1 }
 0x103   : > { %944 = vst [vmem:[%s1494_s17 + $0x48] sm:$0xff] %v912_v22  ;;  %v911_v32 = vadd.f32 %v879_v10, %v815_v24  ;;  %v927_v33 = vadd.f32 %v895_v11, %v831_v25  ;;  %v818_v34 = vadd.f32 %v1219_v28, %v1480_v50  ;;  %v834_v35 = vadd.f32 %v1243_v29, %v1480_v50 }
 0x104   : > { %960 = vst [vmem:[%s1494_s17 + $0xc8] sm:$0xff] %v928_v23  ;;  %v592_v38 = vpop.f32.mrf.mxu0  ;;  %v672_v39 = vpop.f32.mrf.mxu1 }
 0x105   : > { %943 = vst [vmem:[%s1494_s17 + $0x40] sm:$0xff] %v911_v32  ;;  %959 = vst [vmem:[%s1494_s17 + $0xc0] sm:$0xff] %v927_v33  ;;  %v914_v42 = vadd.f32 %v882_v20, %v818_v34  ;;  %v930_v43 = vadd.f32 %v898_v21, %v834_v35  ;;  %v817_v44 = vadd.f32 %v1480_v50, %v592_v38 }
 0x106   : > { %v833_v45 = vadd.f32 %v1480_v50, %v672_v39  ;;  %v1222_v48 = vpop.f32.mrf.mxu0  ;;  %v1246_v49 = vpop.f32.mrf.mxu1 }
 0x107   : > { %946 = vst [vmem:[%s1494_s17 + $0x58] sm:$0xff] %v914_v42  ;;  %962 = vst [vmem:[%s1494_s17 + $0xd8] sm:$0xff] %v930_v43  ;;  %v913_v53 = vadd.f32 %v881_v30, %v817_v44  ;;  %v820_v55 = vadd.f32 %v1222_v48, %v1480_v50  ;;  %v836_v56 = vadd.f32 %v1246_v49, %v1480_v50 }
 0x108   : > { %v929_v54 = vadd.f32 %v897_v31, %v833_v45  ;;  %v602_v59 = vpop.f32.mrf.mxu0  ;;  %v682_v60 = vpop.f32.mrf.mxu1 }
 0x109   : > { %945 = vst [vmem:[%s1494_s17 + $0x50] sm:$0xff] %v913_v53  ;;  %v916_v63 = vadd.f32 %v884_v40, %v820_v55  ;;  %v932_v0 = vadd.f32 %v900_v41, %v836_v56  ;;  %v819_v1 = vadd.f32 %v1480_v50, %v602_v59  ;;  %v835_v2 = vadd.f32 %v1480_v50, %v682_v60 }
 0x10a   : > { %961 = vst [vmem:[%s1494_s17 + $0xd0] sm:$0xff] %v929_v54  ;;  %v1225_v3 = vpop.f32.mrf.mxu0  ;;  %v1249_v4 = vpop.f32.mrf.mxu1 }
 0x10b   : > { %948 = vst [vmem:[%s1494_s17 + $0x68] sm:$0xff] %v916_v63  ;;  %964 = vst [vmem:[%s1494_s17 + $0xe8] sm:$0xff] %v932_v0  ;;  %v915_v7 = vadd.f32 %v883_v51, %v819_v1  ;;  %v931_v8 = vadd.f32 %v899_v52, %v835_v2  ;;  %v822_v9 = vadd.f32 %v1225_v3, %v1480_v50 }
 0x10c   : > { %v838_v10 = vadd.f32 %v1249_v4, %v1480_v50  ;;  %v612_v11 = vpop.f32.mrf.mxu0  ;;  %v692_v12 = vpop.f32.mrf.mxu1 }
 0x10d   : > { %947 = vst [vmem:[%s1494_s17 + $0x60] sm:$0xff] %v915_v7  ;;  %963 = vst [vmem:[%s1494_s17 + $0xe0] sm:$0xff] %v931_v8  ;;  %v918_v13 = vadd.f32 %v886_v61, %v822_v9  ;;  %v821_v15 = vadd.f32 %v1480_v50, %v612_v11  ;;  %v837_v16 = vadd.f32 %v1480_v50, %v692_v12 }
 0x10e   : > { %v934_v14 = vadd.f32 %v902_v62, %v838_v10 }
 0x10f   : > { %950 = vst [vmem:[%s1494_s17 + $0x78] sm:$0xff] %v918_v13  ;;  %v917_v17 = vadd.f32 %v885_v5, %v821_v15  ;;  %v933_v18 = vadd.f32 %v901_v6, %v837_v16 }
 0x110   : > { %966 = vst [vmem:[%s1494_s17 + $0xf8] sm:$0xff] %v934_v14 }
 0x111   : > { %949 = vst [vmem:[%s1494_s17 + $0x70] sm:$0xff] %v917_v17  ;;  %965 = vst [vmem:[%s1494_s17 + $0xf0] sm:$0xff] %v933_v18 }
 0x112 PF: > { %s15_s20 = sadd.s32 1, %s1328_s20   ;;  %s1597_s18 = smov %s1324_s19 }
 0x113   : > { %p12_p5 = scmp.ge.s32.totalorder %s15_s20, 4   ;;  %s1598_s19 = smov %s1600_s3 }
 0x115   :  { %14 = sbr.rel (!%p12_p5) target bundleno = 2 (0x2), region = 90 }

// kernel: recurrent_projection.14
= control target key start
LH: loop header
LB: loop body
LE: loop exit
PB: predicated region body
PF: predicated region fallthrough
CT: control target
= control target key end

     0   :  { %s936_s1 = inlined_call_operand.vmem [shape: f32[256,128], index: 1, kind: input, shape index: {}]   ;;  %s937_s0 = inlined_call_operand.vmem [shape: f32[128,256], index: 0, kind: input, shape index: {}]   ;;  %s938_s2 = inlined_call_operand.vmem [shape: f32[1,128], index: 2, kind: input, shape index: {}]   ;;  %s939_s3 = inlined_call_operand.vmem [shape: f32[1,128], index: 3, kind: input, shape index: {}]   ;;  %s940_s4 = inlined_call_operand.vmem [shape: f32[128,128], index: 4, kind: input, shape index: {}]   ;;  %s941_s5 = inlined_call_operand.vmem [shape: f32[128,128], index: 5, kind: output, shape index: {}]  }
   0x1   :  { %v119_v0 = vld [vmem:[%s936_s1 + $0xf8] sm:$0xff]  ;;  %v118_v2 = vld [vmem:[%s936_s1 + $0xf0] sm:$0xff]  ;;  %v117_v4 = vld [vmem:[%s936_s1 + $0xe8] sm:$0xff] }
   0x2   :  { %v103_v1 = vld [vmem:[%s936_s1 + $0x78] sm:$0xff]  ;;  %464 = vmatprep.subr.mxu0 %v119_v0  ;;  %544 = vmatprep.subr.mxu1 %v119_v0  ;;  %v102_v3 = vld [vmem:[%s936_s1 + $0x70] sm:$0xff]  ;;  %v101_v5 = vld [vmem:[%s936_s1 + $0x68] sm:$0xff] }
   0x3   :  { %465 = vmatpush3.msra.mxu0 %v103_v1  ;;  %560 = vmatpush3.msra.mxu1 %v103_v1  ;;  %v116_v6 = vld [vmem:[%s936_s1 + $0xe0] sm:$0xff]  ;;  %v115_v8 = vld [vmem:[%s936_s1 + $0xd8] sm:$0xff]  ;;  %v114_v10 = vld [vmem:[%s936_s1 + $0xd0] sm:$0xff] }
   0x4   :  { %466 = vmatprep.subr.mxu0 %v118_v2  ;;  %545 = vmatprep.subr.mxu1 %v118_v2  ;;  %v100_v7 = vld [vmem:[%s936_s1 + $0x60] sm:$0xff]  ;;  %v99_v9 = vld [vmem:[%s936_s1 + $0x58] sm:$0xff]  ;;  %v98_v11 = vld [vmem:[%s936_s1 + $0x50] sm:$0xff] }
   0x5   :  { %467 = vmatpush3.msra.mxu0 %v102_v3  ;;  %561 = vmatpush3.msra.mxu1 %v102_v3  ;;  %v113_v12 = vld [vmem:[%s936_s1 + $0xc8] sm:$0xff]  ;;  %v112_v14 = vld [vmem:[%s936_s1 + $0xc0] sm:$0xff]  ;;  %v111_v16 = vld [vmem:[%s936_s1 + $0xb8] sm:$0xff] }
   0x6   :  { %468 = vmatprep.subr.mxu0 %v117_v4  ;;  %546 = vmatprep.subr.mxu1 %v117_v4  ;;  %v97_v13 = vld [vmem:[%s936_s1 + $0x48] sm:$0xff]  ;;  %v96_v15 = vld [vmem:[%s936_s1 + $0x40] sm:$0xff]  ;;  %v95_v17 = vld [vmem:[%s936_s1 + $0x38] sm:$0xff] }
   0x7   :  { %469 = vmatpush3.msra.mxu0 %v101_v5  ;;  %562 = vmatpush3.msra.mxu1 %v101_v5  ;;  %v110_v18 = vld [vmem:[%s936_s1 + $0xb0] sm:$0xff]  ;;  %v109_v20 = vld [vmem:[%s936_s1 + $0xa8] sm:$0xff]  ;;  %v108_v22 = vld [vmem:[%s936_s1 + $0xa0] sm:$0xff] }
   0x8   :  { %470 = vmatprep.subr.mxu0 %v116_v6  ;;  %547 = vmatprep.subr.mxu1 %v116_v6  ;;  %v94_v19 = vld [vmem:[%s936_s1 + $0x30] sm:$0xff]  ;;  %v93_v21 = vld [vmem:[%s936_s1 + $0x28] sm:$0xff]  ;;  %v92_v23 = vld [vmem:[%s936_s1 + $0x20] sm:$0xff] }
   0x9   :  { %471 = vmatpush3.msra.mxu0 %v100_v7  ;;  %563 = vmatpush3.msra.mxu1 %v100_v7  ;;  %v107_v24 = vld [vmem:[%s936_s1 + $0x98] sm:$0xff]  ;;  %v106_v26 = vld [vmem:[%s936_s1 + $0x90] sm:$0xff]  ;;  %v105_v28 = vld [vmem:[%s936_s1 + $0x88] sm:$0xff] }
   0xa   :  { %472 = vmatprep.subr.mxu0 %v115_v8  ;;  %548 = vmatprep.subr.mxu1 %v115_v8  ;;  %v91_v25 = vld [vmem:[%s936_s1 + $0x18] sm:$0xff]  ;;  %v90_v27 = vld [vmem:[%s936_s1 + $0x10] sm:$0xff]  ;;  %v89_v29 = vld [vmem:[%s936_s1 + $0x8] sm:$0xff] }
   0xb   :  { %473 = vmatpush3.msra.mxu0 %v99_v9  ;;  %564 = vmatpush3.msra.mxu1 %v99_v9  ;;  %v104_v30 = vld [vmem:[%s936_s1 + $0x80] sm:$0xff]  ;;  %v57_v32 = vld [vmem:[%s937_s0 + $0x8] sm:$0xff]  ;;  %v59_v36 = vld [vmem:[%s937_s0 + $0x18] sm:$0xff] }
   0xc   :  { %474 = vmatprep.subr.mxu0 %v114_v10  ;;  %549 = vmatprep.subr.mxu1 %v114_v10  ;;  %v88_v31 = vld [vmem:[%s936_s1] sm:$0xff]  ;;  %v73_v33 = vld [vmem:[%s937_s0 + $0x88] sm:$0xff]  ;;  %v75_v37 = vld [vmem:[%s937_s0 + $0x98] sm:$0xff] }
   0xd   :  { %475 = vmatpush3.msra.mxu0 %v98_v11  ;;  %565 = vmatpush3.msra.mxu1 %v98_v11  ;;  %v56_v34 = vld [vmem:[%s937_s0] sm:$0xff]  ;;  %v58_v38 = vld [vmem:[%s937_s0 + $0x10] sm:$0xff]  ;;  %v61_v40 = vld [vmem:[%s937_s0 + $0x28] sm:$0xff] }
   0xe   :  { %476 = vmatprep.subr.mxu0 %v113_v12  ;;  %550 = vmatprep.subr.mxu1 %v113_v12  ;;  %v72_v35 = vld [vmem:[%s937_s0 + $0x80] sm:$0xff]  ;;  %v74_v39 = vld [vmem:[%s937_s0 + $0x90] sm:$0xff]  ;;  %v77_v41 = vld [vmem:[%s937_s0 + $0xa8] sm:$0xff] }
   0xf   :  { %477 = vmatpush3.msra.mxu0 %v97_v13  ;;  %566 = vmatpush3.msra.mxu1 %v97_v13  ;;  %v60_v42 = vld [vmem:[%s937_s0 + $0x20] sm:$0xff]  ;;  %v63_v44 = vld [vmem:[%s937_s0 + $0x38] sm:$0xff]  ;;  %v62_v46 = vld [vmem:[%s937_s0 + $0x30] sm:$0xff] }
  0x10   :  { %478 = vmatprep.subr.mxu0 %v112_v14  ;;  %551 = vmatprep.subr.mxu1 %v112_v14  ;;  %v76_v43 = vld [vmem:[%s937_s0 + $0xa0] sm:$0xff]  ;;  %v79_v45 = vld [vmem:[%s937_s0 + $0xb8] sm:$0xff]  ;;  %v78_v47 = vld [vmem:[%s937_s0 + $0xb0] sm:$0xff] }
  0x11   :  { %479 = vmatpush3.msra.mxu0 %v96_v15  ;;  %567 = vmatpush3.msra.mxu1 %v96_v15  ;;  %v65_v48 = vld [vmem:[%s937_s0 + $0x48] sm:$0xff]  ;;  %v64_v50 = vld [vmem:[%s937_s0 + $0x40] sm:$0xff]  ;;  %v67_v52 = vld [vmem:[%s937_s0 + $0x58] sm:$0xff] }
  0x12   :  { %480 = vmatprep.subr.mxu0 %v111_v16  ;;  %552 = vmatprep.subr.mxu1 %v111_v16  ;;  %v81_v49 = vld [vmem:[%s937_s0 + $0xc8] sm:$0xff]  ;;  %v80_v51 = vld [vmem:[%s937_s0 + $0xc0] sm:$0xff]  ;;  %v83_v53 = vld [vmem:[%s937_s0 + $0xd8] sm:$0xff] }
  0x13   :  { %481 = vmatpush3.msra.mxu0 %v95_v17  ;;  %568 = vmatpush3.msra.mxu1 %v95_v17  ;;  %v66_v54 = vld [vmem:[%s937_s0 + $0x50] sm:$0xff]  ;;  %v69_v56 = vld [vmem:[%s937_s0 + $0x68] sm:$0xff]  ;;  %v68_v58 = vld [vmem:[%s937_s0 + $0x60] sm:$0xff] }
  0x14   :  { %482 = vmatprep.subr.mxu0 %v110_v18  ;;  %553 = vmatprep.subr.mxu1 %v110_v18  ;;  %v82_v55 = vld [vmem:[%s937_s0 + $0xd0] sm:$0xff]  ;;  %v85_v57 = vld [vmem:[%s937_s0 + $0xe8] sm:$0xff]  ;;  %v84_v59 = vld [vmem:[%s937_s0 + $0xe0] sm:$0xff] }
  0x15   :  { %483 = vmatpush3.msra.mxu0 %v94_v19  ;;  %569 = vmatpush3.msra.mxu1 %v94_v19  ;;  %v71_v60 = vld [vmem:[%s937_s0 + $0x78] sm:$0xff]  ;;  %v70_v62 = vld [vmem:[%s937_s0 + $0x70] sm:$0xff]  ;;  %v801_v3 = vld [vmem:[%s938_s2] ss:$0 sm:$0xff] }
  0x16   :  { %484 = vmatprep.subr.mxu0 %v109_v20  ;;  %554 = vmatprep.subr.mxu1 %v109_v20  ;;  %v87_v61 = vld [vmem:[%s937_s0 + $0xf8] sm:$0xff]  ;;  %v86_v63 = vld [vmem:[%s937_s0 + $0xf0] sm:$0xff]  ;;  %v806_v7 = vld [vmem:[%s939_s3] ss:$0 sm:$0xff] }
  0x17   :  { %485 = vmatpush3.msra.mxu0 %v93_v21  ;;  %570 = vmatpush3.msra.mxu1 %v93_v21  ;;  %v410_v21 = vld [vmem:[%s940_s4] sm:$0xff] }
  0x18   :  { %486 = vmatprep.subr.mxu0 %v108_v22  ;;  %555 = vmatprep.subr.mxu1 %v108_v22 }
  0x19   :  { %487 = vmatpush3.msra.mxu0 %v92_v23  ;;  %571 = vmatpush3.msra.mxu1 %v92_v23  ;;  %v418_v23 = vld [vmem:[%s940_s4 + $0x40] sm:$0xff] }
  0x1a   :  { %488 = vmatprep.subr.mxu0 %v107_v24  ;;  %556 = vmatprep.subr.mxu1 %v107_v24 }
  0x1b   :  { %489 = vmatpush3.msra.mxu0 %v91_v25  ;;  %572 = vmatpush3.msra.mxu1 %v91_v25 }
  0x1c   :  { %490 = vmatprep.subr.mxu0 %v106_v26  ;;  %557 = vmatprep.subr.mxu1 %v106_v26 }
  0x1d   :  { %491 = vmatpush3.msra.mxu0 %v90_v27  ;;  %573 = vmatpush3.msra.mxu1 %v90_v27 }
  0x1e   :  { %492 = vmatprep.subr.mxu0 %v105_v28  ;;  %558 = vmatprep.subr.mxu1 %v105_v28 }
  0x1f   :  { %493 = vmatpush3.msra.mxu0 %v89_v29  ;;  %574 = vmatpush3.msra.mxu1 %v89_v29 }
  0x20   :  { %494 = vmatprep.subr.mxu0 %v104_v30  ;;  %559 = vmatprep.subr.mxu1 %v104_v30 }
  0x21   :  { %495 = vmatpush3.msra.mxu0 %v88_v31  ;;  %575 = vmatpush3.msra.mxu1 %v88_v31 }
  0x22   :  { %184 = vmatprep.mubr.f32.mxu0 %v57_v32  ;;  %224 = vmatprep.mubr.f32.mxu1 %v73_v33 }
  0x23   :  { %185 = vmatmul.mubr.f32.vlgmr.msra.gmra.mxu0 %v56_v34  ;;  %225 = vmatmul.mubr.f32.vlgmr.msra.gmra.mxu1 %v72_v35 }
  0x24   :  { %189 = vmatprep.mubr.f32.mxu0 %v59_v36  ;;  %229 = vmatprep.mubr.f32.mxu1 %v75_v37 }
  0x27   :  { %190 = vmatmul.mubr.f32.gmra.mxu0 %v58_v38  ;;  %230 = vmatmul.mubr.f32.gmra.mxu1 %v74_v39 }
  0x28   :  { %194 = vmatprep.mubr.f32.mxu0 %v61_v40  ;;  %234 = vmatprep.mubr.f32.mxu1 %v77_v41  ;;  %v411_v41 = vld [vmem:[%s940_s4 + $0x8] sm:$0xff] }
  0x2b   :  { %195 = vmatmul.mubr.f32.gmra.mxu0 %v60_v42  ;;  %235 = vmatmul.mubr.f32.gmra.mxu1 %v76_v43 }
  0x2c   :  { %199 = vmatprep.mubr.f32.mxu0 %v63_v44  ;;  %239 = vmatprep.mubr.f32.mxu1 %v79_v45 }
  0x2f   :  { %200 = vmatmul.mubr.f32.gmra.mxu0 %v62_v46  ;;  %240 = vmatmul.mubr.f32.gmra.mxu1 %v78_v47  ;;  %v419_v46 = vld [vmem:[%s940_s4 + $0x48] sm:$0xff] }
  0x30   :  { %204 = vmatprep.mubr.f32.mxu0 %v65_v48  ;;  %244 = vmatprep.mubr.f32.mxu1 %v81_v49 }
  0x33   :  { %205 = vmatmul.mubr.f32.gmra.mxu0 %v64_v50  ;;  %245 = vmatmul.mubr.f32.gmra.mxu1 %v80_v51 }
  0x34   :  { %209 = vmatprep.mubr.f32.mxu0 %v67_v52  ;;  %249 = vmatprep.mubr.f32.mxu1 %v83_v53 }
  0x37   :  { %210 = vmatmul.mubr.f32.gmra.mxu0 %v66_v54  ;;  %250 = vmatmul.mubr.f32.gmra.mxu1 %v82_v55  ;;  %v412_v55 = vld [vmem:[%s940_s4 + $0x10] sm:$0xff] }
  0x38   :  { %214 = vmatprep.mubr.f32.mxu0 %v69_v56  ;;  %254 = vmatprep.mubr.f32.mxu1 %v85_v57 }
  0x3b   :  { %215 = vmatmul.mubr.f32.gmra.mxu0 %v68_v58  ;;  %255 = vmatmul.mubr.f32.gmra.mxu1 %v84_v59 }
  0x3c   :  { %219 = vmatprep.mubr.f32.mxu0 %v71_v60  ;;  %259 = vmatprep.mubr.f32.mxu1 %v87_v61  ;;  %v420_v60 = vld [vmem:[%s940_s4 + $0x50] sm:$0xff] }
  0x3f   :  { %220 = vmatmul.mubr.f32.gmra.mxu0 %v70_v62  ;;  %260 = vmatmul.mubr.f32.gmra.mxu1 %v86_v63 }
  0xe3   :  { %v496_v0 = vpop.f32.mrf.mxu0  ;;  %v520_v1 = vpop.f32.mrf.mxu1 }
  0xe5   :  { %v497_v2 = vpop.f32.mrf.mxu0  ;;  %v521_v4 = vpop.f32.mrf.mxu1 }
  0xe6   :  { %v498_v5 = vadd.f32 %v497_v2, %v496_v0  ;;  %v522_v6 = vadd.f32 %v521_v4, %v520_v1 }
  0xe7   :  { %v499_v8 = vpop.f32.mrf.mxu0  ;;  %v523_v9 = vpop.f32.mrf.mxu1 }
  0xe8   :  { %v323_v10 = vadd.f32 %v498_v5, %v801_v3  ;;  %v331_v11 = vadd.f32 %v522_v6, %v801_v3 }
  0xe9   :  { %v500_v12 = vpop.f32.mrf.mxu0  ;;  %v524_v13 = vpop.f32.mrf.mxu1 }
  0xea   :  { %vm339_vm0 = vcmp.ge.f32.partialorder %v323_v10, 0.0  ;;  %v362_v14 = vmul.f32 %v806_v7, %v323_v10  ;;  %vm347_vm1 = vcmp.ge.f32.partialorder %v331_v11, 0.0  ;;  %v370_v15 = vmul.f32 %v806_v7, %v331_v11 }
  0xeb   :  { %v501_v16 = vadd.f32 %v500_v12, %v499_v8  ;;  %v525_v17 = vadd.f32 %v524_v13, %v523_v9  ;;  %v502_v18 = vpop.f32.mrf.mxu0  ;;  %v526_v19 = vpop.f32.mrf.mxu1 }
  0xec   :  { %v378_v20 = vsel %vm339_vm0, %v323_v10, %v362_v14  ;;  %v386_v22 = vsel %vm347_vm1, %v331_v11, %v370_v15  ;;  %v413_v14 = vld [vmem:[%s940_s4 + $0x18] sm:$0xff] }
  0xed   :  { %v394_v24 = vmul.f32 -1.0, %v378_v20  ;;  %v402_v25 = vmul.f32 -1.0, %v386_v22  ;;  %v324_v26 = vadd.f32 %v501_v16, %v801_v3  ;;  %v332_v27 = vadd.f32 %v525_v17, %v801_v3  ;;  %v503_v28 = vpop.f32.mrf.mxu0  ;;  %v527_v29 = vpop.f32.mrf.mxu1  ;;  %v421_v20 = vld [vmem:[%s940_s4 + $0x58] sm:$0xff] }
  0xee   :  { %v504_v30 = vadd.f32 %v503_v28, %v502_v18  ;;  %v528_v31 = vadd.f32 %v527_v29, %v526_v19  ;;  %v414_v29 = vld [vmem:[%s940_s4 + $0x20] sm:$0xff] }
  0xef   :  { %v426_v32 = vadd.f32 %v410_v21, %v394_v24  ;;  %v434_v33 = vadd.f32 %v418_v23, %v402_v25  ;;  %vm340_vm2 = vcmp.ge.f32.partialorder %v324_v26, 0.0  ;;  %v363_v34 = vmul.f32 %v806_v7, %v324_v26  ;;  %v505_v35 = vpop.f32.mrf.mxu0  ;;  %v529_v36 = vpop.f32.mrf.mxu1 }
  0xf0   :  { %vm348_vm3 = vcmp.ge.f32.partialorder %v332_v27, 0.0  ;;  %v371_v37 = vmul.f32 %v806_v7, %v332_v27  ;;  %v325_v38 = vadd.f32 %v504_v30, %v801_v3  ;;  %v333_v39 = vadd.f32 %v528_v31, %v801_v3 }
  0xf1   :  { %442 = vst [vmem:[%s941_s5] sm:$0xff] %v426_v32  ;;  %450 = vst [vmem:[%s941_s5 + $0x40] sm:$0xff] %v434_v33  ;;  %v379_v40 = vsel %vm340_vm2, %v324_v26, %v363_v34  ;;  %v506_v42 = vpop.f32.mrf.mxu0  ;;  %v530_v43 = vpop.f32.mrf.mxu1  ;;  %v422_v34 = vld [vmem:[%s940_s4 + $0x60] sm:$0xff] }
  0xf2   :  { %v395_v44 = vmul.f32 -1.0, %v379_v40  ;;  %v387_v45 = vsel %vm348_vm3, %v332_v27, %v371_v37  ;;  %vm341_vm4 = vcmp.ge.f32.partialorder %v325_v38, 0.0  ;;  %v364_v47 = vmul.f32 %v806_v7, %v325_v38 }
  0xf3   :  { %v403_v48 = vmul.f32 -1.0, %v387_v45  ;;  %vm349_vm5 = vcmp.ge.f32.partialorder %v333_v39, 0.0  ;;  %v372_v49 = vmul.f32 %v806_v7, %v333_v39  ;;  %v507_v50 = vadd.f32 %v506_v42, %v505_v35  ;;  %v508_v51 = vpop.f32.mrf.mxu0  ;;  %v532_v52 = vpop.f32.mrf.mxu1 }
  0xf4   :  { %v427_v53 = vadd.f32 %v411_v41, %v395_v44  ;;  %v380_v54 = vsel %vm341_vm4, %v325_v38, %v364_v47  ;;  %v531_v56 = vadd.f32 %v530_v43, %v529_v36 }
  0xf5   :  { %v435_v57 = vadd.f32 %v419_v46, %v403_v48  ;;  %v396_v58 = vmul.f32 -1.0, %v380_v54  ;;  %v388_v59 = vsel %vm349_vm5, %v333_v39, %v372_v49  ;;  %v326_v61 = vadd.f32 %v507_v50, %v801_v3  ;;  %v509_v62 = vpop.f32.mrf.mxu0  ;;  %v533_v63 = vpop.f32.mrf.mxu1  ;;  %v415_v50 = vld [vmem:[%s940_s4 + $0x28] sm:$0xff] }
  0xf6   :  { %443 = vst [vmem:[%s941_s5 + $0x8] sm:$0xff] %v427_v53  ;;  %v404_v0 = vmul.f32 -1.0, %v388_v59  ;;  %v334_v1 = vadd.f32 %v531_v56, %v801_v3  ;;  %v510_v2 = vadd.f32 %v509_v62, %v508_v51  ;;  %v534_v4 = vadd.f32 %v533_v63, %v532_v52  ;;  %v423_v56 = vld [vmem:[%s940_s4 + $0x68] sm:$0xff]  ;;  %v416_v63 = vld [vmem:[%s940_s4 + $0x30] sm:$0xff] }
  0xf7   :  { %451 = vst [vmem:[%s941_s5 + $0x48] sm:$0xff] %v435_v57  ;;  %v428_v5 = vadd.f32 %v412_v55, %v396_v58  ;;  %vm342_vm6 = vcmp.ge.f32.partialorder %v326_v61, 0.0  ;;  %v365_v6 = vmul.f32 %v806_v7, %v326_v61  ;;  %v511_v8 = vpop.f32.mrf.mxu0  ;;  %v535_v9 = vpop.f32.mrf.mxu1 }
  0xf8   :  { %v436_v10 = vadd.f32 %v420_v60, %v404_v0  ;;  %vm350_vm7 = vcmp.ge.f32.partialorder %v334_v1, 0.0  ;;  %v373_v11 = vmul.f32 %v806_v7, %v334_v1  ;;  %v327_v12 = vadd.f32 %v510_v2, %v801_v3 }
  0xf9   :  { %444 = vst [vmem:[%s941_s5 + $0x10] sm:$0xff] %v428_v5  ;;  %v381_v13 = vsel %vm342_vm6, %v326_v61, %v365_v6  ;;  %v335_v15 = vadd.f32 %v534_v4, %v801_v3  ;;  %v512_v16 = vpop.f32.mrf.mxu0  ;;  %v536_v17 = vpop.f32.mrf.mxu1  ;;  %v424_v5 = vld [vmem:[%s940_s4 + $0x70] sm:$0xff] }
  0xfa   :  { %452 = vst [vmem:[%s941_s5 + $0x50] sm:$0xff] %v436_v10  ;;  %v397_v18 = vmul.f32 -1.0, %v381_v13  ;;  %v389_v19 = vsel %vm350_vm7, %v334_v1, %v373_v11  ;;  %vm343_vm8 = vcmp.ge.f32.partialorder %v327_v12, 0.0  ;;  %v366_v21 = vmul.f32 %v806_v7, %v327_v12 }
  0xfb   :  { %v405_v22 = vmul.f32 -1.0, %v389_v19  ;;  %vm351_vm9 = vcmp.ge.f32.partialorder %v335_v15, 0.0  ;;  %v374_v23 = vmul.f32 %v806_v7, %v335_v15  ;;  %v513_v24 = vadd.f32 %v512_v16, %v511_v8  ;;  %v514_v25 = vpop.f32.mrf.mxu0  ;;  %v538_v26 = vpop.f32.mrf.mxu1 }
  0xfc   :  { %v429_v27 = vadd.f32 %v413_v14, %v397_v18  ;;  %v382_v28 = vsel %vm343_vm8, %v327_v12, %v366_v21  ;;  %v537_v30 = vadd.f32 %v536_v17, %v535_v9  ;;  %v425_v17 = vld [vmem:[%s940_s4 + $0x78] sm:$0xff] }
  0xfd   :  { %v437_v31 = vadd.f32 %v421_v20, %v405_v22  ;;  %v398_v32 = vmul.f32 -1.0, %v382_v28  ;;  %v390_v33 = vsel %vm351_vm9, %v335_v15, %v374_v23  ;;  %v328_v35 = vadd.f32 %v513_v24, %v801_v3  ;;  %v515_v36 = vpop.f32.mrf.mxu0  ;;  %v539_v37 = vpop.f32.mrf.mxu1 }
  0xfe   :  { %445 = vst [vmem:[%s941_s5 + $0x18] sm:$0xff] %v429_v27  ;;  %v406_v38 = vmul.f32 -1.0, %v390_v33  ;;  %v336_v39 = vadd.f32 %v537_v30, %v801_v3  ;;  %v516_v40 = vadd.f32 %v515_v36, %v514_v25  ;;  %v540_v41 = vadd.f32 %v539_v37, %v538_v26 }
  0xff   :  { %453 = vst [vmem:[%s941_s5 + $0x58] sm:$0xff] %v437_v31  ;;  %v430_v42 = vadd.f32 %v414_v29, %v398_v32  ;;  %vm344_vm10 = vcmp.ge.f32.partialorder %v328_v35, 0.0  ;;  %v367_v43 = vmul.f32 %v806_v7, %v328_v35  ;;  %v517_v44 = vpop.f32.mrf.mxu0  ;;  %v541_v45 = vpop.f32.mrf.mxu1 }
 0x100   :  { %v438_v46 = vadd.f32 %v422_v34, %v406_v38  ;;  %vm352_vm11 = vcmp.ge.f32.partialorder %v336_v39, 0.0  ;;  %v375_v47 = vmul.f32 %v806_v7, %v336_v39  ;;  %v329_v48 = vadd.f32 %v516_v40, %v801_v3 }
 0x101   :  { %446 = vst [vmem:[%s941_s5 + $0x20] sm:$0xff] %v430_v42  ;;  %v383_v49 = vsel %vm344_vm10, %v328_v35, %v367_v43  ;;  %v337_v51 = vadd.f32 %v540_v41, %v801_v3  ;;  %v518_v52 = vpop.f32.mrf.mxu0  ;;  %v542_v53 = vpop.f32.mrf.mxu1 }
 0x102   :  { %454 = vst [vmem:[%s941_s5 + $0x60] sm:$0xff] %v438_v46  ;;  %v399_v54 = vmul.f32 -1.0, %v383_v49  ;;  %v391_v55 = vsel %vm352_vm11, %v336_v39, %v375_v47  ;;  %vm345_vm12 = vcmp.ge.f32.partialorder %v329_v48, 0.0  ;;  %v368_v57 = vmul.f32 %v806_v7, %v329_v48 }
 0x103   :  { %v407_v58 = vmul.f32 -1.0, %v391_v55  ;;  %vm353_vm13 = vcmp.ge.f32.partialorder %v337_v51, 0.0  ;;  %v376_v59 = vmul.f32 %v806_v7, %v337_v51  ;;  %v519_v60 = vadd.f32 %v518_v52, %v517_v44 }
 0x104   :  { %v431_v61 = vadd.f32 %v415_v50, %v399_v54  ;;  %v384_v62 = vsel %vm345_vm12, %v329_v48, %v368_v57  ;;  %v543_v0 = vadd.f32 %v542_v53, %v541_v45 }
 0x105   :  { %v439_v1 = vadd.f32 %v423_v56, %v407_v58  ;;  %v400_v2 = vmul.f32 -1.0, %v384_v62  ;;  %v392_v4 = vsel %vm353_vm13, %v337_v51, %v376_v59  ;;  %v330_v6 = vadd.f32 %v519_v60, %v801_v3 }
 0x106   :  { %447 = vst [vmem:[%s941_s5 + $0x28] sm:$0xff] %v431_v61  ;;  %v408_v8 = vmul.f32 -1.0, %v392_v4  ;;  %v338_v9 = vadd.f32 %v543_v0, %v801_v3  ;;  %v417_v3 = vld [vmem:[%s940_s4 + $0x38] sm:$0xff] }
 0x107   :  { %455 = vst [vmem:[%s941_s5 + $0x68] sm:$0xff] %v439_v1  ;;  %v432_v10 = vadd.f32 %v416_v63, %v400_v2  ;;  %vm346_vm14 = vcmp.ge.f32.partialorder %v330_v6, 0.0  ;;  %v369_v11 = vmul.f32 %v806_v7, %v330_v6 }
 0x108   :  { %v440_v12 = vadd.f32 %v424_v5, %v408_v8  ;;  %vm354_vm15 = vcmp.ge.f32.partialorder %v338_v9, 0.0  ;;  %v377_v13 = vmul.f32 %v806_v7, %v338_v9 }
 0x109   :  { %448 = vst [vmem:[%s941_s5 + $0x30] sm:$0xff] %v432_v10  ;;  %v385_v14 = vsel %vm346_vm14, %v330_v6, %v369_v11 }
 0x10a   :  { %456 = vst [vmem:[%s941_s5 + $0x70] sm:$0xff] %v440_v12  ;;  %v401_v15 = vmul.f32 -1.0, %v385_v14  ;;  %v393_v16 = vsel %vm354_vm15, %v338_v9, %v377_v13 }
 0x10b   :  { %v409_v7 = vmul.f32 -1.0, %v393_v16 }
 0x10c   :  { %v433_v18 = vadd.f32 %v417_v3, %v401_v15 }
 0x10d   :  { %v441_v19 = vadd.f32 %v425_v17, %v409_v7 }
 0x10e   :  { %449 = vst [vmem:[%s941_s5 + $0x38] sm:$0xff] %v433_v18 }
 0x10f   :  { %457 = vst [vmem:[%s941_s5 + $0x78] sm:$0xff] %v441_v19 }

// kernel: recurrent_projection.15
= control target key start
LH: loop header
LB: loop body
LE: loop exit
PB: predicated region body
PF: predicated region fallthrough
CT: control target
= control target key end

     0   :  { %s802_s1 = inlined_call_operand.vmem [shape: f32[128,128], index: 1, kind: input, shape index: {}]   ;;  %s803_s0 = inlined_call_operand.vmem [shape: f32[128,128], index: 0, kind: input, shape index: {}]   ;;  %s804_s2 = inlined_call_operand.vmem [shape: f32[1,128], index: 2, kind: input, shape index: {}]   ;;  %s805_s3 = inlined_call_operand.vmem [shape: f32[1,128], index: 3, kind: input, shape index: {}]   ;;  %s806_s4 = inlined_call_operand.vmem [shape: f32[128,128], index: 4, kind: input, shape index: {}]   ;;  %s807_s5 = inlined_call_operand.vmem [shape: f32[128,128], index: 5, kind: output, shape index: {}]  }
   0x1   :  { %v87_v0 = vld [vmem:[%s802_s1 + $0x78] sm:$0xff]  ;;  %v86_v1 = vld [vmem:[%s802_s1 + $0x70] sm:$0xff]  ;;  %v85_v2 = vld [vmem:[%s802_s1 + $0x68] sm:$0xff] }
   0x2   :  { %448 = vmatprep.subr.mxu0 %v87_v0  ;;  %504 = vmatprep.subr.mxu1 %v87_v0  ;;  %v84_v3 = vld [vmem:[%s802_s1 + $0x60] sm:$0xff]  ;;  %v83_v4 = vld [vmem:[%s802_s1 + $0x58] sm:$0xff]  ;;  %v82_v5 = vld [vmem:[%s802_s1 + $0x50] sm:$0xff] }
   0x3   :  { %449 = vmatpush3.msra.mxu0 %v87_v0  ;;  %520 = vmatpush3.msra.mxu1 %v87_v0  ;;  %v81_v6 = vld [vmem:[%s802_s1 + $0x48] sm:$0xff]  ;;  %v80_v7 = vld [vmem:[%s802_s1 + $0x40] sm:$0xff]  ;;  %v79_v8 = vld [vmem:[%s802_s1 + $0x38] sm:$0xff] }
   0x4   :  { %450 = vmatprep.subr.mxu0 %v86_v1  ;;  %505 = vmatprep.subr.mxu1 %v86_v1  ;;  %v78_v9 = vld [vmem:[%s802_s1 + $0x30] sm:$0xff]  ;;  %v77_v10 = vld [vmem:[%s802_s1 + $0x28] sm:$0xff]  ;;  %v76_v11 = vld [vmem:[%s802_s1 + $0x20] sm:$0xff] }
   0x5   :  { %451 = vmatpush3.msra.mxu0 %v86_v1  ;;  %521 = vmatpush3.msra.mxu1 %v86_v1  ;;  %v75_v12 = vld [vmem:[%s802_s1 + $0x18] sm:$0xff]  ;;  %v74_v13 = vld [vmem:[%s802_s1 + $0x10] sm:$0xff]  ;;  %v73_v14 = vld [vmem:[%s802_s1 + $0x8] sm:$0xff] }
   0x6   :  { %452 = vmatprep.subr.mxu0 %v85_v2  ;;  %506 = vmatprep.subr.mxu1 %v85_v2  ;;  %v72_v15 = vld [vmem:[%s802_s1] sm:$0xff]  ;;  %v57_v18 = vld [vmem:[%s803_s0 + $0x8] sm:$0xff]  ;;  %v58_v20 = vld [vmem:[%s803_s0 + $0x10] sm:$0xff] }
   0x7   :  { %453 = vmatpush3.msra.mxu0 %v85_v2  ;;  %522 = vmatpush3.msra.mxu1 %v85_v2  ;;  %v56_v16 = vld [vmem:[%s803_s0] sm:$0xff]  ;;  %v65_v19 = vld [vmem:[%s803_s0 + $0x48] sm:$0xff]  ;;  %v66_v21 = vld [vmem:[%s803_s0 + $0x50] sm:$0xff] }
   0x8   :  { %454 = vmatprep.subr.mxu0 %v84_v3  ;;  %507 = vmatprep.subr.mxu1 %v84_v3  ;;  %v64_v17 = vld [vmem:[%s803_s0 + $0x40] sm:$0xff]  ;;  %v59_v22 = vld [vmem:[%s803_s0 + $0x18] sm:$0xff]  ;;  %v61_v26 = vld [vmem:[%s803_s0 + $0x28] sm:$0xff] }
   0x9   :  { %455 = vmatpush3.msra.mxu0 %v84_v3  ;;  %523 = vmatpush3.msra.mxu1 %v84_v3  ;;  %v67_v23 = vld [vmem:[%s803_s0 + $0x58] sm:$0xff]  ;;  %v60_v24 = vld [vmem:[%s803_s0 + $0x20] sm:$0xff]  ;;  %v69_v27 = vld [vmem:[%s803_s0 + $0x68] sm:$0xff] }
   0xa   :  { %456 = vmatprep.subr.mxu0 %v83_v4  ;;  %508 = vmatprep.subr.mxu1 %v83_v4  ;;  %v68_v25 = vld [vmem:[%s803_s0 + $0x60] sm:$0xff]  ;;  %v62_v28 = vld [vmem:[%s803_s0 + $0x30] sm:$0xff]  ;;  %v63_v30 = vld [vmem:[%s803_s0 + $0x38] sm:$0xff] }
   0xb   :  { %457 = vmatpush3.msra.mxu0 %v83_v4  ;;  %524 = vmatpush3.msra.mxu1 %v83_v4  ;;  %v70_v29 = vld [vmem:[%s803_s0 + $0x70] sm:$0xff]  ;;  %v71_v31 = vld [vmem:[%s803_s0 + $0x78] sm:$0xff]  ;;  %v665_v32 = vld [vmem:[%s804_s2] ss:$0 sm:$0xff] }
   0xc   :  { %458 = vmatprep.subr.mxu0 %v82_v5  ;;  %509 = vmatprep.subr.mxu1 %v82_v5  ;;  %v670_v34 = vld [vmem:[%s805_s3] ss:$0 sm:$0xff]  ;;  %v363_v41 = vld [vmem:[%s806_s4 + $0x8] sm:$0xff]  ;;  %v365_v61 = vld [vmem:[%s806_s4 + $0x18] sm:$0xff] }
   0xd   :  { %459 = vmatpush3.msra.mxu0 %v82_v5  ;;  %525 = vmatpush3.msra.mxu1 %v82_v5  ;;  %v371_v43 = vld [vmem:[%s806_s4 + $0x48] sm:$0xff]  ;;  %v362_v55 = vld [vmem:[%s806_s4] sm:$0xff]  ;;  %v373_v0 = vld [vmem:[%s806_s4 + $0x58] sm:$0xff] }
   0xe   :  { %460 = vmatprep.subr.mxu0 %v81_v6  ;;  %510 = vmatprep.subr.mxu1 %v81_v6  ;;  %v370_v59 = vld [vmem:[%s806_s4 + $0x40] sm:$0xff] }
   0xf   :  { %461 = vmatpush3.msra.mxu0 %v81_v6  ;;  %526 = vmatpush3.msra.mxu1 %v81_v6 }
  0x10   :  { %462 = vmatprep.subr.mxu0 %v80_v7  ;;  %511 = vmatprep.subr.mxu1 %v80_v7 }
  0x11   :  { %463 = vmatpush3.msra.mxu0 %v80_v7  ;;  %527 = vmatpush3.msra.mxu1 %v80_v7 }
  0x12   :  { %464 = vmatprep.subr.mxu0 %v79_v8  ;;  %512 = vmatprep.subr.mxu1 %v79_v8 }
  0x13   :  { %465 = vmatpush3.msra.mxu0 %v79_v8  ;;  %528 = vmatpush3.msra.mxu1 %v79_v8 }
  0x14   :  { %466 = vmatprep.subr.mxu0 %v78_v9  ;;  %513 = vmatprep.subr.mxu1 %v78_v9 }
  0x15   :  { %467 = vmatpush3.msra.mxu0 %v78_v9  ;;  %529 = vmatpush3.msra.mxu1 %v78_v9 }
  0x16   :  { %468 = vmatprep.subr.mxu0 %v77_v10  ;;  %514 = vmatprep.subr.mxu1 %v77_v10 }
  0x17   :  { %469 = vmatpush3.msra.mxu0 %v77_v10  ;;  %530 = vmatpush3.msra.mxu1 %v77_v10 }
  0x18   :  { %470 = vmatprep.subr.mxu0 %v76_v11  ;;  %515 = vmatprep.subr.mxu1 %v76_v11 }
  0x19   :  { %471 = vmatpush3.msra.mxu0 %v76_v11  ;;  %531 = vmatpush3.msra.mxu1 %v76_v11 }
  0x1a   :  { %472 = vmatprep.subr.mxu0 %v75_v12  ;;  %516 = vmatprep.subr.mxu1 %v75_v12 }
  0x1b   :  { %473 = vmatpush3.msra.mxu0 %v75_v12  ;;  %532 = vmatpush3.msra.mxu1 %v75_v12 }
  0x1c   :  { %474 = vmatprep.subr.mxu0 %v74_v13  ;;  %517 = vmatprep.subr.mxu1 %v74_v13 }
  0x1d   :  { %475 = vmatpush3.msra.mxu0 %v74_v13  ;;  %533 = vmatpush3.msra.mxu1 %v74_v13 }
  0x1e   :  { %476 = vmatprep.subr.mxu0 %v73_v14  ;;  %518 = vmatprep.subr.mxu1 %v73_v14 }
  0x1f   :  { %477 = vmatpush3.msra.mxu0 %v73_v14  ;;  %534 = vmatpush3.msra.mxu1 %v73_v14 }
  0x20   :  { %478 = vmatprep.subr.mxu0 %v72_v15  ;;  %519 = vmatprep.subr.mxu1 %v72_v15 }
  0x21   :  { %479 = vmatpush3.msra.mxu0 %v72_v15  ;;  %535 = vmatpush3.msra.mxu1 %v72_v15  ;;  %v364_v15 = vld [vmem:[%s806_s4 + $0x10] sm:$0xff] }
  0x22   :  { %480 = vmatprep.mubr.f32.mxu0 %v56_v16  ;;  %492 = vmatprep.mubr.f32.mxu1 %v64_v17  ;;  %v372_v17 = vld [vmem:[%s806_s4 + $0x50] sm:$0xff] }
  0x23   :  { %481 = vmatmul.mubr.f32.vlgmr.msra.gmra.mxu0 %v57_v18  ;;  %493 = vmatmul.mubr.f32.vlgmr.msra.gmra.mxu1 %v65_v19 }
  0x24   :  { %483 = vmatprep.mubr.f32.mxu0 %v58_v20  ;;  %495 = vmatprep.mubr.f32.mxu1 %v66_v21 }
  0x27   :  { %484 = vmatmul.mubr.f32.gmra.mxu0 %v59_v22  ;;  %496 = vmatmul.mubr.f32.gmra.mxu1 %v67_v23 }
  0x28   :  { %486 = vmatprep.mubr.f32.mxu0 %v60_v24  ;;  %498 = vmatprep.mubr.f32.mxu1 %v68_v25 }
  0x2b   :  { %487 = vmatmul.mubr.f32.gmra.mxu0 %v61_v26  ;;  %499 = vmatmul.mubr.f32.gmra.mxu1 %v69_v27 }
  0x2c   :  { %489 = vmatprep.mubr.f32.mxu0 %v62_v28  ;;  %501 = vmatprep.mubr.f32.mxu1 %v70_v29 }
  0x2f   :  { %490 = vmatmul.mubr.f32.gmra.mxu0 %v63_v30  ;;  %502 = vmatmul.mubr.f32.gmra.mxu1 %v71_v31  ;;  %v367_v31 = vld [vmem:[%s806_s4 + $0x28] sm:$0xff] }
  0xe3   :  { %v482_v33 = vpop.f32.mrf.mxu0  ;;  %v494_v35 = vpop.f32.mrf.mxu1 }
  0xe4   :  { %v292_v36 = vadd.f32 %v482_v33, %v665_v32  ;;  %v300_v37 = vadd.f32 %v494_v35, %v665_v32  ;;  %v375_v35 = vld [vmem:[%s806_s4 + $0x68] sm:$0xff] }
  0xe5   :  { %v154_v38 = vpop.f32.mrf.mxu0  ;;  %v194_v39 = vpop.f32.mrf.mxu1 }
  0xe6   :  { %vm308_vm0 = vcmp.ge.f32.partialorder %v292_v36, 0.0  ;;  %v331_v40 = vmul.f32 %v670_v34, %v292_v36  ;;  %vm316_vm1 = vcmp.ge.f32.partialorder %v300_v37, 0.0  ;;  %v339_v42 = vmul.f32 %v670_v34, %v300_v37 }
  0xe7   :  { %v291_v44 = vadd.f32 %v665_v32, %v154_v38  ;;  %v299_v45 = vadd.f32 %v665_v32, %v194_v39  ;;  %v485_v46 = vpop.f32.mrf.mxu0  ;;  %v497_v47 = vpop.f32.mrf.mxu1 }
  0xe8   :  { %v347_v48 = vsel %vm308_vm0, %v292_v36, %v331_v40  ;;  %v355_v49 = vsel %vm316_vm1, %v300_v37, %v339_v42  ;;  %v294_v50 = vadd.f32 %v485_v46, %v665_v32  ;;  %v302_v51 = vadd.f32 %v497_v47, %v665_v32  ;;  %v366_v37 = vld [vmem:[%s806_s4 + $0x20] sm:$0xff]  ;;  %v369_v46 = vld [vmem:[%s806_s4 + $0x38] sm:$0xff] }
  0xe9   :  { %v379_v52 = vadd.f32 %v363_v41, %v347_v48  ;;  %v387_v53 = vadd.f32 %v371_v43, %v355_v49  ;;  %vm307_vm2 = vcmp.ge.f32.partialorder %v291_v44, 0.0  ;;  %v330_v54 = vmul.f32 %v670_v34, %v291_v44  ;;  %v164_v56 = vpop.f32.mrf.mxu0  ;;  %v204_v57 = vpop.f32.mrf.mxu1  ;;  %v374_v40 = vld [vmem:[%s806_s4 + $0x60] sm:$0xff] }
  0xea   :  { %vm315_vm3 = vcmp.ge.f32.partialorder %v299_v45, 0.0  ;;  %v338_v58 = vmul.f32 %v670_v34, %v299_v45  ;;  %vm310_vm4 = vcmp.ge.f32.partialorder %v294_v50, 0.0  ;;  %v333_v60 = vmul.f32 %v670_v34, %v294_v50 }
  0xeb   :  { %395 = vst [vmem:[%s807_s5 + $0x8] sm:$0xff] %v379_v52  ;;  %403 = vst [vmem:[%s807_s5 + $0x48] sm:$0xff] %v387_v53  ;;  %v346_v62 = vsel %vm307_vm2, %v291_v44, %v330_v54  ;;  %vm318_vm5 = vcmp.ge.f32.partialorder %v302_v51, 0.0  ;;  %v341_v63 = vmul.f32 %v670_v34, %v302_v51  ;;  %v293_v1 = vadd.f32 %v665_v32, %v164_v56  ;;  %v488_v2 = vpop.f32.mrf.mxu0  ;;  %v500_v3 = vpop.f32.mrf.mxu1  ;;  %v377_v54 = vld [vmem:[%s806_s4 + $0x78] sm:$0xff] }
  0xec   :  { %v378_v4 = vadd.f32 %v362_v55, %v346_v62  ;;  %v354_v5 = vsel %vm315_vm3, %v299_v45, %v338_v58  ;;  %v349_v6 = vsel %vm310_vm4, %v294_v50, %v333_v60  ;;  %v301_v7 = vadd.f32 %v665_v32, %v204_v57  ;;  %v368_v60 = vld [vmem:[%s806_s4 + $0x30] sm:$0xff] }
  0xed   :  { %v386_v8 = vadd.f32 %v370_v59, %v354_v5  ;;  %v381_v9 = vadd.f32 %v365_v61, %v349_v6  ;;  %v357_v10 = vsel %vm318_vm5, %v302_v51, %v341_v63  ;;  %vm309_vm6 = vcmp.ge.f32.partialorder %v293_v1, 0.0  ;;  %v174_v11 = vpop.f32.mrf.mxu0  ;;  %v214_v12 = vpop.f32.mrf.mxu1  ;;  %v376_v62 = vld [vmem:[%s806_s4 + $0x70] sm:$0xff] }
  0xee   :  { %394 = vst [vmem:[%s807_s5] sm:$0xff] %v378_v4  ;;  %v389_v13 = vadd.f32 %v373_v0, %v357_v10  ;;  %v332_v14 = vmul.f32 %v670_v34, %v293_v1  ;;  %vm317_vm7 = vcmp.ge.f32.partialorder %v301_v7, 0.0  ;;  %v340_v16 = vmul.f32 %v670_v34, %v301_v7 }
  0xef   :  { %402 = vst [vmem:[%s807_s5 + $0x40] sm:$0xff] %v386_v8  ;;  %397 = vst [vmem:[%s807_s5 + $0x18] sm:$0xff] %v381_v9  ;;  %v296_v18 = vadd.f32 %v488_v2, %v665_v32  ;;  %v304_v19 = vadd.f32 %v500_v3, %v665_v32  ;;  %v295_v20 = vadd.f32 %v665_v32, %v174_v11  ;;  %v491_v22 = vpop.f32.mrf.mxu0  ;;  %v503_v23 = vpop.f32.mrf.mxu1 }
  0xf0   :  { %v303_v21 = vadd.f32 %v665_v32, %v214_v12  ;;  %405 = vst [vmem:[%s807_s5 + $0x58] sm:$0xff] %v389_v13  ;;  %v348_v24 = vsel %vm309_vm6, %v293_v1, %v332_v14  ;;  %v356_v25 = vsel %vm317_vm7, %v301_v7, %v340_v16  ;;  %v298_v26 = vadd.f32 %v491_v22, %v665_v32 }
  0xf1   :  { %v306_v27 = vadd.f32 %v503_v23, %v665_v32  ;;  %v380_v28 = vadd.f32 %v364_v15, %v348_v24  ;;  %v388_v29 = vadd.f32 %v372_v17, %v356_v25  ;;  %vm312_vm8 = vcmp.ge.f32.partialorder %v296_v18, 0.0  ;;  %v184_v41 = vpop.f32.mrf.mxu0  ;;  %v224_v47 = vpop.f32.mrf.mxu1 }
  0xf2   :  { %v335_v30 = vmul.f32 %v670_v34, %v296_v18  ;;  %vm320_vm9 = vcmp.ge.f32.partialorder %v304_v19, 0.0  ;;  %v343_v33 = vmul.f32 %v670_v34, %v304_v19  ;;  %vm311_vm10 = vcmp.ge.f32.partialorder %v295_v20, 0.0 }
  0xf3   :  { %v334_v36 = vmul.f32 %v670_v34, %v295_v20  ;;  %396 = vst [vmem:[%s807_s5 + $0x10] sm:$0xff] %v380_v28  ;;  %404 = vst [vmem:[%s807_s5 + $0x50] sm:$0xff] %v388_v29  ;;  %vm319_vm11 = vcmp.ge.f32.partialorder %v303_v21, 0.0  ;;  %v342_v39 = vmul.f32 %v670_v34, %v303_v21  ;;  %vm314_vm12 = vcmp.ge.f32.partialorder %v298_v26, 0.0 }
  0xf4   :  { %v351_v38 = vsel %vm312_vm8, %v296_v18, %v335_v30  ;;  %v359_v43 = vsel %vm320_vm9, %v304_v19, %v343_v33  ;;  %v337_v45 = vmul.f32 %v670_v34, %v298_v26  ;;  %vm322_vm13 = vcmp.ge.f32.partialorder %v306_v27, 0.0 }
  0xf5   :  { %v383_v42 = vadd.f32 %v367_v31, %v351_v38  ;;  %v350_v44 = vsel %vm311_vm10, %v295_v20, %v334_v36  ;;  %v391_v48 = vadd.f32 %v375_v35, %v359_v43  ;;  %v358_v50 = vsel %vm319_vm11, %v303_v21, %v342_v39 }
  0xf6   :  { %v382_v49 = vadd.f32 %v366_v37, %v350_v44  ;;  %v390_v51 = vadd.f32 %v374_v40, %v358_v50  ;;  %v353_v52 = vsel %vm314_vm12, %v298_v26, %v337_v45  ;;  %v345_v53 = vmul.f32 %v670_v34, %v306_v27 }
  0xf7   :  { %399 = vst [vmem:[%s807_s5 + $0x28] sm:$0xff] %v383_v42  ;;  %v297_v55 = vadd.f32 %v665_v32, %v184_v41  ;;  %407 = vst [vmem:[%s807_s5 + $0x68] sm:$0xff] %v391_v48  ;;  %v385_v56 = vadd.f32 %v369_v46, %v353_v52  ;;  %v305_v57 = vadd.f32 %v665_v32, %v224_v47 }
  0xf8   :  { %398 = vst [vmem:[%s807_s5 + $0x20] sm:$0xff] %v382_v49  ;;  %406 = vst [vmem:[%s807_s5 + $0x60] sm:$0xff] %v390_v51  ;;  %v361_v58 = vsel %vm322_vm13, %v306_v27, %v345_v53 }
  0xf9   :  { %vm313_vm14 = vcmp.ge.f32.partialorder %v297_v55, 0.0  ;;  %v336_v59 = vmul.f32 %v670_v34, %v297_v55  ;;  %401 = vst [vmem:[%s807_s5 + $0x38] sm:$0xff] %v385_v56  ;;  %v393_v61 = vadd.f32 %v377_v54, %v361_v58  ;;  %vm321_vm15 = vcmp.ge.f32.partialorder %v305_v57, 0.0 }
  0xfa   :  { %v344_v32 = vmul.f32 %v670_v34, %v305_v57 }
  0xfb   :  { %v352_v63 = vsel %vm313_vm14, %v297_v55, %v336_v59  ;;  %409 = vst [vmem:[%s807_s5 + $0x78] sm:$0xff] %v393_v61 }
  0xfc   :  { %v384_v0 = vadd.f32 %v368_v60, %v352_v63  ;;  %v360_v1 = vsel %vm321_vm15, %v305_v57, %v344_v32 }
  0xfd   :  { %v392_v2 = vadd.f32 %v376_v62, %v360_v1 }
  0xfe   :  { %400 = vst [vmem:[%s807_s5 + $0x30] sm:$0xff] %v384_v0 }
  0xff   :  { %408 = vst [vmem:[%s807_s5 + $0x70] sm:$0xff] %v392_v2 }

// kernel: recurrent_projection.16
= control target key start
LH: loop header
LB: loop body
LE: loop exit
PB: predicated region body
PF: predicated region fallthrough
CT: control target
= control target key end

     0   :  { %s832_s1 = inlined_call_operand.vmem [shape: f32[256,128], index: 1, kind: input, shape index: {}]   ;;  %s833_s0 = inlined_call_operand.vmem [shape: f32[128,256], index: 0, kind: input, shape index: {}]   ;;  %s834_s2 = inlined_call_operand.vmem [shape: f32[1,128], index: 2, kind: input, shape index: {}]   ;;  %s835_s3 = inlined_call_operand.vmem [shape: f32[1,128], index: 3, kind: input, shape index: {}]   ;;  %s836_s4 = inlined_call_operand.vmem [shape: f32[128,128], index: 4, kind: output, shape index: {}]  }
   0x1   :  { %v116_v0 = vld [vmem:[%s832_s1 + $0xf8] sm:$0xff]  ;;  %v115_v2 = vld [vmem:[%s832_s1 + $0xf0] sm:$0xff]  ;;  %v114_v4 = vld [vmem:[%s832_s1 + $0xe8] sm:$0xff] }
   0x2   :  { %v100_v1 = vld [vmem:[%s832_s1 + $0x78] sm:$0xff]  ;;  %413 = vmatprep.subr.mxu0 %v116_v0  ;;  %493 = vmatprep.subr.mxu1 %v116_v0  ;;  %v99_v3 = vld [vmem:[%s832_s1 + $0x70] sm:$0xff]  ;;  %v98_v5 = vld [vmem:[%s832_s1 + $0x68] sm:$0xff] }
   0x3   :  { %414 = vmatpush3.msra.mxu0 %v100_v1  ;;  %509 = vmatpush3.msra.mxu1 %v100_v1  ;;  %v113_v6 = vld [vmem:[%s832_s1 + $0xe0] sm:$0xff]  ;;  %v112_v8 = vld [vmem:[%s832_s1 + $0xd8] sm:$0xff]  ;;  %v111_v10 = vld [vmem:[%s832_s1 + $0xd0] sm:$0xff] }
   0x4   :  { %415 = vmatprep.subr.mxu0 %v115_v2  ;;  %494 = vmatprep.subr.mxu1 %v115_v2  ;;  %v97_v7 = vld [vmem:[%s832_s1 + $0x60] sm:$0xff]  ;;  %v96_v9 = vld [vmem:[%s832_s1 + $0x58] sm:$0xff]  ;;  %v95_v11 = vld [vmem:[%s832_s1 + $0x50] sm:$0xff] }
   0x5   :  { %416 = vmatpush3.msra.mxu0 %v99_v3  ;;  %510 = vmatpush3.msra.mxu1 %v99_v3  ;;  %v110_v12 = vld [vmem:[%s832_s1 + $0xc8] sm:$0xff]  ;;  %v109_v14 = vld [vmem:[%s832_s1 + $0xc0] sm:$0xff]  ;;  %v108_v16 = vld [vmem:[%s832_s1 + $0xb8] sm:$0xff] }
   0x6   :  { %417 = vmatprep.subr.mxu0 %v114_v4  ;;  %495 = vmatprep.subr.mxu1 %v114_v4  ;;  %v94_v13 = vld [vmem:[%s832_s1 + $0x48] sm:$0xff]  ;;  %v93_v15 = vld [vmem:[%s832_s1 + $0x40] sm:$0xff]  ;;  %v92_v17 = vld [vmem:[%s832_s1 + $0x38] sm:$0xff] }
   0x7   :  { %418 = vmatpush3.msra.mxu0 %v98_v5  ;;  %511 = vmatpush3.msra.mxu1 %v98_v5  ;;  %v107_v18 = vld [vmem:[%s832_s1 + $0xb0] sm:$0xff]  ;;  %v106_v20 = vld [vmem:[%s832_s1 + $0xa8] sm:$0xff]  ;;  %v105_v22 = vld [vmem:[%s832_s1 + $0xa0] sm:$0xff] }
   0x8   :  { %419 = vmatprep.subr.mxu0 %v113_v6  ;;  %496 = vmatprep.subr.mxu1 %v113_v6  ;;  %v91_v19 = vld [vmem:[%s832_s1 + $0x30] sm:$0xff]  ;;  %v90_v21 = vld [vmem:[%s832_s1 + $0x28] sm:$0xff]  ;;  %v89_v23 = vld [vmem:[%s832_s1 + $0x20] sm:$0xff] }
   0x9   :  { %420 = vmatpush3.msra.mxu0 %v97_v7  ;;  %512 = vmatpush3.msra.mxu1 %v97_v7  ;;  %v104_v24 = vld [vmem:[%s832_s1 + $0x98] sm:$0xff]  ;;  %v103_v26 = vld [vmem:[%s832_s1 + $0x90] sm:$0xff]  ;;  %v102_v28 = vld [vmem:[%s832_s1 + $0x88] sm:$0xff] }
   0xa   :  { %421 = vmatprep.subr.mxu0 %v112_v8  ;;  %497 = vmatprep.subr.mxu1 %v112_v8  ;;  %v88_v25 = vld [vmem:[%s832_s1 + $0x18] sm:$0xff]  ;;  %v87_v27 = vld [vmem:[%s832_s1 + $0x10] sm:$0xff]  ;;  %v86_v29 = vld [vmem:[%s832_s1 + $0x8] sm:$0xff] }
   0xb   :  { %422 = vmatpush3.msra.mxu0 %v96_v9  ;;  %513 = vmatpush3.msra.mxu1 %v96_v9  ;;  %v101_v30 = vld [vmem:[%s832_s1 + $0x80] sm:$0xff]  ;;  %v54_v32 = vld [vmem:[%s833_s0 + $0x8] sm:$0xff]  ;;  %v56_v36 = vld [vmem:[%s833_s0 + $0x18] sm:$0xff] }
   0xc   :  { %423 = vmatprep.subr.mxu0 %v111_v10  ;;  %498 = vmatprep.subr.mxu1 %v111_v10  ;;  %v85_v31 = vld [vmem:[%s832_s1] sm:$0xff]  ;;  %v70_v33 = vld [vmem:[%s833_s0 + $0x88] sm:$0xff]  ;;  %v72_v37 = vld [vmem:[%s833_s0 + $0x98] sm:$0xff] }
   0xd   :  { %424 = vmatpush3.msra.mxu0 %v95_v11  ;;  %514 = vmatpush3.msra.mxu1 %v95_v11  ;;  %v53_v34 = vld [vmem:[%s833_s0] sm:$0xff]  ;;  %v55_v38 = vld [vmem:[%s833_s0 + $0x10] sm:$0xff]  ;;  %v58_v40 = vld [vmem:[%s833_s0 + $0x28] sm:$0xff] }
   0xe   :  { %425 = vmatprep.subr.mxu0 %v110_v12  ;;  %499 = vmatprep.subr.mxu1 %v110_v12  ;;  %v69_v35 = vld [vmem:[%s833_s0 + $0x80] sm:$0xff]  ;;  %v71_v39 = vld [vmem:[%s833_s0 + $0x90] sm:$0xff]  ;;  %v74_v41 = vld [vmem:[%s833_s0 + $0xa8] sm:$0xff] }
   0xf   :  { %426 = vmatpush3.msra.mxu0 %v94_v13  ;;  %515 = vmatpush3.msra.mxu1 %v94_v13  ;;  %v57_v42 = vld [vmem:[%s833_s0 + $0x20] sm:$0xff]  ;;  %v60_v44 = vld [vmem:[%s833_s0 + $0x38] sm:$0xff]  ;;  %v59_v46 = vld [vmem:[%s833_s0 + $0x30] sm:$0xff] }
  0x10   :  { %427 = vmatprep.subr.mxu0 %v109_v14  ;;  %500 = vmatprep.subr.mxu1 %v109_v14  ;;  %v73_v43 = vld [vmem:[%s833_s0 + $0xa0] sm:$0xff]  ;;  %v76_v45 = vld [vmem:[%s833_s0 + $0xb8] sm:$0xff]  ;;  %v75_v47 = vld [vmem:[%s833_s0 + $0xb0] sm:$0xff] }
  0x11   :  { %428 = vmatpush3.msra.mxu0 %v93_v15  ;;  %516 = vmatpush3.msra.mxu1 %v93_v15  ;;  %v62_v48 = vld [vmem:[%s833_s0 + $0x48] sm:$0xff]  ;;  %v61_v50 = vld [vmem:[%s833_s0 + $0x40] sm:$0xff]  ;;  %v64_v52 = vld [vmem:[%s833_s0 + $0x58] sm:$0xff] }
  0x12   :  { %429 = vmatprep.subr.mxu0 %v108_v16  ;;  %501 = vmatprep.subr.mxu1 %v108_v16  ;;  %v78_v49 = vld [vmem:[%s833_s0 + $0xc8] sm:$0xff]  ;;  %v77_v51 = vld [vmem:[%s833_s0 + $0xc0] sm:$0xff]  ;;  %v80_v53 = vld [vmem:[%s833_s0 + $0xd8] sm:$0xff] }
  0x13   :  { %430 = vmatpush3.msra.mxu0 %v92_v17  ;;  %517 = vmatpush3.msra.mxu1 %v92_v17  ;;  %v63_v54 = vld [vmem:[%s833_s0 + $0x50] sm:$0xff]  ;;  %v66_v56 = vld [vmem:[%s833_s0 + $0x68] sm:$0xff]  ;;  %v65_v58 = vld [vmem:[%s833_s0 + $0x60] sm:$0xff] }
  0x14   :  { %431 = vmatprep.subr.mxu0 %v107_v18  ;;  %502 = vmatprep.subr.mxu1 %v107_v18  ;;  %v79_v55 = vld [vmem:[%s833_s0 + $0xd0] sm:$0xff]  ;;  %v82_v57 = vld [vmem:[%s833_s0 + $0xe8] sm:$0xff]  ;;  %v81_v59 = vld [vmem:[%s833_s0 + $0xe0] sm:$0xff] }
  0x15   :  { %432 = vmatpush3.msra.mxu0 %v91_v19  ;;  %518 = vmatpush3.msra.mxu1 %v91_v19  ;;  %v68_v60 = vld [vmem:[%s833_s0 + $0x78] sm:$0xff]  ;;  %v67_v62 = vld [vmem:[%s833_s0 + $0x70] sm:$0xff]  ;;  %v745_v3 = vld [vmem:[%s834_s2] ss:$0 sm:$0xff] }
  0x16   :  { %433 = vmatprep.subr.mxu0 %v106_v20  ;;  %503 = vmatprep.subr.mxu1 %v106_v20  ;;  %v84_v61 = vld [vmem:[%s833_s0 + $0xf8] sm:$0xff]  ;;  %v83_v63 = vld [vmem:[%s833_s0 + $0xf0] sm:$0xff]  ;;  %v750_v7 = vld [vmem:[%s835_s3] ss:$0 sm:$0xff] }
  0x17   :  { %434 = vmatpush3.msra.mxu0 %v90_v21  ;;  %519 = vmatpush3.msra.mxu1 %v90_v21 }
  0x18   :  { %435 = vmatprep.subr.mxu0 %v105_v22  ;;  %504 = vmatprep.subr.mxu1 %v105_v22 }
  0x19   :  { %436 = vmatpush3.msra.mxu0 %v89_v23  ;;  %520 = vmatpush3.msra.mxu1 %v89_v23 }
  0x1a   :  { %437 = vmatprep.subr.mxu0 %v104_v24  ;;  %505 = vmatprep.subr.mxu1 %v104_v24 }
  0x1b   :  { %438 = vmatpush3.msra.mxu0 %v88_v25  ;;  %521 = vmatpush3.msra.mxu1 %v88_v25 }
  0x1c   :  { %439 = vmatprep.subr.mxu0 %v103_v26  ;;  %506 = vmatprep.subr.mxu1 %v103_v26 }
  0x1d   :  { %440 = vmatpush3.msra.mxu0 %v87_v27  ;;  %522 = vmatpush3.msra.mxu1 %v87_v27 }
  0x1e   :  { %441 = vmatprep.subr.mxu0 %v102_v28  ;;  %507 = vmatprep.subr.mxu1 %v102_v28 }
  0x1f   :  { %442 = vmatpush3.msra.mxu0 %v86_v29  ;;  %523 = vmatpush3.msra.mxu1 %v86_v29 }
  0x20   :  { %443 = vmatprep.subr.mxu0 %v101_v30  ;;  %508 = vmatprep.subr.mxu1 %v101_v30 }
  0x21   :  { %444 = vmatpush3.msra.mxu0 %v85_v31  ;;  %524 = vmatpush3.msra.mxu1 %v85_v31 }
  0x22   :  { %181 = vmatprep.mubr.f32.mxu0 %v54_v32  ;;  %221 = vmatprep.mubr.f32.mxu1 %v70_v33 }
  0x23   :  { %182 = vmatmul.mubr.f32.vlgmr.msra.gmra.mxu0 %v53_v34  ;;  %222 = vmatmul.mubr.f32.vlgmr.msra.gmra.mxu1 %v69_v35 }
  0x24   :  { %186 = vmatprep.mubr.f32.mxu0 %v56_v36  ;;  %226 = vmatprep.mubr.f32.mxu1 %v72_v37 }
  0x27   :  { %187 = vmatmul.mubr.f32.gmra.mxu0 %v55_v38  ;;  %227 = vmatmul.mubr.f32.gmra.mxu1 %v71_v39 }
  0x28   :  { %191 = vmatprep.mubr.f32.mxu0 %v58_v40  ;;  %231 = vmatprep.mubr.f32.mxu1 %v74_v41 }
  0x2b   :  { %192 = vmatmul.mubr.f32.gmra.mxu0 %v57_v42  ;;  %232 = vmatmul.mubr.f32.gmra.mxu1 %v73_v43 }
  0x2c   :  { %196 = vmatprep.mubr.f32.mxu0 %v60_v44  ;;  %236 = vmatprep.mubr.f32.mxu1 %v76_v45 }
  0x2f   :  { %197 = vmatmul.mubr.f32.gmra.mxu0 %v59_v46  ;;  %237 = vmatmul.mubr.f32.gmra.mxu1 %v75_v47 }
  0x30   :  { %201 = vmatprep.mubr.f32.mxu0 %v62_v48  ;;  %241 = vmatprep.mubr.f32.mxu1 %v78_v49 }
  0x33   :  { %202 = vmatmul.mubr.f32.gmra.mxu0 %v61_v50  ;;  %242 = vmatmul.mubr.f32.gmra.mxu1 %v77_v51 }
  0x34   :  { %206 = vmatprep.mubr.f32.mxu0 %v64_v52  ;;  %246 = vmatprep.mubr.f32.mxu1 %v80_v53 }
  0x37   :  { %207 = vmatmul.mubr.f32.gmra.mxu0 %v63_v54  ;;  %247 = vmatmul.mubr.f32.gmra.mxu1 %v79_v55 }
  0x38   :  { %211 = vmatprep.mubr.f32.mxu0 %v66_v56  ;;  %251 = vmatprep.mubr.f32.mxu1 %v82_v57 }
  0x3b   :  { %212 = vmatmul.mubr.f32.gmra.mxu0 %v65_v58  ;;  %252 = vmatmul.mubr.f32.gmra.mxu1 %v81_v59 }
  0x3c   :  { %216 = vmatprep.mubr.f32.mxu0 %v68_v60  ;;  %256 = vmatprep.mubr.f32.mxu1 %v84_v61 }
  0x3f   :  { %217 = vmatmul.mubr.f32.gmra.mxu0 %v67_v62  ;;  %257 = vmatmul.mubr.f32.gmra.mxu1 %v83_v63 }
  0xe3   :  { %v445_v0 = vpop.f32.mrf.mxu0  ;;  %v469_v1 = vpop.f32.mrf.mxu1 }
  0xe5   :  { %v446_v2 = vpop.f32.mrf.mxu0  ;;  %v470_v4 = vpop.f32.mrf.mxu1 }
  0xe6   :  { %v447_v5 = vadd.f32 %v446_v2, %v445_v0  ;;  %v471_v6 = vadd.f32 %v470_v4, %v469_v1 }
  0xe7   :  { %v448_v8 = vpop.f32.mrf.mxu0  ;;  %v472_v9 = vpop.f32.mrf.mxu1 }
  0xe8   :  { %v320_v10 = vadd.f32 %v447_v5, %v745_v3  ;;  %v328_v11 = vadd.f32 %v471_v6, %v745_v3 }
  0xe9   :  { %v449_v12 = vpop.f32.mrf.mxu0  ;;  %v473_v13 = vpop.f32.mrf.mxu1 }
  0xea   :  { %vm336_vm0 = vcmp.ge.f32.partialorder %v320_v10, 0.0  ;;  %v359_v14 = vmul.f32 %v750_v7, %v320_v10  ;;  %vm344_vm1 = vcmp.ge.f32.partialorder %v328_v11, 0.0  ;;  %v367_v15 = vmul.f32 %v750_v7, %v328_v11 }
  0xeb   :  { %v450_v16 = vadd.f32 %v449_v12, %v448_v8  ;;  %v474_v17 = vadd.f32 %v473_v13, %v472_v9  ;;  %v451_v18 = vpop.f32.mrf.mxu0  ;;  %v475_v19 = vpop.f32.mrf.mxu1 }
  0xec   :  { %v375_v20 = vsel %vm336_vm0, %v320_v10, %v359_v14  ;;  %v383_v21 = vsel %vm344_vm1, %v328_v11, %v367_v15 }
  0xed   :  { %391 = vst [vmem:[%s836_s4] sm:$0xff] %v375_v20  ;;  %399 = vst [vmem:[%s836_s4 + $0x40] sm:$0xff] %v383_v21  ;;  %v321_v22 = vadd.f32 %v450_v16, %v745_v3  ;;  %v329_v23 = vadd.f32 %v474_v17, %v745_v3  ;;  %v452_v24 = vpop.f32.mrf.mxu0  ;;  %v476_v25 = vpop.f32.mrf.mxu1 }
  0xee   :  { %v453_v26 = vadd.f32 %v452_v24, %v451_v18  ;;  %v477_v27 = vadd.f32 %v476_v25, %v475_v19 }
  0xef   :  { %vm337_vm2 = vcmp.ge.f32.partialorder %v321_v22, 0.0  ;;  %v360_v28 = vmul.f32 %v750_v7, %v321_v22  ;;  %vm345_vm3 = vcmp.ge.f32.partialorder %v329_v23, 0.0  ;;  %v368_v29 = vmul.f32 %v750_v7, %v329_v23  ;;  %v454_v30 = vpop.f32.mrf.mxu0  ;;  %v478_v31 = vpop.f32.mrf.mxu1 }
  0xf0   :  { %v322_v32 = vadd.f32 %v453_v26, %v745_v3  ;;  %v330_v33 = vadd.f32 %v477_v27, %v745_v3 }
  0xf1   :  { %v376_v34 = vsel %vm337_vm2, %v321_v22, %v360_v28  ;;  %v384_v35 = vsel %vm345_vm3, %v329_v23, %v368_v29  ;;  %v455_v36 = vpop.f32.mrf.mxu0  ;;  %v479_v37 = vpop.f32.mrf.mxu1 }
  0xf2   :  { %392 = vst [vmem:[%s836_s4 + $0x8] sm:$0xff] %v376_v34  ;;  %400 = vst [vmem:[%s836_s4 + $0x48] sm:$0xff] %v384_v35  ;;  %vm338_vm4 = vcmp.ge.f32.partialorder %v322_v32, 0.0  ;;  %v361_v38 = vmul.f32 %v750_v7, %v322_v32  ;;  %vm346_vm5 = vcmp.ge.f32.partialorder %v330_v33, 0.0  ;;  %v369_v39 = vmul.f32 %v750_v7, %v330_v33 }
  0xf3   :  { %v456_v40 = vadd.f32 %v455_v36, %v454_v30  ;;  %v480_v41 = vadd.f32 %v479_v37, %v478_v31  ;;  %v457_v42 = vpop.f32.mrf.mxu0  ;;  %v481_v43 = vpop.f32.mrf.mxu1 }
  0xf4   :  { %v377_v44 = vsel %vm338_vm4, %v322_v32, %v361_v38  ;;  %v385_v45 = vsel %vm346_vm5, %v330_v33, %v369_v39 }
  0xf5   :  { %393 = vst [vmem:[%s836_s4 + $0x10] sm:$0xff] %v377_v44  ;;  %401 = vst [vmem:[%s836_s4 + $0x50] sm:$0xff] %v385_v45  ;;  %v323_v46 = vadd.f32 %v456_v40, %v745_v3  ;;  %v331_v47 = vadd.f32 %v480_v41, %v745_v3  ;;  %v458_v48 = vpop.f32.mrf.mxu0  ;;  %v482_v49 = vpop.f32.mrf.mxu1 }
  0xf6   :  { %v459_v50 = vadd.f32 %v458_v48, %v457_v42  ;;  %v483_v51 = vadd.f32 %v482_v49, %v481_v43 }
  0xf7   :  { %vm339_vm6 = vcmp.ge.f32.partialorder %v323_v46, 0.0  ;;  %v362_v52 = vmul.f32 %v750_v7, %v323_v46  ;;  %vm347_vm7 = vcmp.ge.f32.partialorder %v331_v47, 0.0  ;;  %v370_v53 = vmul.f32 %v750_v7, %v331_v47  ;;  %v460_v54 = vpop.f32.mrf.mxu0  ;;  %v484_v55 = vpop.f32.mrf.mxu1 }
  0xf8   :  { %v324_v56 = vadd.f32 %v459_v50, %v745_v3  ;;  %v332_v57 = vadd.f32 %v483_v51, %v745_v3 }
  0xf9   :  { %v378_v58 = vsel %vm339_vm6, %v323_v46, %v362_v52  ;;  %v386_v59 = vsel %vm347_vm7, %v331_v47, %v370_v53  ;;  %v461_v60 = vpop.f32.mrf.mxu0  ;;  %v485_v61 = vpop.f32.mrf.mxu1 }
  0xfa   :  { %394 = vst [vmem:[%s836_s4 + $0x18] sm:$0xff] %v378_v58  ;;  %402 = vst [vmem:[%s836_s4 + $0x58] sm:$0xff] %v386_v59  ;;  %vm340_vm8 = vcmp.ge.f32.partialorder %v324_v56, 0.0  ;;  %v363_v62 = vmul.f32 %v750_v7, %v324_v56  ;;  %vm348_vm9 = vcmp.ge.f32.partialorder %v332_v57, 0.0  ;;  %v371_v63 = vmul.f32 %v750_v7, %v332_v57 }
  0xfb   :  { %v462_v0 = vadd.f32 %v461_v60, %v460_v54  ;;  %v486_v1 = vadd.f32 %v485_v61, %v484_v55  ;;  %v463_v2 = vpop.f32.mrf.mxu0  ;;  %v487_v4 = vpop.f32.mrf.mxu1 }
  0xfc   :  { %v379_v5 = vsel %vm340_vm8, %v324_v56, %v363_v62  ;;  %v387_v6 = vsel %vm348_vm9, %v332_v57, %v371_v63 }
  0xfd   :  { %395 = vst [vmem:[%s836_s4 + $0x20] sm:$0xff] %v379_v5  ;;  %403 = vst [vmem:[%s836_s4 + $0x60] sm:$0xff] %v387_v6  ;;  %v325_v8 = vadd.f32 %v462_v0, %v745_v3  ;;  %v333_v9 = vadd.f32 %v486_v1, %v745_v3  ;;  %v464_v10 = vpop.f32.mrf.mxu0  ;;  %v488_v11 = vpop.f32.mrf.mxu1 }
  0xfe   :  { %v465_v12 = vadd.f32 %v464_v10, %v463_v2  ;;  %v489_v13 = vadd.f32 %v488_v11, %v487_v4 }
  0xff   :  { %vm341_vm10 = vcmp.ge.f32.partialorder %v325_v8, 0.0  ;;  %v364_v14 = vmul.f32 %v750_v7, %v325_v8  ;;  %vm349_vm11 = vcmp.ge.f32.partialorder %v333_v9, 0.0  ;;  %v372_v15 = vmul.f32 %v750_v7, %v333_v9  ;;  %v466_v16 = vpop.f32.mrf.mxu0  ;;  %v490_v17 = vpop.f32.mrf.mxu1 }
 0x100   :  { %v326_v18 = vadd.f32 %v465_v12, %v745_v3  ;;  %v334_v19 = vadd.f32 %v489_v13, %v745_v3 }
 0x101   :  { %v380_v20 = vsel %vm341_vm10, %v325_v8, %v364_v14  ;;  %v388_v21 = vsel %vm349_vm11, %v333_v9, %v372_v15  ;;  %v467_v22 = vpop.f32.mrf.mxu0  ;;  %v491_v23 = vpop.f32.mrf.mxu1 }
 0x102   :  { %396 = vst [vmem:[%s836_s4 + $0x28] sm:$0xff] %v380_v20  ;;  %404 = vst [vmem:[%s836_s4 + $0x68] sm:$0xff] %v388_v21  ;;  %vm342_vm12 = vcmp.ge.f32.partialorder %v326_v18, 0.0  ;;  %v365_v24 = vmul.f32 %v750_v7, %v326_v18  ;;  %vm350_vm13 = vcmp.ge.f32.partialorder %v334_v19, 0.0  ;;  %v373_v25 = vmul.f32 %v750_v7, %v334_v19 }
 0x103   :  { %v468_v26 = vadd.f32 %v467_v22, %v466_v16  ;;  %v492_v27 = vadd.f32 %v491_v23, %v490_v17 }
 0x104   :  { %v381_v28 = vsel %vm342_vm12, %v326_v18, %v365_v24  ;;  %v389_v29 = vsel %vm350_vm13, %v334_v19, %v373_v25 }
 0x105   :  { %397 = vst [vmem:[%s836_s4 + $0x30] sm:$0xff] %v381_v28  ;;  %405 = vst [vmem:[%s836_s4 + $0x70] sm:$0xff] %v389_v29  ;;  %v327_v30 = vadd.f32 %v468_v26, %v745_v3  ;;  %v335_v31 = vadd.f32 %v492_v27, %v745_v3 }
 0x107   :  { %vm343_vm14 = vcmp.ge.f32.partialorder %v327_v30, 0.0  ;;  %v366_v32 = vmul.f32 %v750_v7, %v327_v30  ;;  %vm351_vm15 = vcmp.ge.f32.partialorder %v335_v31, 0.0  ;;  %v374_v33 = vmul.f32 %v750_v7, %v335_v31 }
 0x109   :  { %v382_v34 = vsel %vm343_vm14, %v327_v30, %v366_v32  ;;  %v390_v35 = vsel %vm351_vm15, %v335_v31, %v374_v33 }
 0x10a   :  { %398 = vst [vmem:[%s836_s4 + $0x38] sm:$0xff] %v382_v34  ;;  %406 = vst [vmem:[%s836_s4 + $0x78] sm:$0xff] %v390_v35 }

</bundles_post_ra>
